<compile_context>
chip_gen: v6e
topology: v6e:2x2x1
jax: 0.10.0
libtpu: 0.0.40
codegen_flags: <defaults>
</compile_context>

<pallas_src>
import jax
import jax.numpy as jnp
from jax.experimental import pallas as pl
from jax.experimental.pallas import tpu as pltpu


# ----------------------------- in-kernel helpers ----------------------------

def _pool(act, col_step, row_step, out_len):
    """2x2 / stride-2 max pool in the flat (dilated) frame: two shifted maxima."""
    n = act.shape[1]
    a = jnp.maximum(act[:, :n - col_step], act[:, col_step:])
    return jnp.maximum(a[:, :out_len], a[:, row_step:row_step + out_len])


def _stack_taps(act, taps, out_len):
    """Stack shifted windows along the contraction (sublane) axis -> one matmul."""
    return jnp.concatenate([act[:, o:o + out_len] for o in taps], axis=0)


# --------------------------------- kernel -----------------------------------

def _lenet_kernel(x_ref, w1_ref, w2_ref, w3_ref, f1_ref, f2_ref, out_ref):
    bsub = x_ref.shape[0]
    w1, w2, w3 = w1_ref[...], w2_ref[...], w3_ref[...]
    f1, f2 = f1_ref[...], f2_ref[...]
    cdt = w1.dtype                                   # matmul operand dtype (bf16/f32)

    # Tap offsets in the flat frame (column index r = 32*h + w of the original
    # 32x32 image; later layers live on the (64,2)/(128,4)-strided lattices).
    taps1 = tuple(32 * kh + kw for kh in range(3) for kw in range(3))
    taps2 = tuple(64 * kh + 2 * kw for kh in range(4) for kw in range(4))
    taps3 = tuple(128 * kh + 4 * kw for kh in range(3) for kw in range(3))
    taps4 = tuple(128 * h + 4 * w for h in range(4) for w in range(4))

    lane = jax.lax.broadcasted_iota(jnp.int32, (1, bsub), 1)

    def one_image(i, hidden):
        # conv1 3x3 (valid 30x30 at r = 32h + w) + ReLU.  Stacked rhs is built
        # in fp32 (3-row pieces), cast once, then one K=27 matmul.
        x = x_ref[i]                                                # (3, 1024) f32
        rhs = _stack_taps(x, taps1, 958).astype(cdt)                # (27, 958)
        o = jnp.maximum(jnp.dot(w1, rhs, preferred_element_type=jnp.float32), 0.0)
        p = _pool(o, 1, 32, 925).astype(cdt)                        # (16, 925)

        # conv2 4x4 on the (64, 2) lattice (valid 12x12) + ReLU, K = 256.
        rhs = _stack_taps(p, taps2, 727)                            # (256, 727)
        o = jnp.maximum(jnp.dot(w2, rhs, preferred_element_type=jnp.float32), 0.0)
        p = _pool(o, 2, 64, 661).astype(cdt)                        # (32, 661)

        # conv3 3x3 on the (128, 4) lattice (valid 4x4) + ReLU, K = 288.
        rhs = _stack_taps(p, taps3, 397)                            # (288, 397)
        o = jnp.maximum(jnp.dot(w3, rhs, preferred_element_type=jnp.float32), 0.0)
        o = o.astype(cdt)                                           # (64, 397)

        # fc1 == collapsing the 4x4x64 window at r = 0, K = 1024, + ReLU.
        rhs = _stack_taps(o, taps4, 1)                              # (1024, 1)
        h1 = jnp.maximum(jnp.dot(f1, rhs, preferred_element_type=jnp.float32), 0.0)

        # Scatter this image's hidden column into lane i (cheap VPU one-hot).
        return hidden + h1 * (lane == i).astype(jnp.float32)        # (64, BSUB)

    hidden = jax.lax.fori_loop(0, bsub, one_image,
                               jnp.zeros((64, bsub), jnp.float32))

    # fc2, batched over the whole sub-batch: lane-dense (16, BSUB) output store.
    y = jnp.dot(f2, hidden.astype(cdt), preferred_element_type=jnp.float32)
    out_ref[0] = y.astype(out_ref.dtype)


# ------------------------------ wrapper / params -----------------------------

def lenet_forward(x_nchw, params, *, bsub=64):
    """x_nchw: (B, 3, 32, 32) float32; params from prepare_params()."""
    B = x_nchw.shape[0]
    x = x_nchw.reshape(B, 3, 32 * 32)                 # NCHW is already (C, H*W)

    bsub = max(1, min(bsub, B))                       # images per grid step
    nb = pl.cdiv(B, bsub)                             # keep >= 2 steps on v7x
    bp = nb * bsub
    if bp != B:                                       # pad batch to a full grid
        x = jnp.pad(x, ((0, bp - B), (0, 0), (0, 0)))

    out = pl.pallas_call(
        _lenet_kernel,
        out_shape=jax.ShapeDtypeStruct((nb, 16, bsub), jnp.float32),
        grid=(nb,),
        in_specs=[
            pl.BlockSpec((bsub, 3, 1024), lambda b: (b, 0, 0)),    # sub-batch
            pl.BlockSpec((16, 27), lambda b: (0, 0)),              # conv1 (fused taps)
            pl.BlockSpec((32, 256), lambda b: (0, 0)),             # conv2
            pl.BlockSpec((64, 288), lambda b: (0, 0)),             # conv3
            pl.BlockSpec((64, 1024), lambda b: (0, 0)),            # fc1
            pl.BlockSpec((16, 64), lambda b: (0, 0)),              # fc2
        ],
        out_specs=pl.BlockSpec((1, 16, bsub), lambda b: (b, 0, 0)),
        compiler_params=pltpu.CompilerParams(
            dimension_semantics=("parallel",),        # batch blocks across TCs
            vmem_limit_bytes=32 * 1024 * 1024,        # safe on v5e/v6e/v7x
        ),
    )(x, params["w1"], params["w2"], params["w3"], params["f1"], params["f2"])

    out = jnp.transpose(out, (0, 2, 1)).reshape(bp, 16)
    return out[:B, :10]


def init_params(key):
    """PyTorch-layout weights (same shapes as the nn.Module, no biases)."""
    k1, k2, k3, k4, k5 = jax.random.split(key, 5)
    s = 0.1
    return {
        "conv1": s * jax.random.normal(k1, (16, 3, 3, 3), jnp.float32),
        "conv2": s * jax.random.normal(k2, (32, 16, 4, 4), jnp.float32),
        "conv3": s * jax.random.normal(k3, (64, 32, 3, 3), jnp.float32),
        "fc1":   s * jax.random.normal(k4, (50, 4 * 4 * 64), jnp.float32),
        "fc2":   s * jax.random.normal(k5, (10, 50), jnp.float32),
    }


def prepare_params(raw, compute_dtype=jnp.bfloat16):
    """One-time weight prep: fused-tap layout, zero padding, dtype cast.

    Kernel rhs row order for a conv is (kh*KW + kw)*Cin + c, so weights become
    (Cout, KH*KW*Cin) with the same column order.  fc1's rhs row order is
    (h*4 + w)*64 + c while PyTorch flattens as c*16 + h*4 + w, hence the
    permute.  fc1 out 50->64 and fc2 10x50 -> 16x64 are zero-padded.
    """
    def conv_prep(w):
        o = w.shape[0]
        return jnp.asarray(w.transpose(0, 2, 3, 1).reshape(o, -1), compute_dtype)

    f1 = raw["fc1"].reshape(50, 64, 4, 4).transpose(0, 2, 3, 1).reshape(50, 1024)
    f1 = jnp.pad(f1, ((0, 14), (0, 0)))
    f2 = jnp.pad(raw["fc2"], ((0, 6), (0, 14)))
    return {
        "w1": conv_prep(raw["conv1"]),                 # (16, 27)
        "w2": conv_prep(raw["conv2"]),                 # (32, 256)
        "w3": conv_prep(raw["conv3"]),                 # (64, 288)
        "f1": jnp.asarray(f1, compute_dtype),          # (64, 1024)
        "f2": jnp.asarray(f2, compute_dtype),          # (16, 64)
    }


# ----------------------------- pure-JAX reference ----------------------------

def _maxpool_nchw(y):
    B, C, H, W = y.shape
    return y.reshape(B, C, H // 2, 2, W // 2, 2).max(axis=(3, 5))


def _reference_forward(x, p):
    dn = ("NCHW", "OIHW", "NCHW")
    hi = jax.lax.Precision.HIGHEST
    y = jax.lax.conv_general_dilated(x, p["conv1"], (1, 1), "VALID",
                                     dimension_numbers=dn, precision=hi)
    y = _maxpool_nchw(jnp.maximum(y, 0.0))
    y = jax.lax.conv_general_dilated(y, p["conv2"], (1, 1), "VALID",
                                     dimension_numbers=dn, precision=hi)
    y = _maxpool_nchw(jnp.maximum(y, 0.0))
    y = jax.lax.conv_general_dilated(y, p["conv3"], (1, 1), "VALID",
                                     dimension_numbers=dn, precision=hi)
    y = jnp.maximum(y, 0.0).reshape(y.shape[0], -1)    # PyTorch .view order
    y = jnp.maximum(jnp.dot(y, p["fc1"].T, precision=hi), 0.0)
    return jnp.dot(y, p["fc2"].T, precision=hi)


# ----------------------------------- main ------------------------------------

if __name__ == "__main__":
    key = jax.random.PRNGKey(0)
    kx, kp = jax.random.split(key)
    x = jax.random.normal(kx, (2, 3, 32, 32), jnp.float32)   # CIFAR-shaped, B=2
    raw = init_params(kp)
    ref = _reference_forward(x, raw)

    fwd = jax.jit(lenet_forward)

    # fp32-operand path: tight check of the forward-pass semantics.
    out32 = jax.block_until_ready(fwd(x, prepare_params(raw, jnp.float32)))
    assert out32.shape == (2, 10) and out32.dtype == jnp.float32
    err32 = float(jnp.max(jnp.abs(out32 - ref)))
    assert err32 < 1e-3, f"fp32 kernel/reference mismatch: max abs err {err32}"

    # bf16-operand path (default perf config): scale-relative tolerance.
    outbf = jax.block_until_ready(fwd(x, prepare_params(raw)))
    rel = float(jnp.max(jnp.abs(outbf - ref))) / (float(jnp.max(jnp.abs(ref))) + 1e-3)
    assert rel < 0.1, f"bf16 kernel/reference mismatch: rel err {rel}"

    print("KERNEL_OK")
</pallas_src>

<mosaic_0001>
module attributes {stable_mosaic.version = 11 : i64} {
  func.func @_lenet_kernel(%arg0: i32, %arg1: memref<2x3x1024xf32, #tpu.memory_space<vmem>>, %arg2: memref<16x27xf32, #tpu.memory_space<vmem>>, %arg3: memref<32x256xf32, #tpu.memory_space<vmem>>, %arg4: memref<64x288xf32, #tpu.memory_space<vmem>>, %arg5: memref<64x1024xf32, #tpu.memory_space<vmem>>, %arg6: memref<16x64xf32, #tpu.memory_space<vmem>>, %arg7: memref<1x16x2xf32, #tpu.memory_space<vmem>>) attributes {dimension_semantics = [#tpu.dimension_semantics<parallel>], iteration_bounds = array<i64: 1>, scalar_prefetch = 0 : i64, scratch_operands = 0 : i64, tpu.core_type = #tpu.core_type<tc>, window_params = [{transform_indices = @transform_0, window_bounds = array<i64: 2, 3, 1024>}, {pipeline_mode = #tpu.pipeline_mode<synchronous>, transform_indices = @transform_1, window_bounds = array<i64: 16, 27>}, {pipeline_mode = #tpu.pipeline_mode<synchronous>, transform_indices = @transform_2, window_bounds = array<i64: 32, 256>}, {pipeline_mode = #tpu.pipeline_mode<synchronous>, transform_indices = @transform_3, window_bounds = array<i64: 64, 288>}, {pipeline_mode = #tpu.pipeline_mode<synchronous>, transform_indices = @transform_4, window_bounds = array<i64: 64, 1024>}, {pipeline_mode = #tpu.pipeline_mode<synchronous>, transform_indices = @transform_5, window_bounds = array<i64: 16, 64>}, {transform_indices = @transform_6, window_bounds = array<i64: 1, 16, 2>}]} {
    %c0 = arith.constant 0 : index
    %c0_0 = arith.constant 0 : index
    %0 = vector.load %arg2[%c0, %c0_0] : memref<16x27xf32, #tpu.memory_space<vmem>>, vector<16x27xf32>
    %c0_1 = arith.constant 0 : index
    %c0_2 = arith.constant 0 : index
    %1 = vector.load %arg3[%c0_1, %c0_2] : memref<32x256xf32, #tpu.memory_space<vmem>>, vector<32x256xf32>
    %c0_3 = arith.constant 0 : index
    %c0_4 = arith.constant 0 : index
    %2 = vector.load %arg4[%c0_3, %c0_4] : memref<64x288xf32, #tpu.memory_space<vmem>>, vector<64x288xf32>
    %c0_5 = arith.constant 0 : index
    %c0_6 = arith.constant 0 : index
    %3 = vector.load %arg5[%c0_5, %c0_6] : memref<64x1024xf32, #tpu.memory_space<vmem>>, vector<64x1024xf32>
    %c0_7 = arith.constant 0 : index
    %c0_8 = arith.constant 0 : index
    %4 = vector.load %arg6[%c0_7, %c0_8] : memref<16x64xf32, #tpu.memory_space<vmem>>, vector<16x64xf32>
    %5 = tpu.iota {dimensions = array<i32: 1>} : vector<1x2xi32>
    %cst = arith.constant 0.000000e+00 : f32
    %6 = vector.broadcast %cst : f32 to vector<64x2xf32>
    %c0_i32 = arith.constant 0 : i32
    %c2_i32 = arith.constant 2 : i32
    %7 = arith.addi %c0_i32, %c2_i32 : i32
    %c1_i32 = arith.constant 1 : i32
    %8 = scf.for %arg8 = %c0_i32 to %7 step %c1_i32 iter_args(%arg9 = %6) -> (vector<64x2xf32>)  : i32 {
      %13 = arith.index_cast %arg8 : i32 to index
      %c0_14 = arith.constant 0 : index
      %c0_15 = arith.constant 0 : index
      %14 = vector.load %arg1[%13, %c0_14, %c0_15] : memref<2x3x1024xf32, #tpu.memory_space<vmem>>, vector<1x3x1024xf32>
      %15 = vector.shape_cast %14 : vector<1x3x1024xf32> to vector<3x1024xf32>
      %16 = vector.extract_strided_slice %15 {offsets = [0, 0], sizes = [3, 958], strides = [1, 1]} : vector<3x1024xf32> to vector<3x958xf32>
      %17 = vector.extract_strided_slice %15 {offsets = [0, 1], sizes = [3, 958], strides = [1, 1]} : vector<3x1024xf32> to vector<3x958xf32>
      %18 = vector.extract_strided_slice %15 {offsets = [0, 2], sizes = [3, 958], strides = [1, 1]} : vector<3x1024xf32> to vector<3x958xf32>
      %19 = vector.extract_strided_slice %15 {offsets = [0, 32], sizes = [3, 958], strides = [1, 1]} : vector<3x1024xf32> to vector<3x958xf32>
      %20 = vector.extract_strided_slice %15 {offsets = [0, 33], sizes = [3, 958], strides = [1, 1]} : vector<3x1024xf32> to vector<3x958xf32>
      %21 = vector.extract_strided_slice %15 {offsets = [0, 34], sizes = [3, 958], strides = [1, 1]} : vector<3x1024xf32> to vector<3x958xf32>
      %22 = vector.extract_strided_slice %15 {offsets = [0, 64], sizes = [3, 958], strides = [1, 1]} : vector<3x1024xf32> to vector<3x958xf32>
      %23 = vector.extract_strided_slice %15 {offsets = [0, 65], sizes = [3, 958], strides = [1, 1]} : vector<3x1024xf32> to vector<3x958xf32>
      %24 = vector.extract_strided_slice %15 {offsets = [0, 66], sizes = [3, 958], strides = [1, 1]} : vector<3x1024xf32> to vector<3x958xf32>
      %25 = tpu.concatenate %16, %17, %18, %19, %20, %21, %22, %23, %24 in 0 : vector<3x958xf32>, vector<3x958xf32>, vector<3x958xf32>, vector<3x958xf32>, vector<3x958xf32>, vector<3x958xf32>, vector<3x958xf32>, vector<3x958xf32>, vector<3x958xf32> -> vector<27x958xf32>
      %cst_16 = arith.constant dense<0.000000e+00> : vector<16x958xf32>
      %26 = tpu.matmul %0, %25, %cst_16 {dimension_numbers = #tpu.dot_dimension_numbers<[1], [0], [0], [1], [0, 0, 1, 1], [], []>} : vector<16x27xf32>, vector<27x958xf32>, vector<16x958xf32> -> vector<16x958xf32>
      %cst_17 = arith.constant 0.000000e+00 : f32
      %27 = vector.broadcast %cst_17 : f32 to vector<16x958xf32>
      %28 = arith.maximumf %26, %27 : vector<16x958xf32>
      %29 = vector.extract_strided_slice %28 {offsets = [0, 0], sizes = [16, 957], strides = [1, 1]} : vector<16x958xf32> to vector<16x957xf32>
      %30 = vector.extract_strided_slice %28 {offsets = [0, 1], sizes = [16, 957], strides = [1, 1]} : vector<16x958xf32> to vector<16x957xf32>
      %31 = arith.maximumf %29, %30 : vector<16x957xf32>
      %32 = vector.extract_strided_slice %31 {offsets = [0, 0], sizes = [16, 925], strides = [1, 1]} : vector<16x957xf32> to vector<16x925xf32>
      %33 = vector.extract_strided_slice %31 {offsets = [0, 32], sizes = [16, 925], strides = [1, 1]} : vector<16x957xf32> to vector<16x925xf32>
      %34 = arith.maximumf %32, %33 : vector<16x925xf32>
      %35 = vector.extract_strided_slice %34 {offsets = [0, 0], sizes = [16, 727], strides = [1, 1]} : vector<16x925xf32> to vector<16x727xf32>
      %36 = vector.extract_strided_slice %34 {offsets = [0, 2], sizes = [16, 727], strides = [1, 1]} : vector<16x925xf32> to vector<16x727xf32>
      %37 = vector.extract_strided_slice %34 {offsets = [0, 4], sizes = [16, 727], strides = [1, 1]} : vector<16x925xf32> to vector<16x727xf32>
      %38 = vector.extract_strided_slice %34 {offsets = [0, 6], sizes = [16, 727], strides = [1, 1]} : vector<16x925xf32> to vector<16x727xf32>
      %39 = vector.extract_strided_slice %34 {offsets = [0, 64], sizes = [16, 727], strides = [1, 1]} : vector<16x925xf32> to vector<16x727xf32>
      %40 = vector.extract_strided_slice %34 {offsets = [0, 66], sizes = [16, 727], strides = [1, 1]} : vector<16x925xf32> to vector<16x727xf32>
      %41 = vector.extract_strided_slice %34 {offsets = [0, 68], sizes = [16, 727], strides = [1, 1]} : vector<16x925xf32> to vector<16x727xf32>
      %42 = vector.extract_strided_slice %34 {offsets = [0, 70], sizes = [16, 727], strides = [1, 1]} : vector<16x925xf32> to vector<16x727xf32>
      %43 = vector.extract_strided_slice %34 {offsets = [0, 128], sizes = [16, 727], strides = [1, 1]} : vector<16x925xf32> to vector<16x727xf32>
      %44 = vector.extract_strided_slice %34 {offsets = [0, 130], sizes = [16, 727], strides = [1, 1]} : vector<16x925xf32> to vector<16x727xf32>
      %45 = vector.extract_strided_slice %34 {offsets = [0, 132], sizes = [16, 727], strides = [1, 1]} : vector<16x925xf32> to vector<16x727xf32>
      %46 = vector.extract_strided_slice %34 {offsets = [0, 134], sizes = [16, 727], strides = [1, 1]} : vector<16x925xf32> to vector<16x727xf32>
      %47 = vector.extract_strided_slice %34 {offsets = [0, 192], sizes = [16, 727], strides = [1, 1]} : vector<16x925xf32> to vector<16x727xf32>
      %48 = vector.extract_strided_slice %34 {offsets = [0, 194], sizes = [16, 727], strides = [1, 1]} : vector<16x925xf32> to vector<16x727xf32>
      %49 = vector.extract_strided_slice %34 {offsets = [0, 196], sizes = [16, 727], strides = [1, 1]} : vector<16x925xf32> to vector<16x727xf32>
      %50 = vector.extract_strided_slice %34 {offsets = [0, 198], sizes = [16, 727], strides = [1, 1]} : vector<16x925xf32> to vector<16x727xf32>
      %51 = tpu.concatenate %35, %36, %37, %38, %39, %40, %41, %42, %43, %44, %45, %46, %47, %48, %49, %50 in 0 : vector<16x727xf32>, vector<16x727xf32>, vector<16x727xf32>, vector<16x727xf32>, vector<16x727xf32>, vector<16x727xf32>, vector<16x727xf32>, vector<16x727xf32>, vector<16x727xf32>, vector<16x727xf32>, vector<16x727xf32>, vector<16x727xf32>, vector<16x727xf32>, vector<16x727xf32>, vector<16x727xf32>, vector<16x727xf32> -> vector<256x727xf32>
      %cst_18 = arith.constant dense<0.000000e+00> : vector<32x727xf32>
      %52 = tpu.matmul %1, %51, %cst_18 {dimension_numbers = #tpu.dot_dimension_numbers<[1], [0], [0], [1], [0, 0, 1, 1], [], []>} : vector<32x256xf32>, vector<256x727xf32>, vector<32x727xf32> -> vector<32x727xf32>
      %cst_19 = arith.constant 0.000000e+00 : f32
      %53 = vector.broadcast %cst_19 : f32 to vector<32x727xf32>
      %54 = arith.maximumf %52, %53 : vector<32x727xf32>
      %55 = vector.extract_strided_slice %54 {offsets = [0, 0], sizes = [32, 725], strides = [1, 1]} : vector<32x727xf32> to vector<32x725xf32>
      %56 = vector.extract_strided_slice %54 {offsets = [0, 2], sizes = [32, 725], strides = [1, 1]} : vector<32x727xf32> to vector<32x725xf32>
      %57 = arith.maximumf %55, %56 : vector<32x725xf32>
      %58 = vector.extract_strided_slice %57 {offsets = [0, 0], sizes = [32, 661], strides = [1, 1]} : vector<32x725xf32> to vector<32x661xf32>
      %59 = vector.extract_strided_slice %57 {offsets = [0, 64], sizes = [32, 661], strides = [1, 1]} : vector<32x725xf32> to vector<32x661xf32>
      %60 = arith.maximumf %58, %59 : vector<32x661xf32>
      %61 = vector.extract_strided_slice %60 {offsets = [0, 0], sizes = [32, 397], strides = [1, 1]} : vector<32x661xf32> to vector<32x397xf32>
      %62 = vector.extract_strided_slice %60 {offsets = [0, 4], sizes = [32, 397], strides = [1, 1]} : vector<32x661xf32> to vector<32x397xf32>
      %63 = vector.extract_strided_slice %60 {offsets = [0, 8], sizes = [32, 397], strides = [1, 1]} : vector<32x661xf32> to vector<32x397xf32>
      %64 = vector.extract_strided_slice %60 {offsets = [0, 128], sizes = [32, 397], strides = [1, 1]} : vector<32x661xf32> to vector<32x397xf32>
      %65 = vector.extract_strided_slice %60 {offsets = [0, 132], sizes = [32, 397], strides = [1, 1]} : vector<32x661xf32> to vector<32x397xf32>
      %66 = vector.extract_strided_slice %60 {offsets = [0, 136], sizes = [32, 397], strides = [1, 1]} : vector<32x661xf32> to vector<32x397xf32>
      %67 = vector.extract_strided_slice %60 {offsets = [0, 256], sizes = [32, 397], strides = [1, 1]} : vector<32x661xf32> to vector<32x397xf32>
      %68 = vector.extract_strided_slice %60 {offsets = [0, 260], sizes = [32, 397], strides = [1, 1]} : vector<32x661xf32> to vector<32x397xf32>
      %69 = vector.extract_strided_slice %60 {offsets = [0, 264], sizes = [32, 397], strides = [1, 1]} : vector<32x661xf32> to vector<32x397xf32>
      %70 = tpu.concatenate %61, %62, %63, %64, %65, %66, %67, %68, %69 in 0 : vector<32x397xf32>, vector<32x397xf32>, vector<32x397xf32>, vector<32x397xf32>, vector<32x397xf32>, vector<32x397xf32>, vector<32x397xf32>, vector<32x397xf32>, vector<32x397xf32> -> vector<288x397xf32>
      %cst_20 = arith.constant dense<0.000000e+00> : vector<64x397xf32>
      %71 = tpu.matmul %2, %70, %cst_20 {dimension_numbers = #tpu.dot_dimension_numbers<[1], [0], [0], [1], [0, 0, 1, 1], [], []>} : vector<64x288xf32>, vector<288x397xf32>, vector<64x397xf32> -> vector<64x397xf32>
      %cst_21 = arith.constant 0.000000e+00 : f32
      %72 = vector.broadcast %cst_21 : f32 to vector<64x397xf32>
      %73 = arith.maximumf %71, %72 : vector<64x397xf32>
      %74 = vector.extract_strided_slice %73 {offsets = [0, 0], sizes = [64, 1], strides = [1, 1]} : vector<64x397xf32> to vector<64x1xf32>
      %75 = vector.extract_strided_slice %73 {offsets = [0, 4], sizes = [64, 1], strides = [1, 1]} : vector<64x397xf32> to vector<64x1xf32>
      %76 = vector.extract_strided_slice %73 {offsets = [0, 8], sizes = [64, 1], strides = [1, 1]} : vector<64x397xf32> to vector<64x1xf32>
      %77 = vector.extract_strided_slice %73 {offsets = [0, 12], sizes = [64, 1], strides = [1, 1]} : vector<64x397xf32> to vector<64x1xf32>
      %78 = vector.extract_strided_slice %73 {offsets = [0, 128], sizes = [64, 1], strides = [1, 1]} : vector<64x397xf32> to vector<64x1xf32>
      %79 = vector.extract_strided_slice %73 {offsets = [0, 132], sizes = [64, 1], strides = [1, 1]} : vector<64x397xf32> to vector<64x1xf32>
      %80 = vector.extract_strided_slice %73 {offsets = [0, 136], sizes = [64, 1], strides = [1, 1]} : vector<64x397xf32> to vector<64x1xf32>
      %81 = vector.extract_strided_slice %73 {offsets = [0, 140], sizes = [64, 1], strides = [1, 1]} : vector<64x397xf32> to vector<64x1xf32>
      %82 = vector.extract_strided_slice %73 {offsets = [0, 256], sizes = [64, 1], strides = [1, 1]} : vector<64x397xf32> to vector<64x1xf32>
      %83 = vector.extract_strided_slice %73 {offsets = [0, 260], sizes = [64, 1], strides = [1, 1]} : vector<64x397xf32> to vector<64x1xf32>
      %84 = vector.extract_strided_slice %73 {offsets = [0, 264], sizes = [64, 1], strides = [1, 1]} : vector<64x397xf32> to vector<64x1xf32>
      %85 = vector.extract_strided_slice %73 {offsets = [0, 268], sizes = [64, 1], strides = [1, 1]} : vector<64x397xf32> to vector<64x1xf32>
      %86 = vector.extract_strided_slice %73 {offsets = [0, 384], sizes = [64, 1], strides = [1, 1]} : vector<64x397xf32> to vector<64x1xf32>
      %87 = vector.extract_strided_slice %73 {offsets = [0, 388], sizes = [64, 1], strides = [1, 1]} : vector<64x397xf32> to vector<64x1xf32>
      %88 = vector.extract_strided_slice %73 {offsets = [0, 392], sizes = [64, 1], strides = [1, 1]} : vector<64x397xf32> to vector<64x1xf32>
      %89 = vector.extract_strided_slice %73 {offsets = [0, 396], sizes = [64, 1], strides = [1, 1]} : vector<64x397xf32> to vector<64x1xf32>
      %90 = tpu.concatenate %74, %75, %76, %77, %78, %79, %80, %81, %82, %83, %84, %85, %86, %87, %88, %89 in 0 : vector<64x1xf32>, vector<64x1xf32>, vector<64x1xf32>, vector<64x1xf32>, vector<64x1xf32>, vector<64x1xf32>, vector<64x1xf32>, vector<64x1xf32>, vector<64x1xf32>, vector<64x1xf32>, vector<64x1xf32>, vector<64x1xf32>, vector<64x1xf32>, vector<64x1xf32>, vector<64x1xf32>, vector<64x1xf32> -> vector<1024x1xf32>
      %cst_22 = arith.constant dense<0.000000e+00> : vector<64x1xf32>
      %91 = tpu.matmul %3, %90, %cst_22 {dimension_numbers = #tpu.dot_dimension_numbers<[1], [0], [0], [1], [0, 0, 1, 1], [], []>} : vector<64x1024xf32>, vector<1024x1xf32>, vector<64x1xf32> -> vector<64x1xf32>
      %cst_23 = arith.constant 0.000000e+00 : f32
      %92 = vector.broadcast %cst_23 : f32 to vector<64x1xf32>
      %93 = arith.maximumf %91, %92 : vector<64x1xf32>
      %94 = vector.broadcast %arg8 : i32 to vector<1x2xi32>
      %95 = arith.cmpi eq, %5, %94 : vector<1x2xi32>
      %96 = arith.extui %95 : vector<1x2xi1> to vector<1x2xi32>
      %97 = arith.sitofp %96 : vector<1x2xi32> to vector<1x2xf32>
      %98 = vector.broadcast %93 : vector<64x1xf32> to vector<64x2xf32>
      %99 = vector.broadcast %97 : vector<1x2xf32> to vector<64x2xf32>
      %100 = arith.mulf %98, %99 : vector<64x2xf32>
      %101 = arith.addf %arg9, %100 : vector<64x2xf32>
      scf.yield %101 : vector<64x2xf32>
    }
    %c2_i32_9 = arith.constant 2 : i32
    %cst_10 = arith.constant dense<0.000000e+00> : vector<16x2xf32>
    %9 = tpu.matmul %4, %8, %cst_10 {dimension_numbers = #tpu.dot_dimension_numbers<[1], [0], [0], [1], [0, 0, 1, 1], [], []>} : vector<16x64xf32>, vector<64x2xf32>, vector<16x2xf32> -> vector<16x2xf32>
    %c0_11 = arith.constant 0 : index
    %c0_12 = arith.constant 0 : index
    %c0_13 = arith.constant 0 : index
    %10 = vector.load %arg7[%c0_11, %c0_12, %c0_13] : memref<1x16x2xf32, #tpu.memory_space<vmem>>, vector<1x16x2xf32>
    %11 = vector.shape_cast %10 : vector<1x16x2xf32> to vector<16x2xf32>
    %12 = vector.shape_cast %9 : vector<16x2xf32> to vector<1x16x2xf32>
    tpu.vector_store %arg7[%c0_11, %c0_12, %c0_13], %12 {strides = array<i32>} : memref<1x16x2xf32, #tpu.memory_space<vmem>>, vector<1x16x2xf32>,
    return
  }
  func.func @transform_0(%arg0: i32) -> (i32, i32, i32) {
    %c0_i32 = arith.constant 0 : i32
    %c0_i32_0 = arith.constant 0 : i32
    %c0_i32_1 = arith.constant 0 : i32
    return %arg0, %c0_i32, %c0_i32_0 : i32, i32, i32
  }
  func.func @transform_1(%arg0: i32) -> (i32, i32) {
    %c0_i32 = arith.constant 0 : i32
    %c0_i32_0 = arith.constant 0 : i32
    %c0_i32_1 = arith.constant 0 : i32
    return %c0_i32, %c0_i32_0 : i32, i32
  }
  func.func @transform_2(%arg0: i32) -> (i32, i32) {
    %c0_i32 = arith.constant 0 : i32
    %c0_i32_0 = arith.constant 0 : i32
    %c0_i32_1 = arith.constant 0 : i32
    return %c0_i32, %c0_i32_0 : i32, i32
  }
  func.func @transform_3(%arg0: i32) -> (i32, i32) {
    %c0_i32 = arith.constant 0 : i32
    %c0_i32_0 = arith.constant 0 : i32
    %c0_i32_1 = arith.constant 0 : i32
    return %c0_i32, %c0_i32_0 : i32, i32
  }
  func.func @transform_4(%arg0: i32) -> (i32, i32) {
    %c0_i32 = arith.constant 0 : i32
    %c0_i32_0 = arith.constant 0 : i32
    %c0_i32_1 = arith.constant 0 : i32
    return %c0_i32, %c0_i32_0 : i32, i32
  }
  func.func @transform_5(%arg0: i32) -> (i32, i32) {
    %c0_i32 = arith.constant 0 : i32
    %c0_i32_0 = arith.constant 0 : i32
    %c0_i32_1 = arith.constant 0 : i32
    return %c0_i32, %c0_i32_0 : i32, i32
  }
  func.func @transform_6(%arg0: i32) -> (i32, i32, i32) {
    %c0_i32 = arith.constant 0 : i32
    %c0_i32_0 = arith.constant 0 : i32
    %c0_i32_1 = arith.constant 0 : i32
    return %arg0, %c0_i32, %c0_i32_0 : i32, i32, i32
  }
}

</mosaic_0001>

<bundles_post_ra>
// kernel: lenet_forward.1
= control target key start
LH: loop header
LB: loop body
LE: loop exit
PB: predicated region body
PF: predicated region fallthrough
CT: control target
= control target key end

     0   :  { %11 = vsyncpa [#allocation3], 0  ;;  %s7591_s0 = inlined_call_operand.vmem [shape: f32[2,3,1024], index: 0, kind: input, shape index: {}]   ;;  %s7592_s1 = inlined_call_operand.hbm [shape: f32[16,27], index: 1, kind: input, shape index: {}]   ;;  %s7593_s2 = inlined_call_operand.vmem [shape: f32[32,256], index: 2, kind: input, shape index: {}]   ;;  %s7594_s3 = inlined_call_operand.vmem [shape: f32[64,288], index: 3, kind: input, shape index: {}]   ;;  %s7595_s4 = inlined_call_operand.hbm [shape: f32[64,1024], index: 4, kind: input, shape index: {}]   ;;  %s7596_s5 = inlined_call_operand.hbm [shape: f32[16,64], index: 5, kind: input, shape index: {}]   ;;  %s7597_s6 = inlined_call_operand.vmem [shape: f32[1,16,2], index: 6, kind: output, shape index: {}]  }
   0x1   :  { %12 = vsyncpa [#allocation5], 0  ;;  %s4292_s21 = smov [#allocation4]  }
   0x2   :  { %s36_s22 = sshll.u32 %s4292_s21, 4  ;;  %s37_s22 = int_to_ptr.vmem [resolvable:$true] %s36_s22 }
   0x3   :  { %s4164_s23 = scalar_lea.vmem %s37_s22, 8192  ;;  %p4169_p1 = scmp.lt.s32.totalorder %s37_s22, %s37_s22 }
   0x4   :  { %p4165_p0 = scmp.ne.s32.totalorder %s37_s22, %s4164_s23  ;;  %p4170_p2 = scmp.lt.s32.totalorder %s4164_s23, %s4164_s23 }
   0x6   :  { %p4171_p3 = por %p4170_p2, %p4169_p1 }
   0x8   :  { %p4172_p4 = pnand %p4171_p3, %p4165_p0 }
   0xa   :  { %4175 = shalt.err (!%p4172_p4)
}
   0xb   :  { %s4293_s24 = smov 1024   ;;  %s4294_s25 = smov 64  }
   0xc   :  { %42 = dma.hbm_to_vmem [thread:$0]  %s7595_s4, 8192, %s37_s22, [#allocation5], %s4293_s24, %s4293_s24, %s4294_s25  }
   0xd   :  { %s4295_s28 = smov [#allocation2]  }
   0xe   :  { %s20_s29 = sshll.u32 %s4295_s28, 4  ;;  %s21_s29 = int_to_ptr.vmem [resolvable:$true] %s20_s29 }
   0xf   :  { %s4184_s30 = scalar_lea.vmem %s21_s29, 256  ;;  %p4189_p6 = scmp.lt.s32.totalorder %s21_s29, %s21_s29 }
  0x10   :  { %p4185_p5 = scmp.ne.s32.totalorder %s21_s29, %s4184_s30  ;;  %p4190_p7 = scmp.lt.s32.totalorder %s4184_s30, %s4184_s30 }
  0x12   :  { %p4191_p8 = por %p4190_p7, %p4189_p6 }
  0x14   :  { %p4192_p9 = pnand %p4191_p8, %p4185_p5 }
  0x16   :  { %4195 = shalt.err (!%p4192_p9)
}
  0x17   :  { %s4296_s7 = smov 128   ;;  %s4297_s8 = smov 8  }
  0x18   :  { %26 = dma.hbm_to_vmem [thread:$0]  %s7592_s1, 256, %s21_s29, [#allocation3], %s4296_s7, %s4296_s7, %s4297_s8  }
  0x19   :  { %s4298_s11 = smov [#allocation6]  }
  0x1a   :  { %s48_s12 = sshll.u32 %s4298_s11, 4  ;;  %s49_s12 = int_to_ptr.vmem [resolvable:$true] %s48_s12 }
  0x1b   :  { %s4204_s4 = scalar_lea.vmem %s49_s12, 256  ;;  %p4209_p11 = scmp.lt.s32.totalorder %s49_s12, %s49_s12 }
  0x1c   :  { %p4205_p10 = scmp.ne.s32.totalorder %s49_s12, %s4204_s4  ;;  %p4210_p12 = scmp.lt.s32.totalorder %s4204_s4, %s4204_s4 }
  0x1e   :  { %p4211_p13 = por %p4210_p12, %p4209_p11 }
  0x20   :  { %p4212_p0 = pnand %p4211_p13, %p4205_p10 }
  0x22   :  { %4215 = shalt.err (!%p4212_p0)
}
  0x23   :  { %54 = dma.hbm_to_vmem [thread:$0]  %s7596_s5, 256, %s49_s12, [#allocation5], %s4296_s7, %s4296_s7, %s4297_s8  }
  0x24   :  { %4252 = dma.done.wait [#allocation3], 256  }
  0x25   :  { %4253 = vsyncadd [#allocation3], 4294967040 }
  0x26   :  { %4254 = dma.done.wait [#allocation5], 8448  }
  0x27   :  { %4255 = vsyncadd [#allocation5], 4294958848  ;;  %v164_v0 = vlaneseq  ;;  %v4361_v2 = vld [vmem:[#allocation2] sm:$0xff]  ;;  %v4363_v3 = vld [vmem:[#allocation2 + $0x8] sm:$0xff] }
  0x28   :  { %7700 = vst [vmem:[#allocation10_spill] sm:$0xff] %v4361_v2  ;;  %7701 = vst [vmem:[#allocation11_spill] sm:$0xff] %v4363_v3  ;;  %v4368_v4 = vld [vmem:[%s7593_s2] sm:$0xff]  ;;  %v4373_v5 = vld [vmem:[%s7593_s2 + $0x8] sm:$0xff] }
  0x29   :  { %v4359_v1 = vand.u32 127, %v164_v0  ;;  %7702 = vst [vmem:[#allocation12_spill] sm:$0xff] %v4368_v4  ;;  %7703 = vst [vmem:[#allocation13_spill] sm:$0xff] %v4373_v5  ;;  %v4378_v6 = vld [vmem:[%s7593_s2 + $0x10] sm:$0xff]  ;;  %v4383_v7 = vld [vmem:[%s7593_s2 + $0x18] sm:$0xff] }
  0x2a   :  { %7704 = vst [vmem:[#allocation14_spill] sm:$0xff] %v4378_v6  ;;  %7705 = vst [vmem:[#allocation15_spill] sm:$0xff] %v4383_v7  ;;  %v4388_v8 = vld [vmem:[%s7593_s2 + $0x20] sm:$0xff]  ;;  %v4393_v9 = vld [vmem:[%s7593_s2 + $0x28] sm:$0xff] }
  0x2b   :  { %7699 = vst [vmem:[#allocation9_spill] sm:$0xff] %v4359_v1  ;;  %7706 = vst [vmem:[#allocation16_spill] sm:$0xff] %v4388_v8  ;;  %v4398_v10 = vld [vmem:[%s7593_s2 + $0x30] sm:$0xff]  ;;  %v4403_v11 = vld [vmem:[%s7593_s2 + $0x38] sm:$0xff] }
  0x2c   :  { %7707 = vst [vmem:[#allocation17_spill] sm:$0xff] %v4393_v9  ;;  %7708 = vst [vmem:[#allocation18_spill] sm:$0xff] %v4398_v10  ;;  %v4408_v12 = vld [vmem:[%s7594_s3] sm:$0xff]  ;;  %v4413_v13 = vld [vmem:[%s7594_s3 + $0x8] sm:$0xff] }
  0x2d   :  { %7709 = vst [vmem:[#allocation19_spill] sm:$0xff] %v4403_v11  ;;  %7710 = vst [vmem:[#allocation20_spill] sm:$0xff] %v4408_v12  ;;  %v4418_v14 = vld [vmem:[%s7594_s3 + $0x10] sm:$0xff]  ;;  %v4423_v15 = vld [vmem:[%s7594_s3 + $0x18] sm:$0xff] }
  0x2e   :  { %7711 = vst [vmem:[#allocation21_spill] sm:$0xff] %v4413_v13  ;;  %7712 = vst [vmem:[#allocation22_spill] sm:$0xff] %v4418_v14  ;;  %v4428_v16 = vld [vmem:[%s7594_s3 + $0x20] sm:$0xff]  ;;  %v4433_v17 = vld [vmem:[%s7594_s3 + $0x28] sm:$0xff] }
  0x2f   :  { %7713 = vst [vmem:[#allocation23_spill] sm:$0xff] %v4423_v15  ;;  %7714 = vst [vmem:[#allocation24_spill] sm:$0xff] %v4428_v16  ;;  %v4438_v18 = vld [vmem:[%s7594_s3 + $0x30] sm:$0xff]  ;;  %v4443_v19 = vld [vmem:[%s7594_s3 + $0x38] sm:$0xff] }
  0x30   :  { %7715 = vst [vmem:[#allocation25_spill] sm:$0xff] %v4433_v17  ;;  %7716 = vst [vmem:[#allocation26_spill] sm:$0xff] %v4438_v18  ;;  %v4448_v20 = vld [vmem:[%s7594_s3 + $0x40] sm:$0xff]  ;;  %v4453_v21 = vld [vmem:[%s7594_s3 + $0x48] sm:$0xff] }
  0x31   :  { %7717 = vst [vmem:[#allocation27_spill] sm:$0xff] %v4443_v19  ;;  %7718 = vst [vmem:[#allocation28_spill] sm:$0xff] %v4448_v20  ;;  %v4458_v22 = vld [vmem:[%s7594_s3 + $0x50] sm:$0xff]  ;;  %v4463_v23 = vld [vmem:[%s7594_s3 + $0x58] sm:$0xff] }
  0x32   :  { %7719 = vst [vmem:[#allocation29_spill] sm:$0xff] %v4453_v21  ;;  %7720 = vst [vmem:[#allocation30_spill] sm:$0xff] %v4458_v22  ;;  %v4468_v24 = vld [vmem:[%s7594_s3 + $0x60] sm:$0xff]  ;;  %v4473_v25 = vld [vmem:[%s7594_s3 + $0x68] sm:$0xff] }
  0x33   :  { %7721 = vst [vmem:[#allocation31_spill] sm:$0xff] %v4463_v23  ;;  %7722 = vst [vmem:[#allocation32_spill] sm:$0xff] %v4468_v24  ;;  %v4478_v26 = vld [vmem:[%s7594_s3 + $0x70] sm:$0xff]  ;;  %v4483_v27 = vld [vmem:[%s7594_s3 + $0x78] sm:$0xff] }
  0x34   :  { %7723 = vst [vmem:[#allocation33_spill] sm:$0xff] %v4473_v25  ;;  %7724 = vst [vmem:[#allocation34_spill] sm:$0xff] %v4478_v26  ;;  %v4488_v28 = vld [vmem:[%s7594_s3 + $0x80] sm:$0xff]  ;;  %v4493_v29 = vld [vmem:[%s7594_s3 + $0x88] sm:$0xff] }
  0x35   :  { %7725 = vst [vmem:[#allocation35_spill] sm:$0xff] %v4483_v27  ;;  %7726 = vst [vmem:[#allocation36_spill] sm:$0xff] %v4488_v28  ;;  %v4498_v30 = vld [vmem:[%s7594_s3 + $0x90] sm:$0xff]  ;;  %v4503_v31 = vld [vmem:[%s7594_s3 + $0x98] sm:$0xff] }
  0x36   :  { %7727 = vst [vmem:[#allocation37_spill] sm:$0xff] %v4493_v29  ;;  %7728 = vst [vmem:[#allocation38_spill] sm:$0xff] %v4498_v30  ;;  %v4508_v32 = vld [vmem:[%s7594_s3 + $0xa0] sm:$0xff]  ;;  %v4513_v33 = vld [vmem:[%s7594_s3 + $0xa8] sm:$0xff] }
  0x37   :  { %7729 = vst [vmem:[#allocation39_spill] sm:$0xff] %v4503_v31  ;;  %7730 = vst [vmem:[#allocation40_spill] sm:$0xff] %v4508_v32  ;;  %v4518_v34 = vld [vmem:[%s7594_s3 + $0xb0] sm:$0xff]  ;;  %v4523_v35 = vld [vmem:[%s7594_s3 + $0xb8] sm:$0xff]  ;;  %s4673_s3 = smov 0  }
  0x38   :  { %7731 = vst [vmem:[#allocation41_spill] sm:$0xff] %v4513_v33  ;;  %7732 = vst [vmem:[#allocation42_spill] sm:$0xff] %v4518_v34  ;;  %v4525_v36 = vld [vmem:[#allocation4] sm:$0xff]  ;;  %v4527_v37 = vld [vmem:[#allocation4 + $0x8] sm:$0xff] }
  0x39   :  { %7733 = vst [vmem:[#allocation43_spill] sm:$0xff] %v4523_v35  ;;  %7734 = vst [vmem:[#allocation44_spill] sm:$0xff] %v4525_v36  ;;  %v4529_v38 = vld [vmem:[#allocation4 + $0x10] sm:$0xff]  ;;  %v4531_v39 = vld [vmem:[#allocation4 + $0x18] sm:$0xff] }
  0x3a   :  { %7735 = vst [vmem:[#allocation45_spill] sm:$0xff] %v4527_v37  ;;  %7736 = vst [vmem:[#allocation46_spill] sm:$0xff] %v4529_v38  ;;  %v4533_v40 = vld [vmem:[#allocation4 + $0x20] sm:$0xff]  ;;  %v4535_v41 = vld [vmem:[#allocation4 + $0x28] sm:$0xff] }
  0x3b   :  { %7737 = vst [vmem:[#allocation47_spill] sm:$0xff] %v4531_v39  ;;  %7738 = vst [vmem:[#allocation48_spill] sm:$0xff] %v4533_v40  ;;  %v4537_v42 = vld [vmem:[#allocation4 + $0x30] sm:$0xff]  ;;  %v4539_v43 = vld [vmem:[#allocation4 + $0x38] sm:$0xff] }
  0x3c   :  { %7739 = vst [vmem:[#allocation49_spill] sm:$0xff] %v4535_v41  ;;  %7740 = vst [vmem:[#allocation50_spill] sm:$0xff] %v4537_v42  ;;  %v4541_v44 = vld [vmem:[#allocation4 + $0x40] sm:$0xff]  ;;  %v4543_v45 = vld [vmem:[#allocation4 + $0x48] sm:$0xff] }
  0x3d   :  { %7741 = vst [vmem:[#allocation51_spill] sm:$0xff] %v4539_v43  ;;  %7742 = vst [vmem:[#allocation52_spill] sm:$0xff] %v4541_v44  ;;  %v4545_v46 = vld [vmem:[#allocation4 + $0x50] sm:$0xff]  ;;  %v4547_v47 = vld [vmem:[#allocation4 + $0x58] sm:$0xff] }
  0x3e   :  { %7743 = vst [vmem:[#allocation53_spill] sm:$0xff] %v4543_v45  ;;  %7744 = vst [vmem:[#allocation54_spill] sm:$0xff] %v4545_v46  ;;  %v4549_v48 = vld [vmem:[#allocation4 + $0x60] sm:$0xff]  ;;  %v4551_v49 = vld [vmem:[#allocation4 + $0x68] sm:$0xff] }
  0x3f   :  { %7745 = vst [vmem:[#allocation55_spill] sm:$0xff] %v4547_v47  ;;  %7746 = vst [vmem:[#allocation56_spill] sm:$0xff] %v4549_v48  ;;  %v4553_v50 = vld [vmem:[#allocation4 + $0x70] sm:$0xff]  ;;  %v4555_v51 = vld [vmem:[#allocation4 + $0x78] sm:$0xff] }
  0x40   :  { %7747 = vst [vmem:[#allocation57_spill] sm:$0xff] %v4551_v49  ;;  %7748 = vst [vmem:[#allocation58_spill] sm:$0xff] %v4553_v50  ;;  %v4557_v52 = vld [vmem:[#allocation4 + $0x80] sm:$0xff]  ;;  %v4559_v53 = vld [vmem:[#allocation4 + $0x88] sm:$0xff] }
  0x41   :  { %7749 = vst [vmem:[#allocation59_spill] sm:$0xff] %v4555_v51  ;;  %7750 = vst [vmem:[#allocation60_spill] sm:$0xff] %v4557_v52  ;;  %v4561_v54 = vld [vmem:[#allocation4 + $0x90] sm:$0xff]  ;;  %v4563_v55 = vld [vmem:[#allocation4 + $0x98] sm:$0xff] }
  0x42   :  { %7751 = vst [vmem:[#allocation61_spill] sm:$0xff] %v4559_v53  ;;  %7752 = vst [vmem:[#allocation62_spill] sm:$0xff] %v4561_v54  ;;  %v4565_v56 = vld [vmem:[#allocation4 + $0xa0] sm:$0xff]  ;;  %v4567_v57 = vld [vmem:[#allocation4 + $0xa8] sm:$0xff] }
  0x43   :  { %7753 = vst [vmem:[#allocation63_spill] sm:$0xff] %v4563_v55  ;;  %7754 = vst [vmem:[#allocation64_spill] sm:$0xff] %v4565_v56  ;;  %v4569_v58 = vld [vmem:[#allocation4 + $0xb0] sm:$0xff]  ;;  %v4571_v59 = vld [vmem:[#allocation4 + $0xb8] sm:$0xff] }
  0x44   :  { %7755 = vst [vmem:[#allocation65_spill] sm:$0xff] %v4567_v57  ;;  %7756 = vst [vmem:[#allocation66_spill] sm:$0xff] %v4569_v58  ;;  %v4573_v60 = vld [vmem:[#allocation4 + $0xc0] sm:$0xff]  ;;  %v4575_v61 = vld [vmem:[#allocation4 + $0xc8] sm:$0xff] }
  0x45   :  { %7757 = vst [vmem:[#allocation67_spill] sm:$0xff] %v4571_v59  ;;  %7758 = vst [vmem:[#allocation68_spill] sm:$0xff] %v4573_v60  ;;  %v4577_v62 = vld [vmem:[#allocation4 + $0xd0] sm:$0xff]  ;;  %v4579_v63 = vld [vmem:[#allocation4 + $0xd8] sm:$0xff] }
  0x46   :  { %7759 = vst [vmem:[#allocation69_spill] sm:$0xff] %v4575_v61  ;;  %7760 = vst [vmem:[#allocation70_spill] sm:$0xff] %v4577_v62  ;;  %v4581_v0 = vld [vmem:[#allocation4 + $0xe0] sm:$0xff]  ;;  %v4583_v1 = vld [vmem:[#allocation4 + $0xe8] sm:$0xff] }
  0x47   :  { %7761 = vst [vmem:[#allocation71_spill] sm:$0xff] %v4579_v63  ;;  %7762 = vst [vmem:[#allocation72_spill] sm:$0xff] %v4581_v0  ;;  %v4585_v50 = vld [vmem:[#allocation4 + $0xf0] sm:$0xff]  ;;  %v4587_v56 = vld [vmem:[#allocation4 + $0xf8] sm:$0xff] }
  0x48   :  { %7763 = vst [vmem:[#allocation73_spill] sm:$0xff] %v4583_v1  ;;  %7764 = vst [vmem:[#allocation74_spill] sm:$0xff] %v4585_v50  ;;  %v4589_v51 = vld [vmem:[#allocation4 + $0x100] sm:$0xff]  ;;  %v4591_v58 = vld [vmem:[#allocation4 + $0x108] sm:$0xff] }
  0x49   :  { %7765 = vst [vmem:[#allocation75_spill] sm:$0xff] %v4587_v56  ;;  %7766 = vst [vmem:[#allocation76_spill] sm:$0xff] %v4589_v51  ;;  %v4593_v59 = vld [vmem:[#allocation4 + $0x110] sm:$0xff]  ;;  %v4595_v57 = vld [vmem:[#allocation4 + $0x118] sm:$0xff] }
  0x4a   :  { %7767 = vst [vmem:[#allocation77_spill] sm:$0xff] %v4591_v58  ;;  %7768 = vst [vmem:[#allocation78_spill] sm:$0xff] %v4593_v59  ;;  %v4597_v42 = vld [vmem:[#allocation4 + $0x120] sm:$0xff]  ;;  %v4599_v48 = vld [vmem:[#allocation4 + $0x128] sm:$0xff] }
  0x4b   :  { %7769 = vst [vmem:[#allocation79_spill] sm:$0xff] %v4595_v57  ;;  %7770 = vst [vmem:[#allocation80_spill] sm:$0xff] %v4597_v42  ;;  %v4601_v49 = vld [vmem:[#allocation4 + $0x130] sm:$0xff]  ;;  %v4603_v0 = vld [vmem:[#allocation4 + $0x138] sm:$0xff] }
  0x4c   :  { %7771 = vst [vmem:[#allocation81_spill] sm:$0xff] %v4599_v48  ;;  %7772 = vst [vmem:[#allocation82_spill] sm:$0xff] %v4601_v49  ;;  %v4605_v1 = vld [vmem:[#allocation4 + $0x140] sm:$0xff]  ;;  %v4607_v50 = vld [vmem:[#allocation4 + $0x148] sm:$0xff] }
  0x4d   :  { %7773 = vst [vmem:[#allocation83_spill] sm:$0xff] %v4603_v0  ;;  %7774 = vst [vmem:[#allocation84_spill] sm:$0xff] %v4605_v1  ;;  %v4609_v56 = vld [vmem:[#allocation4 + $0x150] sm:$0xff]  ;;  %v4611_v40 = vld [vmem:[#allocation4 + $0x158] sm:$0xff] }
  0x4e   :  { %7775 = vst [vmem:[#allocation85_spill] sm:$0xff] %v4607_v50  ;;  %7776 = vst [vmem:[#allocation86_spill] sm:$0xff] %v4609_v56  ;;  %v4613_v43 = vld [vmem:[#allocation4 + $0x160] sm:$0xff]  ;;  %v4615_v41 = vld [vmem:[#allocation4 + $0x168] sm:$0xff] }
  0x4f   :  { %7777 = vst [vmem:[#allocation87_spill] sm:$0xff] %v4611_v40  ;;  %7778 = vst [vmem:[#allocation88_spill] sm:$0xff] %v4613_v43  ;;  %v4617_v59 = vld [vmem:[#allocation4 + $0x170] sm:$0xff]  ;;  %v4619_v42 = vld [vmem:[#allocation4 + $0x178] sm:$0xff] }
  0x50   :  { %7779 = vst [vmem:[#allocation89_spill] sm:$0xff] %v4615_v41  ;;  %7780 = vst [vmem:[#allocation90_spill] sm:$0xff] %v4617_v59  ;;  %v4621_v48 = vld [vmem:[#allocation4 + $0x180] sm:$0xff]  ;;  %v4623_v49 = vld [vmem:[#allocation4 + $0x188] sm:$0xff] }
  0x51   :  { %7781 = vst [vmem:[#allocation91_spill] sm:$0xff] %v4619_v42  ;;  %7782 = vst [vmem:[#allocation92_spill] sm:$0xff] %v4621_v48  ;;  %v4625_v0 = vld [vmem:[#allocation4 + $0x190] sm:$0xff]  ;;  %v4627_v1 = vld [vmem:[#allocation4 + $0x198] sm:$0xff] }
  0x52   :  { %7783 = vst [vmem:[#allocation93_spill] sm:$0xff] %v4623_v49  ;;  %7784 = vst [vmem:[#allocation94_spill] sm:$0xff] %v4625_v0  ;;  %v4629_v57 = vld [vmem:[#allocation4 + $0x1a0] sm:$0xff]  ;;  %v4631_v56 = vld [vmem:[#allocation4 + $0x1a8] sm:$0xff] }
  0x53   :  { %7785 = vst [vmem:[#allocation95_spill] sm:$0xff] %v4627_v1  ;;  %7786 = vst [vmem:[#allocation96_spill] sm:$0xff] %v4629_v57  ;;  %v4633_v40 = vld [vmem:[#allocation4 + $0x1b0] sm:$0xff]  ;;  %v4635_v43 = vld [vmem:[#allocation4 + $0x1b8] sm:$0xff] }
  0x54   :  { %7787 = vst [vmem:[#allocation97_spill] sm:$0xff] %v4631_v56  ;;  %7788 = vst [vmem:[#allocation98_spill] sm:$0xff] %v4633_v40  ;;  %v4637_v41 = vld [vmem:[#allocation4 + $0x1c0] sm:$0xff]  ;;  %v4639_v59 = vld [vmem:[#allocation4 + $0x1c8] sm:$0xff] }
  0x55   :  { %7789 = vst [vmem:[#allocation99_spill] sm:$0xff] %v4635_v43  ;;  %7790 = vst [vmem:[#allocation100_spill] sm:$0xff] %v4637_v41  ;;  %v4641_v42 = vld [vmem:[#allocation4 + $0x1d0] sm:$0xff]  ;;  %v4643_v48 = vld [vmem:[#allocation4 + $0x1d8] sm:$0xff]  ;;  %v4657_v43 = vmov 0.0   ;;  %v4659_v41 = vmov 0.0  }
  0x56   :  { %7791 = vst [vmem:[#allocation101_spill] sm:$0xff] %v4639_v59  ;;  %7792 = vst [vmem:[#allocation102_spill] sm:$0xff] %v4641_v42  ;;  %v4645_v49 = vld [vmem:[#allocation4 + $0x1e0] sm:$0xff]  ;;  %v4647_v0 = vld [vmem:[#allocation4 + $0x1e8] sm:$0xff]  ;;  %v4661_v59 = vmov 0.0   ;;  %v4663_v42 = vmov 0.0  }
  0x57   :  { %7793 = vst [vmem:[#allocation103_spill] sm:$0xff] %v4643_v48  ;;  %7794 = vst [vmem:[#allocation104_spill] sm:$0xff] %v4645_v49  ;;  %v4649_v1 = vld [vmem:[#allocation4 + $0x1f0] sm:$0xff]  ;;  %v4651_v57 = vld [vmem:[#allocation4 + $0x1f8] sm:$0xff]  ;;  %v4665_v48 = vmov 0.0   ;;  %v4667_v49 = vmov 0.0  }
  0x58   :  { %7795 = vst [vmem:[#allocation105_spill] sm:$0xff] %v4647_v0  ;;  %7796 = vst [vmem:[#allocation106_spill] sm:$0xff] %v4649_v1  ;;  %v4653_v56 = vld [vmem:[#allocation6] sm:$0xff]  ;;  %v4655_v40 = vld [vmem:[#allocation6 + $0x8] sm:$0xff]  ;;  %v4669_v0 = vmov 0.0   ;;  %v4671_v1 = vmov 0.0  }
  0x59   :  { %7797 = vst [vmem:[#allocation107_spill] sm:$0xff] %v4651_v57  ;;  %7798 = vst [vmem:[#allocation108_spill] sm:$0xff] %v4653_v56 }
  0x5a   :  { %7799 = vst [vmem:[#allocation109_spill] sm:$0xff] %v4655_v40 }
  0x5b LB: > { %v7800_v4 = vld [vmem:[#allocation12_spill] sm:$0xff]  ;;  %v7801_v5 = vld [vmem:[#allocation13_spill] sm:$0xff]  ;;  %v7802_v3 = vld [vmem:[#allocation11_spill] sm:$0xff]  ;;  %7804 = vst [vmem:[#allocation110_spill] sm:$0xff] %v4258_v43  ;;  %s3797_s21 = sshll.u32 %s4290_s3, 5  ;;  %s4299_s25 = smov 64   ;;  %v4270_v42 = vphi %v4663_v42, %v7984_v42   ;;  %v4266_v59 = vphi %v4661_v59, %v7983_v59   ;;  %v4262_v41 = vphi %v4659_v41, %v7982_v41   ;;  %v4258_v43 = vphi %v4657_v43, %v7981_v43   ;;  %s4290_s3 = sphi %s4673_s3, %s171_s3   ;;  %v4286_v1 = vphi %v4671_v1, %v7988_v1   ;;  %v4282_v0 = vphi %v4669_v0, %v7987_v0   ;;  %v4278_v49 = vphi %v4667_v49, %v7986_v49   ;;  %v4274_v48 = vphi %v4665_v48, %v7985_v48  }
  0x5c   : > { %v7803_v2 = vld [vmem:[#allocation10_spill] sm:$0xff]  ;;  %7805 = vst [vmem:[#allocation111_spill] sm:$0xff] %v4262_v41  ;;  %7806 = vst [vmem:[#allocation112_spill] sm:$0xff] %v4266_v59  ;;  %s4706_s24 = scalar_lea.vmem %s7591_s0, %s3797_s21  ;;  %s4300_s26 = smov 94   ;;  %vm491_vm0 = vcmask 506880   ;;  %vm499_vm1 = vcmask 1042432  }
  0x5d   : > { %7807 = vst [vmem:[#allocation113_spill] sm:$0xff] %v4270_v42  ;;  %7808 = vst [vmem:[#allocation114_spill] sm:$0xff] %v4274_v48  ;;  %v4709_v40 = vld [vmem:[%s4706_s24 + $0x8] sm:$0x77]  ;;  %v4712_v56 = vld [vmem:[%s4706_s24] sm:$0x77] }
  0x5e   : > { %7809 = vst [vmem:[#allocation115_spill] sm:$0xff] %v4278_v49  ;;  %7810 = vst [vmem:[#allocation116_spill] sm:$0xff] %v4282_v0  ;;  %v397_v43 = vrot.slane %v4709_v40, 6  ;;  %v357_v41 = vrot.slane %v4709_v40, 1  ;;  %v4720_v59 = vcombine.high %v4712_v56, %v4712_v56  ;;  %s4301_s27 = smov 62   ;;  %s4302_s28 = smov 126  }
  0x5f   : > { %7811 = vst [vmem:[#allocation117_spill] sm:$0xff] %v4286_v1  ;;  %v281_v49 = vrot.slane %v4709_v40, 7  ;;  %s4303_s29 = smov 96   ;;  %s4304_s30 = smov 63   ;;  %v4773_v1 = vld [vmem:[%s4706_s24 + $0x10] sm:$0x77] }
  0x60   : > { %407 = vrot.lane.b32.xlu1 %v397_v43, %s4299_s25  ;;  %367 = vrot.lane.b32.xlu0 %v357_v41, %s4300_s26  ;;  %v396_v42 = vrot.slane %v4720_v59, 6  ;;  %v356_v48 = vrot.slane %v4720_v59, 1  ;;  %v241_v41 = vrot.slane %v4709_v40, 2  ;;  %v240_v43 = vrot.slane %v4720_v59, 2  ;;  %s4305_s7 = smov 95   ;;  %s4307_s8 = smov 127  }
  0x61   : > { %v280_v0 = vrot.slane %v4720_v59, 7  ;;  %v399_v57 = vrot.slane %v4773_v1, 6  ;;  %v4813_v62 = vld [vmem:[%s4706_s24 + $0x18] sm:$0x77]  ;;  %vm419_vm2 = vcmask 523264   ;;  %vm379_vm3 = vcmask 769024  }
  0x62   : > { %v401_v50 = vrot.slane %v4813_v62, 6  ;;  %vm459_vm4 = vcmask 515072   ;;  %vm544_vm5 = vcmask 1041408   ;;  %vm553_vm6 = vcmask 1044480   ;;  %s4308_s9 = smov 58   ;;  %s4309_s10 = smov 60  }
  0x63   : > { %vm303_vm7 = vcmask 785408   ;;  %vm263_vm8 = vcmask 1031168   ;;  %vm517_vm9 = vcmask 1040384   ;;  %vm339_vm10 = vcmask 777216   ;;  %s4310_s11 = smov 122   ;;  %s4311_s12 = smov 124  }
  0x64   : > { %479 = vrot.lane.b32.xlu1 %v4709_v40, %s4301_s27  ;;  %477 = vrot.lane.b32.xlu0 %v4720_v59, %s4301_s27  ;;  %vm526_vm11 = vcmask 1043456   ;;  %vm535_vm12 = vcmask 1046528   ;;  %vm223_vm13 = vcmask 1039360   ;;  %vm508_vm14 = vcmask 1045504   ;;  %v7828_v7 = vld [vmem:[#allocation15_spill] sm:$0xff]  ;;  %v7829_v6 = vld [vmem:[#allocation14_spill] sm:$0xff] }
  0x65   : > { %vm562_vm15 = vcmask 220160   ;;  %v7830_v9 = vld [vmem:[#allocation17_spill] sm:$0xff]  ;;  %v7831_v8 = vld [vmem:[#allocation16_spill] sm:$0xff]  ;;  %s4312_s2 = smov 120   ;;  %s4313_s4 = smov 116  }
  0x68   : > { %405 = vrot.lane.b32.xlu1 %v396_v42, %s4299_s25  ;;  %365 = vrot.lane.b32.xlu0 %v356_v48, %s4300_s26  ;;  %v395_v42 = vrot.slane %v4712_v56, 6  ;;  %v355_v48 = vrot.slane %v4712_v56, 1 }
  0x6c   : > { %251 = vrot.lane.b32.xlu1 %v241_v41, %s4302_s28  ;;  %249 = vrot.lane.b32.xlu0 %v240_v43, %s4302_s28  ;;  %v437_v41 = vrot.slane %v4709_v40, 3  ;;  %v436_v43 = vrot.slane %v4720_v59, 3 }
  0x70   : > { %291 = vrot.lane.b32.xlu1 %v281_v49, %s4303_s29  ;;  %289 = vrot.lane.b32.xlu0 %v280_v0, %s4303_s29  ;;  %v239_v49 = vrot.slane %v4712_v56, 2  ;;  %v279_v0 = vrot.slane %v4712_v56, 7 }
  0x74   : > { %403 = vrot.lane.b32.xlu1 %v395_v42, %s4299_s25  ;;  %363 = vrot.lane.b32.xlu0 %v355_v48, %s4300_s26  ;;  %v435_v42 = vrot.slane %v4712_v56, 3  ;;  %v320_v48 = vcombine.low %v4709_v40, %v4709_v40 }
  0x78   : > { %447 = vrot.lane.b32.xlu1 %v437_v41, %s4304_s30  ;;  %445 = vrot.lane.b32.xlu0 %v436_v43, %s4304_s30  ;;  %v319_v41 = vcombine.low %v4712_v56, %v4712_v56  ;;  %v200_v43 = vrot.slane %v4720_v59, 5 }
  0x7c   : > { %247 = vrot.lane.b32.xlu1 %v239_v49, %s4302_s28  ;;  %475 = vrot.lane.b32.xlu0 %v4712_v56, %s4301_s27  ;;  %v7598_v49 = vmov 0.0  }
  0x7d   : > { %649 = vmatprep.mubr.f32.mxu0 %v7598_v49  ;;  %880 = vmatprep.mubr.f32.mxu1 %v7598_v49 }
  0x80   : > { %325 = vrot.lane.b32.xlu1 %v4712_v56, %s4305_s7  ;;  %287 = vrot.lane.b32.xlu0 %v279_v0, %s4303_s29  ;;  %v201_v0 = vrot.slane %v4709_v40, 5 }
  0x84   : > { %443 = vrot.lane.b32.xlu1 %v435_v42, %s4304_s30  ;;  %327 = vrot.lane.b32.xlu0 %v320_v48, %s4305_s7  ;;  %v199_v42 = vrot.slane %v4712_v56, 5  ;;  %v4770_v48 = vcombine.high %v4709_v40, %v4709_v40 }
  0x86   : > { %v358_v49 = vrot.slane %v4770_v48, 1 }
  0x88   : > { %323 = vrot.lane.b32.xlu0 %v319_v41, %s4305_s7  ;;  %209 = vrot.lane.b32.xlu1 %v200_v43, %s4307_s8  ;;  %v359_v41 = vrot.slane %v4773_v1, 1  ;;  %v398_v43 = vrot.slane %v4770_v48, 6 }
  0x8c   : > { %211 = vrot.lane.b32.xlu0 %v201_v0, %s4307_s8  ;;  %207 = vrot.lane.b32.xlu1 %v199_v42, %s4307_s8  ;;  %v242_v0 = vrot.slane %v4770_v48, 2  ;;  %v282_v42 = vrot.slane %v4770_v48, 7 }
  0x90   : > { %369 = vrot.lane.b32.xlu0 %v358_v49, %s4300_s26  ;;  %371 = vrot.lane.b32.xlu1 %v359_v41, %s4300_s26  ;;  %v243_v49 = vrot.slane %v4773_v1, 2  ;;  %v283_v41 = vrot.slane %v4773_v1, 7 }
  0x94   : > { %409 = vrot.lane.b32.xlu0 %v398_v43, %s4299_s25  ;;  %411 = vrot.lane.b32.xlu1 %v399_v57, %s4299_s25  ;;  %v438_v57 = vrot.slane %v4770_v48, 3  ;;  %v439_v43 = vrot.slane %v4773_v1, 3 }
  0x98   : > { %481 = vrot.lane.b32.xlu0 %v4770_v48, %s4301_s27  ;;  %483 = vrot.lane.b32.xlu1 %v4773_v1, %s4301_s27 }
  0x9c   : > { %253 = vrot.lane.b32.xlu0 %v242_v0, %s4302_s28  ;;  %255 = vrot.lane.b32.xlu1 %v243_v49, %s4302_s28  ;;  %v321_v0 = vcombine.low %v4773_v1, %v4773_v1  ;;  %v202_v49 = vrot.slane %v4770_v48, 5 }
  0xa0   : > { %293 = vrot.lane.b32.xlu0 %v282_v42, %s4303_s29  ;;  %295 = vrot.lane.b32.xlu1 %v283_v41, %s4303_s29  ;;  %v203_v42 = vrot.slane %v4773_v1, 5  ;;  %v4810_v41 = vcombine.high %v4773_v1, %v4773_v1 }
  0xa4   : > { %449 = vrot.lane.b32.xlu0 %v438_v57, %s4304_s30  ;;  %451 = vrot.lane.b32.xlu1 %v439_v43, %s4304_s30  ;;  %v360_v57 = vrot.slane %v4810_v41, 1  ;;  %v361_v43 = vrot.slane %v4813_v62, 1 }
  0xa8   : > { %329 = vrot.lane.b32.xlu0 %v4709_v40, %s4305_s7  ;;  %331 = vrot.lane.b32.xlu1 %v321_v0, %s4305_s7  ;;  %v400_v0 = vrot.slane %v4810_v41, 6 }
  0xac   : > { %213 = vrot.lane.b32.xlu0 %v202_v49, %s4307_s8  ;;  %215 = vrot.lane.b32.xlu1 %v203_v42, %s4307_s8  ;;  %v244_v49 = vrot.slane %v4810_v41, 2  ;;  %v245_v42 = vrot.slane %v4813_v62, 2 }
  0xb0   : > { %373 = vrot.lane.b32.xlu0 %v360_v57, %s4300_s26  ;;  %375 = vrot.lane.b32.xlu1 %v361_v43, %s4300_s26  ;;  %v284_v57 = vrot.slane %v4810_v41, 7  ;;  %v285_v43 = vrot.slane %v4813_v62, 7 }
  0xb4   : > { %413 = vrot.lane.b32.xlu0 %v400_v0, %s4299_s25  ;;  %415 = vrot.lane.b32.xlu1 %v401_v50, %s4299_s25  ;;  %v440_v50 = vrot.slane %v4810_v41, 3  ;;  %v441_v0 = vrot.slane %v4813_v62, 3 }
  0xb8   : > { %485 = vrot.lane.b32.xlu0 %v4810_v41, %s4301_s27  ;;  %487 = vrot.lane.b32.xlu1 %v4813_v62, %s4301_s27 }
  0xbc   : > { %257 = vrot.lane.b32.xlu0 %v244_v49, %s4302_s28  ;;  %259 = vrot.lane.b32.xlu1 %v245_v42, %s4302_s28  ;;  %v322_v49 = vcombine.low %v4813_v62, %v4813_v62  ;;  %v204_v42 = vrot.slane %v4810_v41, 5 }
  0xc0   : > { %297 = vrot.lane.b32.xlu0 %v284_v57, %s4303_s29  ;;  %299 = vrot.lane.b32.xlu1 %v285_v43, %s4303_s29  ;;  %v205_v57 = vrot.slane %v4813_v62, 5  ;;  %v4850_v43 = vcombine.high %v4813_v62, %v4813_v62 }
  0xc4   : > { %453 = vrot.lane.b32.xlu0 %v440_v50, %s4304_s30  ;;  %455 = vrot.lane.b32.xlu1 %v441_v0, %s4304_s30  ;;  %v362_v50 = vrot.slane %v4850_v43, 1  ;;  %v402_v0 = vrot.slane %v4850_v43, 6 }
  0xc8   : > { %333 = vrot.lane.b32.xlu0 %v4773_v1, %s4305_s7  ;;  %335 = vrot.lane.b32.xlu1 %v322_v49, %s4305_s7  ;;  %v246_v49 = vrot.slane %v4850_v43, 2 }
  0xcc   : > { %217 = vrot.lane.b32.xlu0 %v204_v42, %s4307_s8  ;;  %219 = vrot.lane.b32.xlu1 %v205_v57, %s4307_s8  ;;  %v286_v42 = vrot.slane %v4850_v43, 7  ;;  %v442_v57 = vrot.slane %v4850_v43, 3 }
  0xd0   : > { %377 = vrot.lane.b32.xlu0 %v362_v50, %s4300_s26  ;;  %417 = vrot.lane.b32.xlu1 %v402_v0, %s4299_s25 }
  0xd2   : > { %v4859_v51 = vpop.permute.xlu1 %407  ;;  %v4861_v63 = vpop.permute.xlu0 %367 }
  0xd4   : > { %489 = vrot.lane.b32.xlu0 %v4850_v43, %s4301_s27  ;;  %261 = vrot.lane.b32.xlu1 %v246_v49, %s4302_s28  ;;  %v206_v49 = vrot.slane %v4850_v43, 5 }
  0xd6   : > { %v4868_v50 = vpop.permute.xlu1 %479  ;;  %v478_v0 = vpop.permute.xlu0 %477 }
  0xd7   : > { %v493_v54 = vsel %vm491_vm0, %v478_v0, %v4868_v50 }
  0xd8   : > { %3762 = vmatprep.subr.msk.mxu0 %vm499_vm1, %v493_v54  ;;  %301 = vrot.lane.b32.xlu0 %v286_v42, %s4303_s29 }
  0xd9   : > { %457 = vrot.lane.b32.xlu1 %v442_v57, %s4304_s30 }
  0xda   : > { %v406_v58 = vpop.permute.xlu1 %405  ;;  %v366_v60 = vpop.permute.xlu0 %365 }
  0xdb   : > { %v421_v38 = vsel %vm419_vm2, %v406_v58, %v4859_v51 }
  0xdc   : > { %337 = vrot.lane.b32.xlu0 %v4813_v62, %s4305_s7 }
  0xdd   : > { %221 = vrot.lane.b32.xlu1 %v206_v49, %s4307_s8  ;;  %v381_v49 = vsel %vm379_vm3, %v366_v60, %v4861_v63 }
  0xde   : > { %v4879_v55 = vpop.permute.xlu1 %251  ;;  %v250_v46 = vpop.permute.xlu0 %249  ;;  %v546_v39 = vsel %vm544_vm5, %v381_v49, %v421_v38 }
  0xe2   : > { %v4881_v61 = vpop.permute.xlu1 %291  ;;  %v290_v52 = vpop.permute.xlu0 %289 }
  0xe3   : > { %v305_v34 = vsel %vm303_vm7, %v290_v52, %v4881_v61 }
  0xe6   : > { %v404_v54 = vpop.permute.xlu1 %403  ;;  %v364_v47 = vpop.permute.xlu0 %363 }
  0xe7   : > { %v420_v30 = vsel %vm419_vm2, %v404_v54, %v406_v58  ;;  %v380_v32 = vsel %vm379_vm3, %v364_v47, %v366_v60 }
  0xe8   : > { %v545_v58 = vsel %vm544_vm5, %v380_v32, %v420_v30 }
  0xea   : > { %v4883_v42 = vpop.permute.xlu1 %447  ;;  %v446_v57 = vpop.permute.xlu0 %445 }
  0xeb   : > { %v461_v53 = vsel %vm459_vm4, %v446_v57, %v4883_v42 }
  0xec   : > { %v555_v37 = vsel %vm553_vm6, %v546_v39, %v461_v53 }
  0xee   : > { %v248_v44 = vpop.permute.xlu1 %247  ;;  %v476_v45 = vpop.permute.xlu0 %475 }
  0xef   : > { %v492_v36 = vsel %vm491_vm0, %v476_v45, %v478_v0  ;;  %v264_v31 = vsel %vm263_vm8, %v248_v44, %v250_v46 }
  0xf0   : > { %3763 = vmatpush1.msk.msra.mxu0 %vm499_vm1, %v492_v36  ;;  %v265_v36 = vsel %vm263_vm8, %v250_v46, %v4879_v55 }
  0xf1   : > { %611 = vmatprep.subr.mxu0 %v555_v37  ;;  %v519_v37 = vsel %vm517_vm9, %v265_v36, %v305_v34 }
  0xf2   : > { %v326_v33 = vpop.permute.xlu1 %325  ;;  %v288_v35 = vpop.permute.xlu0 %287 }
  0xf3   : > { %v304_v47 = vsel %vm303_vm7, %v288_v35, %v290_v52 }
  0xf6   : > { %v444_v38 = vpop.permute.xlu1 %443  ;;  %v4901_v39 = vpop.permute.xlu0 %327 }
  0xf7   : > { %v460_v45 = vsel %vm459_vm4, %v444_v38, %v446_v57  ;;  %v341_v53 = vsel %vm339_vm10, %v326_v33, %v4901_v39  ;;  %v518_v57 = vsel %vm517_vm9, %v264_v31, %v304_v47 }
  0xf8   : > { %v554_v60 = vsel %vm553_vm6, %v545_v58, %v460_v45  ;;  %v528_v0 = vsel %vm526_vm11, %v519_v37, %v341_v53 }
  0xf9   : > { %612 = vmatpush1.msra.mxu0 %v554_v60  ;;  %v537_v54 = vsel %vm535_vm12, %v528_v0, %v381_v49 }
  0xfa   : > { %613 = vmatprep.subr.mxu0 %v537_v54  ;;  %v324_v34 = vpop.permute.xlu0 %323  ;;  %v210_v27 = vpop.permute.xlu1 %209 }
  0xfb   : > { %v340_v38 = vsel %vm339_vm10, %v324_v34, %v326_v33 }
  0xfc   : > { %v527_v30 = vsel %vm526_vm11, %v518_v57, %v340_v38 }
  0xfd   : > { %v536_v35 = vsel %vm535_vm12, %v527_v30, %v380_v32 }
  0xfe   : > { %614 = vmatpush1.msra.mxu0 %v536_v35  ;;  %v212_v52 = vpop.permute.xlu0 %211  ;;  %v208_v37 = vpop.permute.xlu1 %207 }
  0xff   : > { %v225_v49 = vsel %vm223_vm13, %v210_v27, %v212_v52  ;;  %v224_v44 = vsel %vm223_vm13, %v208_v37, %v210_v27  ;;  %v7812_v27 = vmov 0.0  }
 0x100   : > { %v501_v46 = vsel %vm499_vm1, %v4720_v59, %v225_v49  ;;  %v500_v45 = vsel %vm499_vm1, %v4712_v56, %v224_v44 }
 0x101   : > { %v510_v33 = vsel %vm508_vm14, %v501_v46, %v265_v36  ;;  %v509_v53 = vsel %vm508_vm14, %v500_v45, %v264_v31 }
 0x102   : > { %v370_v32 = vpop.permute.xlu0 %369  ;;  %615 = vmatprep.subr.mxu0 %v510_v33  ;;  %v4925_v58 = vpop.permute.xlu1 %371 }
 0x103   : > { %616 = vmatpush1.msra.mxu0 %v509_v53  ;;  %v383_v35 = vsel %vm379_vm3, %v370_v32, %v4925_v58 }
 0x104   : > { %3764 = vmatmul.mubr.msk.f32.vlgmr.msra.gmra.mxu0 %vm562_vm15, %v7803_v2 }
 0x105   : > { %655 = vmatprep.mubr.f32.mxu0 %v7812_v27 }
 0x106   : > { %v410_v47 = vpop.permute.xlu0 %409  ;;  %v4930_v59 = vpop.permute.xlu1 %411 }
 0x107   : > { %v422_v38 = vsel %vm419_vm2, %v4859_v51, %v410_v47  ;;  %v423_v30 = vsel %vm419_vm2, %v410_v47, %v4930_v59 }
 0x108   : > { %3765 = vmatmul.mubr.msk.f32.gmra.mxu0 %vm562_vm15, %v7802_v3  ;;  %v548_v45 = vsel %vm544_vm5, %v383_v35, %v423_v30 }
 0x109   : > { %726 = vmatprep.mubr.f32.mxu0 %v7812_v27 }
 0x10a   : > { %v482_v31 = vpop.permute.xlu0 %481  ;;  %v484_v56 = vpop.permute.xlu1 %483 }
 0x10b   : > { %v494_v36 = vsel %vm491_vm0, %v4868_v50, %v482_v31  ;;  %v495_v60 = vsel %vm491_vm0, %v482_v31, %v484_v56  ;;  %v382_v50 = vsel %vm379_vm3, %v4861_v63, %v370_v32 }
 0x10c   : > { %3766 = vmatprep.subr.msk.mxu0 %vm499_vm1, %v495_v60  ;;  %v547_v51 = vsel %vm544_vm5, %v382_v50, %v422_v38 }
 0x10d   : > { %3767 = vmatpush1.msk.msra.mxu0 %vm499_vm1, %v494_v36 }
 0x10e   : > { %v254_v0 = vpop.permute.xlu0 %253  ;;  %v4940_v54 = vpop.permute.xlu1 %255 }
 0x10f   : > { %v267_v47 = vsel %vm263_vm8, %v254_v0, %v4940_v54 }
 0x112   : > { %v294_v34 = vpop.permute.xlu0 %293  ;;  %v4942_v57 = vpop.permute.xlu1 %295 }
 0x113   : > { %v306_v33 = vsel %vm303_vm7, %v4881_v61, %v294_v34  ;;  %v307_v63 = vsel %vm303_vm7, %v294_v34, %v4942_v57 }
 0x114   : > { %v521_v61 = vsel %vm517_vm9, %v267_v47, %v307_v63 }
 0x116   : > { %v450_v37 = vpop.permute.xlu0 %449  ;;  %v452_v49 = vpop.permute.xlu1 %451 }
 0x117   : > { %v462_v44 = vsel %vm459_vm4, %v4883_v42, %v450_v37  ;;  %v463_v46 = vsel %vm459_vm4, %v450_v37, %v452_v49  ;;  %v266_v42 = vsel %vm263_vm8, %v4879_v55, %v254_v0 }
 0x118   : > { %v557_v53 = vsel %vm553_vm6, %v548_v45, %v463_v46  ;;  %v556_v32 = vsel %vm553_vm6, %v547_v51, %v462_v44  ;;  %v520_v60 = vsel %vm517_vm9, %v266_v42, %v306_v33 }
 0x119   : > { %688 = vmatprep.subr.mxu0 %v557_v53 }
 0x11a   : > { %v330_v31 = vpop.permute.xlu0 %329  ;;  %689 = vmatpush1.msra.mxu0 %v556_v32  ;;  %v332_v36 = vpop.permute.xlu1 %331 }
 0x11b   : > { %v342_v34 = vsel %vm339_vm10, %v4901_v39, %v330_v31  ;;  %v343_v38 = vsel %vm339_vm10, %v330_v31, %v332_v36 }
 0x11c   : > { %v530_v30 = vsel %vm526_vm11, %v521_v61, %v343_v38  ;;  %v529_v37 = vsel %vm526_vm11, %v520_v60, %v342_v34 }
 0x11d   : > { %v539_v55 = vsel %vm535_vm12, %v530_v30, %v383_v35  ;;  %v538_v0 = vsel %vm535_vm12, %v529_v37, %v382_v50 }
 0x11e   : > { %v214_v44 = vpop.permute.xlu0 %213  ;;  %690 = vmatprep.subr.mxu0 %v539_v55  ;;  %v216_v46 = vpop.permute.xlu1 %215 }
 0x11f   : > { %v226_v45 = vsel %vm223_vm13, %v212_v52, %v214_v44  ;;  %v227_v51 = vsel %vm223_vm13, %v214_v44, %v216_v46  ;;  %691 = vmatpush1.msra.mxu0 %v538_v0 }
 0x120   : > { %v503_v39 = vsel %vm499_vm1, %v4770_v48, %v227_v51  ;;  %v502_v33 = vsel %vm499_vm1, %v4709_v40, %v226_v45 }
 0x121   : > { %v512_v63 = vsel %vm508_vm14, %v503_v39, %v267_v47  ;;  %v511_v35 = vsel %vm508_vm14, %v502_v33, %v266_v42 }
 0x122   : > { %v374_v53 = vpop.permute.xlu0 %373  ;;  %692 = vmatprep.subr.mxu0 %v512_v63  ;;  %v4984_v50 = vpop.permute.xlu1 %375 }
 0x123   : > { %693 = vmatpush1.msra.mxu0 %v511_v35  ;;  %v385_v37 = vsel %vm379_vm3, %v374_v53, %v4984_v50 }
 0x124   : > { %3768 = vmatmul.mubr.msk.f32.vlgmr.msra.gmra.mxu0 %vm562_vm15, %v7803_v2 }
 0x125   : > { %732 = vmatprep.mubr.f32.mxu0 %v7812_v27 }
 0x126   : > { %v414_v52 = vpop.permute.xlu0 %413  ;;  %v4989_v32 = vpop.permute.xlu1 %415 }
 0x127   : > { %v424_v38 = vsel %vm419_vm2, %v4930_v59, %v414_v52  ;;  %v425_v30 = vsel %vm419_vm2, %v414_v52, %v4989_v32 }
 0x128   : > { %3769 = vmatmul.mubr.msk.f32.gmra.mxu0 %vm562_vm15, %v7802_v3  ;;  %v550_v51 = vsel %vm544_vm5, %v385_v37, %v425_v30 }
 0x129   : > { %803 = vmatprep.mubr.f32.mxu0 %v7812_v27 }
 0x12a   : > { %v486_v40 = vpop.permute.xlu0 %485  ;;  %v488_v48 = vpop.permute.xlu1 %487 }
 0x12b   : > { %v496_v42 = vsel %vm491_vm0, %v484_v56, %v486_v40  ;;  %v497_v47 = vsel %vm491_vm0, %v486_v40, %v488_v48  ;;  %v384_v56 = vsel %vm379_vm3, %v4925_v58, %v374_v53 }
 0x12c   : > { %3770 = vmatprep.subr.msk.mxu0 %vm499_vm1, %v497_v47  ;;  %v549_v39 = vsel %vm544_vm5, %v384_v56, %v424_v38 }
 0x12d   : > { %3771 = vmatpush1.msk.msra.mxu0 %vm499_vm1, %v496_v42 }
 0x12e   : > { %v258_v31 = vpop.permute.xlu0 %257  ;;  %v4998_v60 = vpop.permute.xlu1 %259 }
 0x12f   : > { %v268_v35 = vsel %vm263_vm8, %v4940_v54, %v258_v31 }
 0x132   : > { %v298_v61 = vpop.permute.xlu0 %297  ;;  %v300_v34 = vpop.permute.xlu1 %299 }
 0x133   : > { %v308_v59 = vsel %vm303_vm7, %v4942_v57, %v298_v61  ;;  %v309_v33 = vsel %vm303_vm7, %v298_v61, %v300_v34 }
 0x134   : > { %v522_v40 = vsel %vm517_vm9, %v268_v35, %v308_v59 }
 0x136   : > { %v454_v55 = vpop.permute.xlu0 %453  ;;  %v456_v0 = vpop.permute.xlu1 %455 }
 0x137   : > { %v464_v44 = vsel %vm459_vm4, %v452_v49, %v454_v55  ;;  %v465_v45 = vsel %vm459_vm4, %v454_v55, %v456_v0  ;;  %v269_v49 = vsel %vm263_vm8, %v258_v31, %v4998_v60 }
 0x138   : > { %v559_v58 = vsel %vm553_vm6, %v550_v51, %v465_v45  ;;  %v558_v63 = vsel %vm553_vm6, %v549_v39, %v464_v44  ;;  %v523_v57 = vsel %vm517_vm9, %v269_v49, %v309_v33 }
 0x139   : > { %765 = vmatprep.subr.mxu0 %v559_v58 }
 0x13a   : > { %v334_v53 = vpop.permute.xlu0 %333  ;;  %766 = vmatpush1.msra.mxu0 %v558_v63  ;;  %v336_v52 = vpop.permute.xlu1 %335 }
 0x13b   : > { %v344_v42 = vsel %vm339_vm10, %v332_v36, %v334_v53  ;;  %v345_v47 = vsel %vm339_vm10, %v334_v53, %v336_v52 }
 0x13c   : > { %v532_v61 = vsel %vm526_vm11, %v523_v57, %v345_v47  ;;  %v531_v38 = vsel %vm526_vm11, %v522_v40, %v344_v42 }
 0x13d   : > { %v541_v54 = vsel %vm535_vm12, %v532_v61, %v385_v37  ;;  %v540_v30 = vsel %vm535_vm12, %v531_v38, %v384_v56 }
 0x13e   : > { %v218_v31 = vpop.permute.xlu0 %217  ;;  %767 = vmatprep.subr.mxu0 %v541_v54  ;;  %v220_v55 = vpop.permute.xlu1 %219 }
 0x13f   : > { %v228_v44 = vsel %vm223_vm13, %v216_v46, %v218_v31  ;;  %v229_v45 = vsel %vm223_vm13, %v218_v31, %v220_v55  ;;  %768 = vmatpush1.msra.mxu0 %v540_v30 }
 0x140   : > { %v505_v36 = vsel %vm499_vm1, %v4810_v41, %v229_v45  ;;  %v504_v51 = vsel %vm499_vm1, %v4773_v1, %v228_v44 }
 0x141   : > { %v514_v39 = vsel %vm508_vm14, %v505_v36, %v269_v49  ;;  %v513_v37 = vsel %vm508_vm14, %v504_v51, %v268_v35 }
 0x142   : > { %v378_v59 = vpop.permute.xlu0 %377  ;;  %769 = vmatprep.subr.mxu0 %v514_v39  ;;  %v418_v56 = vpop.permute.xlu1 %417 }
 0x143   : > { %770 = vmatpush1.msra.mxu0 %v513_v37  ;;  %v386_v1 = vsel %vm379_vm3, %v4984_v50, %v378_v59  ;;  %v426_v58 = vsel %vm419_vm2, %v4989_v32, %v418_v56  ;;  %v552_v35 = vsel %vm544_vm5, %v378_v59, %v418_v56  ;;  %vm1383_vm3 = vcmask 490496  }
 0x144   : > { %3772 = vmatmul.mubr.msk.f32.vlgmr.msra.gmra.mxu0 %vm562_vm15, %v7803_v2  ;;  %v551_v57 = vsel %vm544_vm5, %v386_v1, %v426_v58  ;;  %vm1179_vm5 = vcmask 1014784  }
 0x145   : > { %809 = vmatprep.mubr.f32.mxu0 %v7812_v27 }
 0x146   : > { %v490_v46 = vpop.permute.xlu0 %489  ;;  %v262_v33 = vpop.permute.xlu1 %261 }
 0x147   : > { %3774 = vmatprep.subr.msk.mxu1 %vm499_vm1, %v490_v46  ;;  %v498_v41 = vsel %vm491_vm0, %v488_v48, %v490_v46  ;;  %v270_v32 = vsel %vm263_vm8, %v4998_v60, %v262_v33 }
 0x148   : > { %3775 = vmatpush1.msk.msra.mxu1 %vm499_vm1, %v498_v41  ;;  %3773 = vmatmul.mubr.msk.f32.gmra.mxu0 %vm562_vm15, %v7802_v3 }
 0x149   : > { %1589 = vmatprep.mubr.f32.mxu0 %v7801_v5 }
 0x14a   : > { %v302_v63 = vpop.permute.xlu0 %301 }
 0x14b   : > { %v458_v49 = vpop.permute.xlu1 %457  ;;  %v310_v53 = vsel %vm303_vm7, %v300_v34, %v302_v63  ;;  %v525_v42 = vsel %vm517_vm9, %v262_v33, %v302_v63 }
 0x14c   : > { %v466_v48 = vsel %vm459_vm4, %v456_v0, %v458_v49  ;;  %v561_v40 = vsel %vm553_vm6, %v552_v35, %v458_v49  ;;  %v524_v61 = vsel %vm517_vm9, %v270_v32, %v310_v53  ;;  %vm1226_vm4 = vcmask 998400  }
 0x14d   : > { %842 = vmatprep.subr.mxu1 %v561_v40  ;;  %v560_v50 = vsel %vm553_vm6, %v551_v57, %v466_v48  ;;  %vm2321_vm6 = vcmask 261120  }
 0x14e   : > { %843 = vmatpush1.msra.mxu1 %v560_v50  ;;  %v338_v47 = vpop.permute.xlu0 %337 }
 0x14f   : > { %v346_v34 = vsel %vm339_vm10, %v336_v52, %v338_v47  ;;  %v534_v0 = vsel %vm526_vm11, %v525_v42, %v338_v47  ;;  %v222_v38 = vpop.permute.xlu1 %221 }
 0x150   : > { %v230_v54 = vsel %vm223_vm13, %v220_v55, %v222_v38  ;;  %v507_v30 = vsel %vm499_vm1, %v4850_v43, %v222_v38  ;;  %v543_v31 = vsel %vm535_vm12, %v534_v0, %v378_v59  ;;  %v533_v60 = vsel %vm526_vm11, %v524_v61, %v346_v34 }
 0x151   : > { %844 = vmatprep.subr.mxu1 %v543_v31  ;;  %v542_v44 = vsel %vm535_vm12, %v533_v60, %v386_v1  ;;  %v506_v45 = vsel %vm499_vm1, %v4813_v62, %v230_v54  ;;  %v516_v52 = vsel %vm508_vm14, %v507_v30, %v262_v33  ;;  %vm1436_vm1 = vcmask 474112  }
 0x152   : > { %845 = vmatpush1.msra.mxu1 %v542_v44  ;;  %v515_v36 = vsel %vm508_vm14, %v506_v45, %v270_v32 }
 0x153   : > { %846 = vmatprep.subr.mxu1 %v516_v52 }
 0x154   : > { %847 = vmatpush1.msra.mxu1 %v515_v36 }
 0x155   : > { %3776 = vmatmul.mubr.msk.f32.vlgmr.msra.gmra.mxu1 %vm562_vm15, %v7803_v2 }
 0x156   : > { %886 = vmatprep.mubr.f32.mxu1 %v7812_v27 }
 0x159   : > { %3777 = vmatmul.mubr.msk.f32.gmra.mxu1 %vm562_vm15, %v7802_v3 }
 0x15a   : > { %1678 = vmatprep.mubr.f32.mxu1 %v7801_v5 }
 0x1c4   : > { %v5078_v43 = vpop.f32.mrf.mxu0 }
 0x1c5   : > { %v7614_v62 = vmax.f32 %v5078_v43, 0.0 }
 0x1c6   : > { %v5081_v55 = vpop.f32.mrf.mxu0 }
 0x1c7   : > { %925 = vrot.lane.b32.xlu1 %v7614_v62, %s4307_s8  ;;  %v7613_v51 = vmax.f32 %v5081_v55, 0.0 }
 0x1c8   : > { %v5090_v39 = vpop.f32.mrf.mxu0 }
 0x1c9   : > { %v7612_v58 = vmax.f32 %v5090_v39, 0.0 }
 0x1ca   : > { %v5092_v37 = vpop.f32.mrf.mxu0 }
 0x1cb   : > { %927 = vrot.lane.b32.xlu1 %v7613_v51, %s4307_s8  ;;  %v7609_v48 = vmax.f32 %v5092_v37, 0.0 }
 0x1e4   : > { %v5094_v59 = vpop.f32.mrf.mxu0 }
 0x1e5   : > { %v7610_v50 = vmax.f32 %v5094_v59, 0.0 }
 0x1e6   : > { %v5096_v56 = vpop.f32.mrf.mxu0 }
 0x1e7   : > { %v896_v32 = vmax.f32 %v5096_v56, 0.0 }
 0x1e8   : > { %v5098_v1 = vpop.f32.mrf.mxu0 }
 0x1e9   : > { %v903_v61 = vmax.f32 %v5098_v1, 0.0 }
 0x1ea   : > { %v5102_v53 = vpop.f32.mrf.mxu0 }
 0x1eb   : > { %v7607_v34 = vmax.f32 %v5102_v53, 0.0 }
 0x204   : > { %v5109_v57 = vpop.f32.mrf.mxu0 }
 0x205   : > { %v897_v38 = vmax.f32 %v5109_v57, 0.0 }
 0x206   : > { %v5117_v42 = vpop.f32.mrf.mxu0 }
 0x207   : > { %v898_v54 = vmax.f32 %v5117_v42, 0.0 }
 0x208   : > { %v5123_v47 = vpop.f32.mrf.mxu0 }
 0x209   : > { %v7611_v30 = vmax.f32 %v5123_v47, 0.0 }
 0x20a   : > { %v5131_v0 = vpop.f32.mrf.mxu0 }
 0x20b   : > { %v7608_v31 = vmax.f32 %v5131_v0, 0.0 }
 0x215   : > { %v882_v46 = vpop.f32.mrf.mxu1 }
 0x216   : > { %v899_v33 = vmax.f32 %v882_v46, 0.0 }
 0x217   : > { %v884_v41 = vpop.f32.mrf.mxu1 }
 0x218   : > { %937 = vrot.lane.b32.xlu0 %v899_v33, %s4307_s8  ;;  %v900_v60 = vmax.f32 %v884_v41, 0.0 }
 0x219   : > { %v888_v63 = vpop.f32.mrf.mxu1 }
 0x21a   : > { %v907_v35 = vmax.f32 %v888_v63, 0.0 }
 0x21b   : > { %v890_v49 = vpop.f32.mrf.mxu1 }
 0x21c   : > { %941 = vrot.lane.b32.xlu0 %v7612_v58, %s4307_s8  ;;  %953 = vrot.lane.b32.xlu1 %v907_v35, %s4307_s8  ;;  %v908_v40 = vmax.f32 %v890_v49, 0.0 }
 0x220   : > { %943 = vrot.lane.b32.xlu0 %v7609_v48, %s4307_s8  ;;  %955 = vrot.lane.b32.xlu1 %v908_v40, %s4307_s8 }
 0x224   : > { %929 = vrot.lane.b32.xlu0 %v7610_v50, %s4307_s8  ;;  %931 = vrot.lane.b32.xlu1 %v896_v32, %s4307_s8 }
 0x228   : > { %947 = vrot.lane.b32.xlu0 %v7607_v34, %s4307_s8  ;;  %945 = vrot.lane.b32.xlu1 %v903_v61, %s4307_s8 }
 0x22c   : > { %933 = vrot.lane.b32.xlu0 %v897_v38, %s4307_s8  ;;  %935 = vrot.lane.b32.xlu1 %v898_v54, %s4307_s8 }
 0x230   : > { %951 = vrot.lane.b32.xlu0 %v7608_v31, %s4307_s8  ;;  %949 = vrot.lane.b32.xlu1 %v7611_v30, %s4307_s8 }
 0x234   : > { %939 = vrot.lane.b32.xlu1 %v900_v60, %s4307_s8 }
 0x239   : > { %v926_v44 = vpop.permute.xlu1 %925 }
 0x23d   : > { %v928_v45 = vpop.permute.xlu1 %927 }
 0x23e   : > { %v957_v58 = vsel %vm223_vm13, %v926_v44, %v928_v45 }
 0x28a   : > { %v938_v56 = vpop.permute.xlu0 %937 }
 0x28e   : > { %v954_v52 = vpop.permute.xlu1 %953  ;;  %v942_v1 = vpop.permute.xlu0 %941 }
 0x292   : > { %v956_v36 = vpop.permute.xlu1 %955  ;;  %v944_v57 = vpop.permute.xlu0 %943 }
 0x293   : > { %v970_v41 = vsel %vm223_vm13, %v954_v52, %v956_v36  ;;  %v5167_v44 = vmax.f32 %v908_v40, %v956_v36 }
 0x294   : > { %v5157_v62 = vmax.f32 %v907_v35, %v970_v41  ;;  %v964_v35 = vsel %vm223_vm13, %v942_v1, %v944_v57  ;;  %v7816_v1 = vmax.f32 %v5094_v59, 0.0 }
 0x296   : > { %v932_v46 = vpop.permute.xlu1 %931  ;;  %v930_v34 = vpop.permute.xlu0 %929 }
 0x297   : > { %v958_v2 = vsel %vm223_vm13, %v928_v45, %v930_v34  ;;  %v7815_v45 = vmax.f32 %v5090_v39, 0.0 }
 0x29a   : > { %v946_v63 = vpop.permute.xlu1 %945  ;;  %v948_v51 = vpop.permute.xlu0 %947 }
 0x29b   : > { %v966_v3 = vsel %vm223_vm13, %v946_v63, %v948_v51 }
 0x29e   : > { %v936_v49 = vpop.permute.xlu1 %935  ;;  %v934_v41 = vpop.permute.xlu0 %933 }
 0x29f   : > { %v961_v36 = vsel %vm223_vm13, %v934_v41, %v936_v49 }
 0x2a0   : > { %v5195_v39 = vmax.f32 %v897_v38, %v961_v36  ;;  %v7818_v38 = vmax.f32 %v5102_v53, 0.0 }
 0x2a2   : > { %v950_v42 = vpop.permute.xlu1 %949 }
 0x2a6   : > { %v940_v31 = vpop.permute.xlu1 %939 }
 0x2a7   : > { %v963_v48 = vsel %vm223_vm13, %v938_v56, %v940_v31  ;;  %v5147_v50 = vmax.f32 %v900_v60, %v940_v31  ;;  %v7813_v31 = vmax.f32 %v5078_v43, 0.0  ;;  %v5174_v43 = vmax.f32 %v903_v61, %v966_v3 }
 0x2a8   : > { %v5150_v30 = vmax.f32 %v899_v33, %v963_v48  ;;  %v7814_v33 = vmax.f32 %v5081_v55, 0.0  ;;  %v995_v55 = vmax.f32 %v7815_v45, %v964_v35  ;;  %v965_v61 = vsel %vm223_vm13, %v944_v57, %v946_v63  ;;  %v952_v57 = vpop.permute.xlu0 %951 }
 0x2a9   : > { %1033 = vrot.lane.b32.xlu1 %v5147_v50, %s4303_s29  ;;  %v987_v60 = vmax.f32 %v7813_v31, %v957_v58  ;;  %v960_v58 = vsel %vm223_vm13, %v932_v46, %v934_v41  ;;  %v967_v63 = vsel %vm223_vm13, %v948_v51, %v950_v42  ;;  %v7820_v51 = vmax.f32 %v5131_v0, 0.0 }
 0x2aa   : > { %1031 = vrot.lane.b32.xlu0 %v5150_v30, %s4303_s29  ;;  %v988_v48 = vmax.f32 %v7814_v33, %v958_v2  ;;  %v959_v2 = vsel %vm223_vm13, %v930_v34, %v932_v46  ;;  %v5183_v40 = vmax.f32 %v896_v32, %v960_v58  ;;  %v7817_v34 = vmax.f32 %v5092_v37, 0.0 }
 0x2ab   : > { %v5188_v3 = vmax.f32 %v7816_v1, %v959_v2  ;;  %v962_v46 = vsel %vm223_vm13, %v936_v49, %v938_v56  ;;  %v5210_v31 = vmax.f32 %v7818_v38, %v967_v63  ;;  %v968_v37 = vsel %vm223_vm13, %v950_v42, %v952_v57 }
 0x2ac   : > { %v996_v32 = vmax.f32 %v7817_v34, %v965_v61  ;;  %v5203_v59 = vmax.f32 %v898_v54, %v962_v46  ;;  %v7819_v56 = vmax.f32 %v5123_v47, 0.0  ;;  %v969_v54 = vsel %vm223_vm13, %v952_v57, %v954_v52 }
 0x2ad   : > { %1047 = vrot.lane.b32.xlu1 %v5157_v62, %s4303_s29  ;;  %v5224_v33 = vmax.f32 %v7820_v51, %v969_v54 }
 0x2ae   : > { %1019 = vrot.lane.b32.xlu0 %v987_v60, %s4303_s29  ;;  %v5217_v49 = vmax.f32 %v7819_v56, %v968_v37 }
 0x2b1   : > { %1021 = vrot.lane.b32.xlu1 %v988_v48, %s4303_s29 }
 0x2b2   : > { %1049 = vrot.lane.b32.xlu0 %v5167_v44, %s4303_s29 }
 0x2b5   : > { %1039 = vrot.lane.b32.xlu1 %v5174_v43, %s4303_s29 }
 0x2b6   : > { %1035 = vrot.lane.b32.xlu0 %v995_v55, %s4303_s29 }
 0x2b9   : > { %1025 = vrot.lane.b32.xlu1 %v5183_v40, %s4303_s29 }
 0x2ba   : > { %1023 = vrot.lane.b32.xlu0 %v5188_v3, %s4303_s29 }
 0x2bd   : > { %1027 = vrot.lane.b32.xlu1 %v5195_v39, %s4303_s29 }
 0x2be   : > { %1037 = vrot.lane.b32.xlu0 %v996_v32, %s4303_s29 }
 0x2c2   : > { %1029 = vrot.lane.b32.xlu0 %v5203_v59, %s4303_s29 }
 0x2c6   : > { %1041 = vrot.lane.b32.xlu0 %v5210_v31, %s4303_s29 }
 0x2ca   : > { %1043 = vrot.lane.b32.xlu0 %v5217_v49, %s4303_s29 }
 0x2ce   : > { %1045 = vrot.lane.b32.xlu0 %v5224_v33, %s4303_s29 }
 0x31b   : > { %v5228_v53 = vpop.permute.xlu1 %1033 }
 0x31c   : > { %v5230_v42 = vpop.permute.xlu0 %1031  ;;  %v1088_v17 = vmax.f32 %v5147_v50, %v5228_v53 }
 0x31d   : > { %v1057_v54 = vsel %vm303_vm7, %v5230_v42, %v5228_v53 }
 0x31f   : > { %v5232_v35 = vpop.permute.xlu1 %1047 }
 0x320   : > { %v1020_v47 = vpop.permute.xlu0 %1019 }
 0x323   : > { %v1022_v41 = vpop.permute.xlu1 %1021 }
 0x324   : > { %v1051_v52 = vsel %vm303_vm7, %v1020_v47, %v1022_v41  ;;  %v5235_v58 = vpop.permute.xlu0 %1049 }
 0x325   : > { %v5237_v45 = vmax.f32 %v987_v60, %v1051_v52  ;;  %v1096_v27 = vmax.f32 %v5167_v44, %v5235_v58 }
 0x327   : > { %1408 = vrot.lane.b32.xlu1 %v5237_v45, %s4308_s9 }
 0x328   : > { %v1036_v0 = vpop.permute.xlu0 %1035 }
 0x32b   : > { %1355 = vrot.lane.b32.xlu1 %v5237_v45, %s4309_s10 }
 0x32c   : > { %v1024_v2 = vpop.permute.xlu0 %1023 }
 0x32d   : > { %v1052_v36 = vsel %vm303_vm7, %v1022_v41, %v1024_v2  ;;  %v5348_v41 = vmax.f32 %v5150_v30, %v1057_v54 }
 0x32e   : > { %v5244_v1 = vmax.f32 %v988_v48, %v1052_v36  ;;  %v1040_v48 = vpop.permute.xlu1 %1039  ;;  %v1064_v36 = vsel %vm303_vm7, %v5232_v35, %v5235_v58 }
 0x32f   : > { %1303 = vrot.lane.b32.xlu1 %v5237_v45, %s4301_s27  ;;  %7823 = vst [vmem:[#allocation120_spill] sm:$0xff] %v5348_v41 }
 0x330   : > { %1410 = vrot.lane.b32.xlu0 %v5244_v1, %s4308_s9  ;;  %v1038_v60 = vpop.permute.xlu0 %1037 }
 0x331   : > { %v1058_v61 = vsel %vm303_vm7, %v1036_v0, %v1038_v60 }
 0x332   : > { %v5251_v34 = vmax.f32 %v995_v55, %v1058_v61  ;;  %v1059_v55 = vsel %vm303_vm7, %v1038_v60, %v1040_v48 }
 0x333   : > { %1251 = vrot.lane.b32.xlu1 %v5237_v45, %s4299_s25  ;;  %v5278_v46 = vmax.f32 %v996_v32, %v1059_v55  ;;  %v1026_v32 = vpop.permute.xlu1 %1025 }
 0x334   : > { %1369 = vrot.lane.b32.xlu0 %v5251_v34, %s4309_s10  ;;  %v1053_v63 = vsel %vm303_vm7, %v1024_v2, %v1026_v32 }
 0x335   : > { %v5302_v38 = vmax.f32 %v5188_v3, %v1053_v63 }
 0x337   : > { %1202 = vrot.lane.b32.xlu1 %v5237_v45, %s4310_s11  ;;  %v1028_v57 = vpop.permute.xlu1 %1027 }
 0x338   : > { %1317 = vrot.lane.b32.xlu0 %v5251_v34, %s4301_s27  ;;  %v1054_v37 = vsel %vm303_vm7, %v1026_v32, %v1028_v57 }
 0x339   : > { %v5310_v56 = vmax.f32 %v5183_v40, %v1054_v37  ;;  %v1030_v40 = vpop.permute.xlu0 %1029 }
 0x33a   : > { %v1055_v3 = vsel %vm303_vm7, %v1028_v57, %v1030_v40  ;;  %v1056_v30 = vsel %vm303_vm7, %v1030_v40, %v5230_v42 }
 0x33b   : > { %1155 = vrot.lane.b32.xlu1 %v5237_v45, %s4311_s12  ;;  %7821 = vst [vmem:[#allocation118_spill] sm:$0xff] %v5310_v56  ;;  %v5345_v47 = vmax.f32 %v5195_v39, %v1055_v3 }
 0x33c   : > { %1265 = vrot.lane.b32.xlu0 %v5251_v34, %s4299_s25 }
 0x33d   : > { %v1042_v51 = vpop.permute.xlu0 %1041  ;;  %7822 = vst [vmem:[#allocation119_spill] sm:$0xff] %v5345_v47 }
 0x33e   : > { %v1060_v52 = vsel %vm303_vm7, %v1040_v48, %v1042_v51 }
 0x33f   : > { %1109 = vrot.lane.b32.xlu1 %v5237_v45, %s4302_s28  ;;  %v5356_v0 = vmax.f32 %v5174_v43, %v1060_v52  ;;  %v5373_v43 = vmax.f32 %v5203_v59, %v1056_v30 }
 0x340   : > { %1214 = vrot.lane.b32.xlu0 %v5251_v34, %s4310_s11 }
 0x341   : > { %7824 = vst [vmem:[#allocation121_spill] sm:$0xff] %v5373_v43  ;;  %v1044_v39 = vpop.permute.xlu0 %1043 }
 0x342   : > { %v1061_v2 = vsel %vm303_vm7, %v1042_v51, %v1044_v39 }
 0x343   : > { %1357 = vrot.lane.b32.xlu1 %v5244_v1, %s4309_s10  ;;  %v5385_v42 = vmax.f32 %v5210_v31, %v1061_v2  ;;  %v5401_v31 = vmax.f32 %v5157_v62, %v1064_v36 }
 0x344   : > { %1167 = vrot.lane.b32.xlu0 %v5251_v34, %s4311_s12 }
 0x345   : > { %7825 = vst [vmem:[#allocation122_spill] sm:$0xff] %v5385_v42  ;;  %v1046_v61 = vpop.permute.xlu0 %1045 }
 0x346   : > { %v1062_v3 = vsel %vm303_vm7, %v1044_v39, %v1046_v61  ;;  %v1063_v30 = vsel %vm303_vm7, %v1046_v61, %v5232_v35 }
 0x347   : > { %1305 = vrot.lane.b32.xlu1 %v5244_v1, %s4301_s27  ;;  %v5445_v51 = vmax.f32 %v5217_v49, %v1062_v3  ;;  %v5458_v2 = vmax.f32 %v5224_v33, %v1063_v30 }
 0x348   : > { %1121 = vrot.lane.b32.xlu0 %v5251_v34, %s4302_s28 }
 0x349   : > { %7826 = vst [vmem:[#allocation123_spill] sm:$0xff] %v5445_v51  ;;  %7827 = vst [vmem:[#allocation124_spill] sm:$0xff] %v5458_v2 }
 0x34b   : > { %1253 = vrot.lane.b32.xlu1 %v5244_v1, %s4299_s25 }
 0x34c   : > { %1424 = vrot.lane.b32.xlu0 %v5278_v46, %s4308_s9 }
 0x34f   : > { %1204 = vrot.lane.b32.xlu1 %v5244_v1, %s4310_s11 }
 0x350   : > { %1371 = vrot.lane.b32.xlu0 %v5278_v46, %s4309_s10 }
 0x353   : > { %1157 = vrot.lane.b32.xlu1 %v5244_v1, %s4311_s12 }
 0x354   : > { %1319 = vrot.lane.b32.xlu0 %v5278_v46, %s4301_s27 }
 0x357   : > { %1111 = vrot.lane.b32.xlu1 %v5244_v1, %s4302_s28 }
 0x358   : > { %1267 = vrot.lane.b32.xlu0 %v5278_v46, %s4299_s25 }
 0x35b   : > { %1422 = vrot.lane.b32.xlu1 %v5251_v34, %s4308_s9 }
 0x35c   : > { %1216 = vrot.lane.b32.xlu0 %v5278_v46, %s4310_s11 }
 0x35f   : > { %1412 = vrot.lane.b32.xlu1 %v5302_v38, %s4308_s9 }
 0x360   : > { %1169 = vrot.lane.b32.xlu0 %v5278_v46, %s4311_s12 }
 0x363   : > { %1414 = vrot.lane.b32.xlu1 %v5310_v56, %s4308_s9 }
 0x364   : > { %1123 = vrot.lane.b32.xlu0 %v5278_v46, %s4302_s28 }
 0x367   : > { %1361 = vrot.lane.b32.xlu1 %v5310_v56, %s4309_s10 }
 0x368   : > { %1359 = vrot.lane.b32.xlu0 %v5302_v38, %s4309_s10 }
 0x36b   : > { %1309 = vrot.lane.b32.xlu1 %v5310_v56, %s4301_s27 }
 0x36c   : > { %1307 = vrot.lane.b32.xlu0 %v5302_v38, %s4301_s27 }
 0x36f   : > { %1257 = vrot.lane.b32.xlu1 %v5310_v56, %s4299_s25 }
 0x370   : > { %1255 = vrot.lane.b32.xlu0 %v5302_v38, %s4299_s25 }
 0x373   : > { %1208 = vrot.lane.b32.xlu1 %v5310_v56, %s4310_s11 }
 0x374   : > { %1206 = vrot.lane.b32.xlu0 %v5302_v38, %s4310_s11 }
 0x377   : > { %1161 = vrot.lane.b32.xlu1 %v5310_v56, %s4311_s12 }
 0x378   : > { %1159 = vrot.lane.b32.xlu0 %v5302_v38, %s4311_s12 }
 0x37b   : > { %1115 = vrot.lane.b32.xlu1 %v5310_v56, %s4302_s28 }
 0x37c   : > { %1113 = vrot.lane.b32.xlu0 %v5302_v38, %s4302_s28 }
 0x37f   : > { %1416 = vrot.lane.b32.xlu1 %v5345_v47, %s4308_s9 }
 0x380   : > { %1420 = vrot.lane.b32.xlu0 %v5348_v41, %s4308_s9 }
 0x383   : > { %1426 = vrot.lane.b32.xlu1 %v5356_v0, %s4308_s9 }
 0x384   : > { %1367 = vrot.lane.b32.xlu0 %v5348_v41, %s4309_s10 }
 0x387   : > { %1373 = vrot.lane.b32.xlu1 %v5356_v0, %s4309_s10 }
 0x388   : > { %1315 = vrot.lane.b32.xlu0 %v5348_v41, %s4301_s27 }
 0x38b   : > { %1321 = vrot.lane.b32.xlu1 %v5356_v0, %s4301_s27 }
 0x38c   : > { %1263 = vrot.lane.b32.xlu0 %v5348_v41, %s4299_s25 }
 0x38f   : > { %1269 = vrot.lane.b32.xlu1 %v5356_v0, %s4299_s25 }
 0x390   : > { %1212 = vrot.lane.b32.xlu0 %v5373_v43, %s4310_s11 }
 0x393   : > { %1218 = vrot.lane.b32.xlu1 %v5356_v0, %s4310_s11 }
 0x394   : > { %1165 = vrot.lane.b32.xlu0 %v5373_v43, %s4311_s12 }
 0x397   : > { %1171 = vrot.lane.b32.xlu1 %v5356_v0, %s4311_s12 }
 0x398   : > { %1428 = vrot.lane.b32.xlu0 %v5385_v42, %s4308_s9 }
 0x399   : > { %v5391_v59 = vpop.permute.xlu1 %1408 }
 0x39b   : > { %1125 = vrot.lane.b32.xlu1 %v5356_v0, %s4302_s28 }
 0x39c   : > { %1375 = vrot.lane.b32.xlu0 %v5385_v42, %s4309_s10 }
 0x39d   : > { %v5403_v60 = vpop.permute.xlu1 %1355 }
 0x39f   : > { %1434 = vrot.lane.b32.xlu1 %v5401_v31, %s4308_s9 }
 0x3a0   : > { %1323 = vrot.lane.b32.xlu0 %v5385_v42, %s4301_s27 }
 0x3a1   : > { %v5409_v48 = vpop.permute.xlu1 %1303 }
 0x3a2   : > { %v5411_v55 = vpop.permute.xlu0 %1410 }
 0x3a3   : > { %1418 = vrot.lane.b32.xlu1 %v5373_v43, %s4308_s9 }
 0x3a4   : > { %1271 = vrot.lane.b32.xlu0 %v5385_v42, %s4299_s25 }
 0x3a5   : > { %v5417_v62 = vpop.permute.xlu1 %1251 }
 0x3a6   : > { %v5419_v32 = vpop.permute.xlu0 %1369 }
 0x3a7   : > { %1363 = vrot.lane.b32.xlu1 %v5345_v47, %s4309_s10 }
 0x3a8   : > { %1220 = vrot.lane.b32.xlu0 %v5385_v42, %s4310_s11 }
 0x3a9   : > { %v5425_v63 = vpop.permute.xlu1 %1202 }
 0x3aa   : > { %v5427_v57 = vpop.permute.xlu0 %1317 }
 0x3ab   : > { %1381 = vrot.lane.b32.xlu1 %v5401_v31, %s4309_s10 }
 0x3ac   : > { %1173 = vrot.lane.b32.xlu0 %v5385_v42, %s4311_s12 }
 0x3ad   : > { %v5433_v37 = vpop.permute.xlu1 %1155 }
 0x3ae   : > { %v5435_v40 = vpop.permute.xlu0 %1265 }
 0x3af   : > { %1365 = vrot.lane.b32.xlu1 %v5373_v43, %s4309_s10 }
 0x3b0   : > { %1127 = vrot.lane.b32.xlu0 %v5385_v42, %s4302_s28 }
 0x3b1   : > { %v5442_v54 = vpop.permute.xlu1 %1109 }
 0x3b2   : > { %v5447_v52 = vpop.permute.xlu0 %1214 }
 0x3b3   : > { %1311 = vrot.lane.b32.xlu1 %v5345_v47, %s4301_s27 }
 0x3b4   : > { %1430 = vrot.lane.b32.xlu0 %v5445_v51, %s4308_s9 }
 0x3b5   : > { %v5455_v39 = vpop.permute.xlu1 %1357 }
 0x3b6   : > { %v5460_v36 = vpop.permute.xlu0 %1167 }
 0x3b7   : > { %1329 = vrot.lane.b32.xlu1 %v5401_v31, %s4301_s27 }
 0x3b8   : > { %1432 = vrot.lane.b32.xlu0 %v5458_v2, %s4308_s9 }
 0x3b9   : > { %v5466_v49 = vpop.permute.xlu1 %1305 }
 0x3ba   : > { %v5468_v35 = vpop.permute.xlu0 %1121 }
 0x3bb   : > { %1313 = vrot.lane.b32.xlu1 %v5373_v43, %s4301_s27 }
 0x3bc   : > { %1377 = vrot.lane.b32.xlu0 %v5445_v51, %s4309_s10 }
 0x3bd   : > { %v5474_v33 = vpop.permute.xlu1 %1253 }
 0x3be   : > { %v1425_v61 = vpop.permute.xlu0 %1424 }
 0x3bf   : > { %1259 = vrot.lane.b32.xlu1 %v5345_v47, %s4299_s25 }
 0x3c0   : > { %1379 = vrot.lane.b32.xlu0 %v5458_v2, %s4309_s10 }
 0x3c1   : > { %v5480_v3 = vpop.permute.xlu1 %1204 }
 0x3c2   : > { %v5482_v30 = vpop.permute.xlu0 %1371 }
 0x3c3   : > { %1277 = vrot.lane.b32.xlu1 %v5401_v31, %s4299_s25  ;;  %v1390_v11 = vsel %vm1383_vm3, %v5419_v32, %v5482_v30 }
 0x3c4   : > { %1325 = vrot.lane.b32.xlu0 %v5445_v51, %s4301_s27 }
 0x3c5   : > { %v5488_v29 = vpop.permute.xlu1 %1157 }
 0x3c6   : > { %v5490_v28 = vpop.permute.xlu0 %1319 }
 0x3c7   : > { %1261 = vrot.lane.b32.xlu1 %v5373_v43, %s4299_s25  ;;  %v1337_v32 = vsel %vm491_vm0, %v5427_v57, %v5490_v28 }
 0x3c8   : > { %1327 = vrot.lane.b32.xlu0 %v5458_v2, %s4301_s27 }
 0x3c9   : > { %v5496_v24 = vpop.permute.xlu1 %1111 }
 0x3ca   : > { %v5498_v26 = vpop.permute.xlu0 %1267 }
 0x3cb   : > { %1210 = vrot.lane.b32.xlu1 %v5345_v47, %s4310_s11  ;;  %v1285_v57 = vsel %vm419_vm2, %v5435_v40, %v5498_v26 }
 0x3cc   : > { %1273 = vrot.lane.b32.xlu0 %v5445_v51, %s4299_s25 }
 0x3cd   : > { %v1423_v25 = vpop.permute.xlu1 %1422 }
 0x3ce   : > { %v5504_v21 = vpop.permute.xlu0 %1216 }
 0x3cf   : > { %1163 = vrot.lane.b32.xlu1 %v5345_v47, %s4311_s12  ;;  %v1232_v40 = vsel %vm1226_vm4, %v5447_v52, %v5504_v21 }
 0x3d0   : > { %1275 = vrot.lane.b32.xlu0 %v5458_v2, %s4299_s25 }
 0x3d1   : > { %v5510_v23 = vpop.permute.xlu1 %1412 }
 0x3d2   : > { %v5512_v22 = vpop.permute.xlu0 %1169  ;;  %v5595_v5 = vsel %vm1436_vm1, %v5411_v55, %v5510_v23 }
 0x3d3   : > { %1175 = vrot.lane.b32.xlu1 %v5445_v51, %s4311_s12  ;;  %v1185_v52 = vsel %vm1179_vm5, %v5460_v36, %v5512_v22 }
 0x3d4   : > { %1222 = vrot.lane.b32.xlu0 %v5445_v51, %s4310_s11 }
 0x3d5   : > { %v5518_v18 = vpop.permute.xlu1 %1414 }
 0x3d6   : > { %v5520_v20 = vpop.permute.xlu0 %1123 }
 0x3d7   : > { %1129 = vrot.lane.b32.xlu1 %v5445_v51, %s4302_s28  ;;  %v1138_v36 = vsel %vm263_vm8, %v5468_v35, %v5520_v20 }
 0x3d8   : > { %1224 = vrot.lane.b32.xlu0 %v5458_v2, %s4310_s11 }
 0x3d9   : > { %v5526_v19 = vpop.permute.xlu1 %1361 }
 0x3da   : > { %v5528_v15 = vpop.permute.xlu0 %1359 }
 0x3db   : > { %1117 = vrot.lane.b32.xlu1 %v5345_v47, %s4302_s28 }
 0x3dc   : > { %1177 = vrot.lane.b32.xlu0 %v5458_v2, %s4311_s12 }
 0x3dd   : > { %v5534_v16 = vpop.permute.xlu1 %1309 }
 0x3de   : > { %v5536_v12 = vpop.permute.xlu0 %1307 }
 0x3df   : > { %1119 = vrot.lane.b32.xlu1 %v5373_v43, %s4302_s28 }
 0x3e0   : > { %1131 = vrot.lane.b32.xlu0 %v5458_v2, %s4302_s28 }
 0x3e1   : > { %v5544_v14 = vpop.permute.xlu1 %1257 }
 0x3e2   : > { %v5548_v13 = vpop.permute.xlu0 %1255 }
 0x3e3   : > { %1517 = vrot.lane.b32.xlu1 %v1088_v17, %s4308_s9 }
 0x3e4   : > { %1519 = vrot.lane.b32.xlu0 %v1096_v27, %s4308_s9 }
 0x3e5   : > { %v5552_v47 = vpop.permute.xlu1 %1208 }
 0x3e6   : > { %v5554_v43 = vpop.permute.xlu0 %1206 }
 0x3e7   : > { %1509 = vrot.lane.b32.xlu1 %v1088_v17, %s4309_s10 }
 0x3e8   : > { %1511 = vrot.lane.b32.xlu0 %v1096_v27, %s4309_s10 }
 0x3e9   : > { %v5558_v50 = vpop.permute.xlu1 %1161 }
 0x3ea   : > { %v5560_v53 = vpop.permute.xlu0 %1159 }
 0x3eb   : > { %1501 = vrot.lane.b32.xlu1 %v1088_v17, %s4301_s27 }
 0x3ec   : > { %1503 = vrot.lane.b32.xlu0 %v1096_v27, %s4301_s27 }
 0x3ed   : > { %v5564_v44 = vpop.permute.xlu1 %1115 }
 0x3ee   : > { %v5566_v58 = vpop.permute.xlu0 %1113 }
 0x3ef   : > { %1493 = vrot.lane.b32.xlu1 %v1088_v17, %s4299_s25 }
 0x3f0   : > { %1495 = vrot.lane.b32.xlu0 %v1096_v27, %s4299_s25  ;;  %v1443_v27 = vsel %vm1436_vm1, %v1423_v25, %v1425_v61  ;;  %v1437_v25 = vsel %vm1436_vm1, %v5391_v59, %v5411_v55  ;;  %v5621_v59 = vsel %vm1383_vm3, %v5455_v39, %v5528_v15 }
 0x3f1   : > { %v5570_v51 = vpop.permute.xlu1 %1416 }
 0x3f2   : > { %v5572_v2 = vpop.permute.xlu0 %1420 }
 0x3f3   : > { %1481 = vrot.lane.b32.xlu1 %v5348_v41, %s4310_s11 }
 0x3f4   : > { %1483 = vrot.lane.b32.xlu0 %v5401_v31, %s4310_s11 }
 0x3f5   : > { %v5578_v56 = vpop.permute.xlu1 %1426 }
 0x3f6   : > { %v5580_v42 = vpop.permute.xlu0 %1367  ;;  %v5584_v17 = vsel %vm1436_vm1, %v1425_v61, %v5578_v56 }
 0x3f7   : > { %1471 = vrot.lane.b32.xlu1 %v5348_v41, %s4311_s12  ;;  %1525 = vmatprep.subr.mxu0 %v5584_v17 }
 0x3f8   : > { %1473 = vrot.lane.b32.xlu0 %v5401_v31, %s4311_s12  ;;  %1526 = vmatpush1.msra.mxu0 %v1443_v27 }
 0x3f9   : > { %v5597_v10 = vpop.permute.xlu1 %1373  ;;  %1527 = vmatprep.subr.mxu0 %v5595_v5 }
 0x3fa   : > { %1528 = vmatpush1.msra.mxu0 %v1437_v25  ;;  %v5603_v61 = vpop.permute.xlu0 %1315  ;;  %v5608_v27 = vsel %vm1383_vm3, %v5482_v30, %v5597_v10  ;;  %v1384_v25 = vsel %vm1383_vm3, %v5403_v60, %v5455_v39  ;;  %v5643_v30 = vsel %vm491_vm0, %v5466_v49, %v5536_v12  ;;  %v1331_v39 = vsel %vm491_vm0, %v5409_v48, %v5466_v49 }
 0x3fb   : > { %1461 = vrot.lane.b32.xlu1 %v5348_v41, %s4302_s28  ;;  %1529 = vmatprep.subr.mxu0 %v5608_v27  ;;  %v1279_v49 = vsel %vm419_vm2, %v5417_v62, %v5474_v33  ;;  %v5687_v62 = vsel %vm1226_vm4, %v5480_v3, %v5554_v43 }
 0x3fc   : > { %1463 = vrot.lane.b32.xlu0 %v5401_v31, %s4302_s28  ;;  %1530 = vmatpush1.msra.mxu0 %v1390_v11 }
 0x3fd   : > { %v5623_v55 = vpop.permute.xlu1 %1321  ;;  %1531 = vmatprep.subr.mxu0 %v5621_v59 }
 0x3fe   : > { %1532 = vmatpush1.msra.mxu0 %v1384_v25  ;;  %v5629_v41 = vpop.permute.xlu0 %1263  ;;  %v5634_v11 = vsel %vm491_vm0, %v5490_v28, %v5623_v55 }
 0x3ff   : > { %1533 = vmatprep.subr.mxu0 %v5634_v11 }
 0x400   : > { %1534 = vmatpush1.msra.mxu0 %v1337_v32  ;;  %v5665_v32 = vsel %vm419_vm2, %v5474_v33, %v5548_v13 }
 0x401   : > { %v5645_v60 = vpop.permute.xlu1 %1269  ;;  %1535 = vmatprep.subr.mxu0 %v5643_v30 }
 0x402   : > { %1536 = vmatpush1.msra.mxu0 %v1331_v39  ;;  %v5651_v25 = vpop.permute.xlu0 %1212  ;;  %v5656_v28 = vsel %vm419_vm2, %v5498_v26, %v5645_v60 }
 0x403   : > { %1537 = vmatprep.subr.mxu0 %v5656_v28 }
 0x404   : > { %1538 = vmatpush1.msra.mxu0 %v1285_v57  ;;  %v1227_v57 = vsel %vm1226_vm4, %v5425_v63, %v5480_v3  ;;  %v1180_v3 = vsel %vm1179_vm5, %v5433_v37, %v5488_v29  ;;  %v1133_v37 = vsel %vm263_vm8, %v5442_v54, %v5496_v24 }
 0x405   : > { %v5667_v48 = vpop.permute.xlu1 %1218  ;;  %1539 = vmatprep.subr.mxu0 %v5665_v32 }
 0x406   : > { %1540 = vmatpush1.msra.mxu0 %v1279_v49  ;;  %v5673_v39 = vpop.permute.xlu0 %1165  ;;  %v5678_v26 = vsel %vm1226_vm4, %v5504_v21, %v5667_v48 }
 0x407   : > { %1541 = vmatprep.subr.mxu0 %v5678_v26 }
 0x408   : > { %1542 = vmatpush1.msra.mxu0 %v1232_v40  ;;  %v5707_v40 = vsel %vm1179_vm5, %v5488_v29, %v5560_v53 }
 0x409   : > { %v5689_v33 = vpop.permute.xlu1 %1171  ;;  %1543 = vmatprep.subr.mxu0 %v5687_v62 }
 0x40a   : > { %1544 = vmatpush1.msra.mxu0 %v1227_v57  ;;  %v1429_v49 = vpop.permute.xlu0 %1428  ;;  %v5698_v21 = vsel %vm1179_vm5, %v5512_v22, %v5689_v33 }
 0x40b   : > { %1545 = vmatprep.subr.mxu0 %v5698_v21 }
 0x40c   : > { %1546 = vmatpush1.msra.mxu0 %v1185_v52  ;;  %v5729_v52 = vsel %vm263_vm8, %v5496_v24, %v5566_v58  ;;  %v1439_v24 = vsel %vm1436_vm1, %v5510_v23, %v5518_v18 }
 0x40d   : > { %v5709_v63 = vpop.permute.xlu1 %1125  ;;  %1547 = vmatprep.subr.mxu0 %v5707_v40 }
 0x40e   : > { %1548 = vmatpush1.msra.mxu0 %v1180_v3  ;;  %v5715_v57 = vpop.permute.xlu0 %1375  ;;  %v5720_v22 = vsel %vm263_vm8, %v5520_v20, %v5709_v63 }
 0x40f   : > { %1549 = vmatprep.subr.mxu0 %v5720_v22 }
 0x410   : > { %1550 = vmatpush1.msra.mxu0 %v1138_v36  ;;  %v1445_v36 = vsel %vm1436_vm1, %v5578_v56, %v1429_v49  ;;  %v1386_v56 = vsel %vm1383_vm3, %v5528_v15, %v5526_v19 }
 0x411   : > { %v5731_v29 = vpop.permute.xlu1 %1434  ;;  %1551 = vmatprep.subr.mxu0 %v5729_v52 }
 0x412   : > { %1552 = vmatpush1.msra.mxu0 %v1133_v37  ;;  %v5737_v3 = vpop.permute.xlu0 %1323 }
 0x413   : > { %1553 = vmatprep.subr.mxu0 %v5278_v46 }
 0x414   : > { %1554 = vmatpush1.msra.mxu0 %v5251_v34 }
 0x415   : > { %v5741_v20 = vpop.permute.xlu1 %1418  ;;  %1555 = vmatprep.subr.mxu0 %v5244_v1 }
 0x416   : > { %1556 = vmatpush1.msra.mxu0 %v5237_v45  ;;  %v5745_v35 = vpop.permute.xlu0 %1271  ;;  %v1392_v45 = vsel %vm1383_vm3, %v5597_v10, %v5715_v57  ;;  %v5780_v10 = vsel %vm491_vm0, %v5536_v12, %v5534_v16  ;;  %v5798_v12 = vsel %vm419_vm2, %v5548_v13, %v5544_v14  ;;  %v5818_v13 = vsel %vm1226_vm4, %v5554_v43, %v5552_v47 }
 0x417   : > { %1557 = vmatprep.subr.mxu0 %v1445_v36 }
 0x418   : > { %1558 = vmatpush2.msra.mxu0 %v5584_v17 }
 0x419   : > { %v5753_v54 = vpop.permute.xlu1 %1363  ;;  %1559 = vmatprep.subr.mxu0 %v1439_v24 }
 0x41a   : > { %1560 = vmatpush2.msra.mxu0 %v5595_v5  ;;  %v5756_v34 = vpop.permute.xlu0 %1220  ;;  %v5773_v5 = vsel %vm491_vm0, %v5623_v55, %v5737_v3 }
 0x41b   : > { %1561 = vmatprep.subr.mxu0 %v1392_v45 }
 0x41c   : > { %1562 = vmatpush2.msra.mxu0 %v5608_v27 }
 0x41d   : > { %v5765_v17 = vpop.permute.xlu1 %1381  ;;  %1563 = vmatprep.subr.mxu0 %v1386_v56 }
 0x41e   : > { %1564 = vmatpush2.msra.mxu0 %v5621_v59  ;;  %v5768_v23 = vpop.permute.xlu0 %1173  ;;  %v5791_v59 = vsel %vm419_vm2, %v5645_v60, %v5745_v35 }
 0x41f   : > { %1565 = vmatprep.subr.mxu0 %v5773_v5  ;;  %v5833_v43 = vsel %vm1179_vm5, %v5689_v33, %v5768_v23 }
 0x420   : > { %1566 = vmatpush2.msra.mxu0 %v5634_v11 }
 0x421   : > { %v5782_v15 = vpop.permute.xlu1 %1365  ;;  %1567 = vmatprep.subr.mxu0 %v5780_v10 }
 0x422   : > { %1568 = vmatpush2.msra.mxu0 %v5643_v30  ;;  %v5786_v27 = vpop.permute.xlu0 %1127  ;;  %v5807_v30 = vsel %vm1226_vm4, %v5667_v48, %v5756_v34 }
 0x423   : > { %1569 = vmatprep.subr.mxu0 %v5791_v59  ;;  %v5849_v33 = vsel %vm263_vm8, %v5709_v63, %v5786_v27 }
 0x424   : > { %1570 = vmatpush2.msra.mxu0 %v5656_v28 }
 0x425   : > { %v5800_v55 = vpop.permute.xlu1 %1311  ;;  %1571 = vmatprep.subr.mxu0 %v5798_v12 }
 0x426   : > { %1572 = vmatpush2.msra.mxu0 %v5665_v32  ;;  %v1431_v11 = vpop.permute.xlu0 %1430  ;;  %v5826_v32 = vsel %vm1436_vm1, %v5518_v18, %v5570_v51  ;;  %v5840_v18 = vsel %vm1179_vm5, %v5560_v53, %v5558_v50  ;;  %v5861_v53 = vsel %vm263_vm8, %v5566_v58, %v5564_v44  ;;  %v5904_v37 = vsel %vm491_vm0, %v5534_v16, %v5800_v55 }
 0x427   : > { %1573 = vmatprep.subr.mxu0 %v5807_v30  ;;  %v5811_v60 = vsel %vm1436_vm1, %v1429_v49, %v1431_v11 }
 0x428   : > { %1574 = vmatpush2.msra.mxu0 %v5678_v26  ;;  %1614 = vmatprep.subr.mxu1 %v5811_v60 }
 0x429   : > { %v5820_v28 = vpop.permute.xlu1 %1329  ;;  %1575 = vmatprep.subr.mxu0 %v5818_v13  ;;  %1615 = vmatpush1.msra.mxu1 %v1445_v36 }
 0x42a   : > { %1576 = vmatpush2.msra.mxu0 %v5687_v62  ;;  %1616 = vmatprep.subr.mxu1 %v5826_v32  ;;  %v1433_v48 = vpop.permute.xlu0 %1432 }
 0x42b   : > { %1577 = vmatprep.subr.mxu0 %v5833_v43  ;;  %1617 = vmatpush1.msra.mxu1 %v1439_v24 }
 0x42c   : > { %1578 = vmatpush2.msra.mxu0 %v5698_v21 }
 0x42d   : > { %v5842_v26 = vpop.permute.xlu1 %1313  ;;  %1579 = vmatprep.subr.mxu0 %v5840_v18 }
 0x42e   : > { %1580 = vmatpush2.msra.mxu0 %v5707_v40  ;;  %v1378_v62 = vpop.permute.xlu0 %1377  ;;  %v5869_v40 = vsel %vm1383_vm3, %v5526_v19, %v5753_v54  ;;  %v5881_v19 = vsel %vm1436_vm1, %v1433_v48, %v5731_v29 }
 0x42f   : > { %1581 = vmatprep.subr.mxu0 %v5849_v33  ;;  %v5854_v49 = vsel %vm1383_vm3, %v5715_v57, %v1378_v62 }
 0x430   : > { %1582 = vmatpush2.msra.mxu0 %v5720_v22  ;;  %1618 = vmatprep.subr.mxu1 %v5854_v49 }
 0x431   : > { %v5863_v21 = vpop.permute.xlu1 %1259  ;;  %1583 = vmatprep.subr.mxu0 %v5861_v53  ;;  %1619 = vmatpush1.msra.mxu1 %v1392_v45  ;;  %v5933_v45 = vsel %vm1383_vm3, %v5753_v54, %v5782_v15 }
 0x432   : > { %1584 = vmatpush2.msra.mxu0 %v5729_v52  ;;  %1620 = vmatprep.subr.mxu1 %v5869_v40  ;;  %v1380_v63 = vpop.permute.xlu0 %1379 }
 0x433   : > { %1585 = vmatprep.subr.mxu0 %v5356_v0  ;;  %1621 = vmatpush1.msra.mxu1 %v1386_v56  ;;  %v5915_v24 = vsel %vm1383_vm3, %v1380_v63, %v5765_v17  ;;  %v5920_v16 = vsel %vm1383_vm3, %v1378_v62, %v1380_v63 }
 0x434   : > { %1586 = vmatpush2.msra.mxu0 %v5278_v46  ;;  %v5890_v46 = vsel %vm1436_vm1, %v1431_v11, %v1433_v48  ;;  %v5967_v48 = vsel %vm491_vm0, %v5800_v55, %v5842_v26 }
 0x435   : > { %v5875_v58 = vpop.permute.xlu1 %1277  ;;  %1587 = vmatprep.subr.mxu0 %v5302_v38 }
 0x436   : > { %1588 = vmatpush2.msra.mxu0 %v5244_v1  ;;  %v1326_v57 = vpop.permute.xlu0 %1325  ;;  %v5897_v1 = vsel %vm1436_vm1, %v5741_v20, %v5572_v2 }
 0x437   : > { %1703 = vmatprep.subr.mxu0 %v5881_v19  ;;  %1590 = vmatmul.mubr.f32.vlgmr.msra.gmra.mxu0 %v7800_v4  ;;  %v5887_v22 = vsel %vm491_vm0, %v5737_v3, %v1326_v57  ;;  %v5909_v3 = vsel %vm1436_vm1, %v5570_v51, %v5741_v20  ;;  %v5926_v51 = vsel %vm1383_vm3, %v5782_v15, %v5580_v42 }
 0x438   : > { %1622 = vmatprep.subr.mxu1 %v5887_v22  ;;  %1704 = vmatpush1.msra.mxu0 %v5890_v46  ;;  %v5955_v15 = vsel %vm491_vm0, %v5842_v26, %v5603_v61 }
 0x439   : > { %v1262_v52 = vpop.permute.xlu1 %1261  ;;  %1623 = vmatpush1.msra.mxu1 %v5773_v5  ;;  %1705 = vmatprep.subr.mxu0 %v5897_v1 }
 0x43a   : > { %1624 = vmatprep.subr.mxu1 %v5904_v37  ;;  %1706 = vmatpush1.msra.mxu0 %v5909_v3  ;;  %v1328_v36 = vpop.permute.xlu0 %1327  ;;  %v5985_v26 = vsel %vm419_vm2, %v1262_v52, %v5629_v41 }
 0x43b   : > { %1625 = vmatpush1.msra.mxu1 %v5780_v10  ;;  %1707 = vmatprep.subr.mxu0 %v5915_v24  ;;  %v5939_v5 = vsel %vm491_vm0, %v1328_v36, %v5820_v28  ;;  %v5948_v54 = vsel %vm491_vm0, %v1326_v57, %v1328_v36  ;;  %v5990_v57 = vsel %vm419_vm2, %v5863_v21, %v1262_v52 }
 0x43c   : > { %1708 = vmatpush1.msra.mxu0 %v5920_v16  ;;  %1595 = vmatprep.mubr.f32.mxu0 %v7828_v7 }
 0x43d   : > { %v1211_v20 = vpop.permute.xlu1 %1210  ;;  %1709 = vmatprep.subr.mxu0 %v5926_v51  ;;  %1596 = vmatmul.mubr.f32.gmra.mxu0 %v7829_v6 }
 0x43e   : > { %1710 = vmatpush1.msra.mxu0 %v5933_v45  ;;  %v1274_v56 = vpop.permute.xlu0 %1273  ;;  %1601 = vmatprep.mubr.f32.mxu0 %v7830_v9  ;;  %v7839_v9 = vld [vmem:[#allocation121_spill] sm:$0xff] }
 0x43f   : > { %1711 = vmatprep.subr.mxu0 %v5939_v5  ;;  %v5945_v10 = vsel %vm419_vm2, %v5745_v35, %v1274_v56  ;;  %v5962_v35 = vsel %vm419_vm2, %v5544_v14, %v5863_v21  ;;  %v7832_v14 = vld [vmem:[#allocation19_spill] sm:$0xff] }
 0x440   : > { %1626 = vmatprep.subr.mxu1 %v5945_v10  ;;  %1712 = vmatpush1.msra.mxu0 %v5948_v54 }
 0x441   : > { %v1164_v11 = vpop.permute.xlu1 %1163  ;;  %1627 = vmatpush1.msra.mxu1 %v5791_v59  ;;  %1713 = vmatprep.subr.mxu0 %v5955_v15 }
 0x442   : > { %1628 = vmatprep.subr.mxu1 %v5962_v35  ;;  %1714 = vmatpush1.msra.mxu0 %v5967_v48  ;;  %v1276_v62 = vpop.permute.xlu0 %1275 }
 0x443   : > { %1629 = vmatpush1.msra.mxu1 %v5798_v12  ;;  %v5974_v59 = vsel %vm419_vm2, %v1276_v62, %v5875_v58  ;;  %v5977_v63 = vsel %vm419_vm2, %v1274_v56, %v1276_v62  ;;  %1602 = vmatmul.mubr.f32.gmra.mxu0 %v7831_v8  ;;  %v7833_v56 = vld [vmem:[#allocation18_spill] sm:$0xff]  ;;  %v7834_v8 = vld [vmem:[#allocation13_spill] sm:$0xff] }
 0x444   : > { %1715 = vmatprep.subr.mxu0 %v5974_v59  ;;  %1607 = vmatprep.mubr.f32.mxu0 %v7832_v14  ;;  %v6002_v14 = vsel %vm1226_vm4, %v5552_v47, %v1211_v20  ;;  %v6024_v47 = vsel %vm1179_vm5, %v5558_v50, %v1164_v11 }
 0x445   : > { %v1176_v55 = vpop.permute.xlu1 %1175  ;;  %1716 = vmatpush1.msra.mxu0 %v5977_v63 }
 0x446   : > { %1717 = vmatprep.subr.mxu0 %v5985_v26  ;;  %v1223_v12 = vpop.permute.xlu0 %1222 }
 0x447   : > { %1718 = vmatpush1.msra.mxu0 %v5990_v57  ;;  %v5995_v36 = vsel %vm1226_vm4, %v5756_v34, %v1223_v12  ;;  %v6012_v34 = vsel %vm1179_vm5, %v5768_v23, %v1176_v55  ;;  %v6028_v23 = vsel %vm1226_vm4, %v1211_v20, %v5651_v25 }
 0x448   : > { %1630 = vmatprep.subr.mxu1 %v5995_v36  ;;  %1608 = vmatmul.mubr.f32.gmra.mxu0 %v7833_v56  ;;  %v7838_v56 = vld [vmem:[#allocation123_spill] sm:$0xff] }
 0x449   : > { %v1130_v62 = vpop.permute.xlu1 %1129  ;;  %1631 = vmatpush1.msra.mxu1 %v5807_v30  ;;  %1767 = vmatprep.mubr.f32.mxu0 %v7834_v8 }
 0x44a   : > { %1632 = vmatprep.subr.mxu1 %v6002_v14  ;;  %v6006_v21 = vpop.permute.xlu0 %1224 }
 0x44b   : > { %1633 = vmatpush1.msra.mxu1 %v5818_v13  ;;  %1719 = vmatprep.subr.mxu0 %v6006_v21  ;;  %v6016_v30 = vsel %vm1226_vm4, %v1223_v12, %v6006_v21 }
 0x44c   : > { %1634 = vmatprep.subr.mxu1 %v6012_v34  ;;  %1720 = vmatpush1.msra.mxu0 %v6016_v30 }
 0x44d   : > { %v1118_v8 = vpop.permute.xlu1 %1117  ;;  %1635 = vmatpush1.msra.mxu1 %v5833_v43  ;;  %1721 = vmatprep.subr.mxu0 %v5651_v25  ;;  %v6038_v43 = vsel %vm263_vm8, %v5786_v27, %v1130_v62  ;;  %v6056_v27 = vsel %vm1179_vm5, %v1164_v11, %v5673_v39 }
 0x44e   : > { %1636 = vmatprep.subr.mxu1 %v6024_v47  ;;  %1722 = vmatpush1.msra.mxu0 %v6028_v23  ;;  %v6032_v13 = vpop.permute.xlu0 %1177 }
 0x44f   : > { %1637 = vmatpush1.msra.mxu1 %v5840_v18  ;;  %1723 = vmatprep.subr.mxu0 %v6032_v13  ;;  %v6042_v50 = vsel %vm1179_vm5, %v1176_v55, %v6032_v13  ;;  %v6052_v18 = vsel %vm263_vm8, %v5564_v44, %v1118_v8  ;;  %v7835_v44 = vld [vmem:[#allocation122_spill] sm:$0xff] }
 0x450   : > { %1638 = vmatprep.subr.mxu1 %v6038_v43  ;;  %1724 = vmatpush1.msra.mxu0 %v6042_v50 }
 0x451   : > { %v6046_v52 = vpop.permute.xlu1 %1119  ;;  %1639 = vmatpush1.msra.mxu1 %v5849_v33  ;;  %1725 = vmatprep.subr.mxu0 %v5673_v39 }
 0x452   : > { %1640 = vmatprep.subr.mxu1 %v6052_v18  ;;  %1726 = vmatpush1.msra.mxu0 %v6056_v27  ;;  %v6060_v20 = vpop.permute.xlu0 %1131  ;;  %v6074_v55 = vsel %vm263_vm8, %v1118_v8, %v6046_v52  ;;  %v7840_v8 = vld [vmem:[#allocation119_spill] sm:$0xff] }
 0x453   : > { %1641 = vmatpush1.msra.mxu1 %v5861_v53  ;;  %1727 = vmatprep.subr.mxu0 %v6060_v20  ;;  %v6066_v33 = vsel %vm263_vm8, %v1130_v62, %v6060_v20  ;;  %v7836_v53 = vld [vmem:[#allocation118_spill] sm:$0xff]  ;;  %v7837_v62 = vld [vmem:[#allocation124_spill] sm:$0xff] }
 0x454   : > { %1642 = vmatprep.subr.mxu1 %v7835_v44  ;;  %1728 = vmatpush1.msra.mxu0 %v6066_v33 }
 0x455   : > { %v1518_v11 = vpop.permute.xlu1 %1517  ;;  %1643 = vmatpush1.msra.mxu1 %v5356_v0  ;;  %1729 = vmatprep.subr.mxu0 %v6046_v52 }
 0x456   : > { %1644 = vmatprep.subr.mxu1 %v7836_v53  ;;  %1730 = vmatpush1.msra.mxu0 %v6074_v55  ;;  %v1520_v12 = vpop.permute.xlu0 %1519 }
 0x457   : > { %1645 = vmatpush1.msra.mxu1 %v5302_v38  ;;  %1731 = vmatprep.subr.mxu0 %v7837_v62  ;;  %v1522_v7 = vsel %vm1436_vm1, %v5731_v29, %v1520_v12  ;;  %v1521_v38 = vsel %vm1436_vm1, %v5572_v2, %v1518_v11 }
 0x458   : > { %1646 = vmatprep.subr.mxu1 %v5890_v46  ;;  %1732 = vmatpush1.msra.mxu0 %v7838_v56 }
 0x459   : > { %v1510_v0 = vpop.permute.xlu1 %1509  ;;  %1647 = vmatpush2.msra.mxu1 %v5811_v60  ;;  %1733 = vmatprep.subr.mxu0 %v7839_v9 }
 0x45a   : > { %1648 = vmatprep.subr.mxu1 %v5909_v3  ;;  %1734 = vmatpush1.msra.mxu0 %v7840_v8  ;;  %v1512_v6 = vpop.permute.xlu0 %1511 }
 0x45b   : > { %1649 = vmatpush2.msra.mxu1 %v5826_v32  ;;  %1735 = vmatprep.subr.mxu0 %v1522_v7  ;;  %v1514_v29 = vsel %vm1383_vm3, %v5765_v17, %v1512_v6  ;;  %v1513_v7 = vsel %vm1383_vm3, %v5580_v42, %v1510_v0 }
 0x45c   : > { %1650 = vmatprep.subr.mxu1 %v5920_v16  ;;  %1736 = vmatpush2.msra.mxu0 %v5881_v19  ;;  %v7842_v16 = vld [vmem:[#allocation15_spill] sm:$0xff] }
 0x45d   : > { %v1502_v60 = vpop.permute.xlu1 %1501  ;;  %1651 = vmatpush2.msra.mxu1 %v5854_v49  ;;  %1737 = vmatprep.subr.mxu0 %v1521_v38 }
 0x45e   : > { %1652 = vmatprep.subr.mxu1 %v5933_v45  ;;  %1738 = vmatpush2.msra.mxu0 %v5897_v1  ;;  %v1504_v46 = vpop.permute.xlu0 %1503  ;;  %v1505_v42 = vsel %vm491_vm0, %v5603_v61, %v1502_v60  ;;  %v7844_v45 = vld [vmem:[#allocation17_spill] sm:$0xff] }
 0x45f   : > { %1653 = vmatpush2.msra.mxu1 %v5869_v40  ;;  %1739 = vmatprep.subr.mxu0 %v1514_v29  ;;  %v1506_v6 = vsel %vm491_vm0, %v5820_v28, %v1504_v46  ;;  %vm2204_vm0 = vcmask 982016  }
 0x460   : > { %1654 = vmatprep.subr.mxu1 %v5948_v54  ;;  %1740 = vmatpush2.msra.mxu0 %v5915_v24  ;;  %v7849_v54 = vmov 0.0  }
 0x461   : > { %v1494_v2 = vpop.permute.xlu1 %1493  ;;  %1655 = vmatpush2.msra.mxu1 %v5887_v22  ;;  %1741 = vmatprep.subr.mxu0 %v1513_v7 }
 0x462   : > { %1656 = vmatprep.subr.mxu1 %v5967_v48  ;;  %1742 = vmatpush2.msra.mxu0 %v5926_v51  ;;  %v1496_v32 = vpop.permute.xlu0 %1495  ;;  %v1497_v61 = vsel %vm419_vm2, %v5629_v41, %v1494_v2  ;;  %v7843_v51 = vld [vmem:[#allocation14_spill] sm:$0xff] }
 0x463   : > { %1657 = vmatpush2.msra.mxu1 %v5904_v37  ;;  %1743 = vmatprep.subr.mxu0 %v1506_v6  ;;  %v1498_v28 = vsel %vm419_vm2, %v5875_v58, %v1496_v32 }
 0x464   : > { %1658 = vmatprep.subr.mxu1 %v5977_v63  ;;  %1744 = vmatpush2.msra.mxu0 %v5939_v5  ;;  %v7846_v5 = vld [vmem:[#allocation19_spill] sm:$0xff] }
 0x465   : > { %1659 = vmatpush2.msra.mxu1 %v5945_v10  ;;  %1745 = vmatprep.subr.mxu0 %v1505_v42  ;;  %v1482_v17 = vpop.permute.xlu1 %1481  ;;  %v7847_v10 = vld [vmem:[#allocation18_spill] sm:$0xff] }
 0x466   : > { %1660 = vmatprep.subr.mxu1 %v5990_v57  ;;  %1746 = vmatpush2.msra.mxu0 %v5955_v15  ;;  %v1484_v49 = vpop.permute.xlu0 %1483  ;;  %v1485_v41 = vsel %vm1226_vm4, %v5651_v25, %v1482_v17 }
 0x467   : > { %1661 = vmatpush2.msra.mxu1 %v5962_v35  ;;  %1747 = vmatprep.subr.mxu0 %v1498_v28  ;;  %v1486_v58 = vsel %vm1226_vm4, %v6006_v21, %v1484_v49 }
 0x468   : > { %1662 = vmatprep.subr.mxu1 %v6016_v30  ;;  %1748 = vmatpush2.msra.mxu0 %v5974_v59 }
 0x469   : > { %1663 = vmatpush2.msra.mxu1 %v5995_v36  ;;  %1749 = vmatprep.subr.mxu0 %v1497_v61  ;;  %v1472_v19 = vpop.permute.xlu1 %1471 }
 0x46a   : > { %1664 = vmatprep.subr.mxu1 %v6028_v23  ;;  %1750 = vmatpush2.msra.mxu0 %v5985_v26  ;;  %v1474_v40 = vpop.permute.xlu0 %1473  ;;  %v1475_v37 = vsel %vm1179_vm5, %v5673_v39, %v1472_v19  ;;  %v7841_v39 = vld [vmem:[#allocation120_spill] sm:$0xff] }
 0x46b   : > { %1665 = vmatpush2.msra.mxu1 %v6002_v14  ;;  %1751 = vmatprep.subr.mxu0 %v1484_v49  ;;  %v1476_v22 = vsel %vm1179_vm5, %v6032_v13, %v1474_v40 }
 0x46c   : > { %1666 = vmatprep.subr.mxu1 %v6042_v50  ;;  %1752 = vmatpush2.msra.mxu0 %v1486_v58 }
 0x46d   : > { %1667 = vmatpush2.msra.mxu1 %v6012_v34  ;;  %1753 = vmatprep.subr.mxu0 %v1482_v17  ;;  %v1462_v25 = vpop.permute.xlu1 %1461 }
 0x46e   : > { %1668 = vmatprep.subr.mxu1 %v6056_v27  ;;  %1754 = vmatpush2.msra.mxu0 %v1485_v41  ;;  %v1464_v1 = vpop.permute.xlu0 %1463  ;;  %v1465_v24 = vsel %vm263_vm8, %v6046_v52, %v1462_v25 }
 0x46f   : > { %1669 = vmatpush2.msra.mxu1 %v6024_v47  ;;  %1755 = vmatprep.subr.mxu0 %v1474_v40  ;;  %v1466_v3 = vsel %vm263_vm8, %v6060_v20, %v1464_v1 }
 0x470   : > { %1670 = vmatprep.subr.mxu1 %v6066_v33  ;;  %1756 = vmatpush2.msra.mxu0 %v1476_v22 }
 0x471   : > { %1671 = vmatpush2.msra.mxu1 %v6038_v43  ;;  %1757 = vmatprep.subr.mxu0 %v1472_v19 }
 0x472   : > { %1672 = vmatprep.subr.mxu1 %v6074_v55  ;;  %1758 = vmatpush2.msra.mxu0 %v1475_v37 }
 0x473   : > { %1673 = vmatpush2.msra.mxu1 %v6052_v18  ;;  %1759 = vmatprep.subr.mxu0 %v1464_v1 }
 0x474   : > { %1674 = vmatprep.subr.mxu1 %v7838_v56  ;;  %1760 = vmatpush2.msra.mxu0 %v1466_v3 }
 0x475   : > { %1675 = vmatpush2.msra.mxu1 %v7835_v44  ;;  %1761 = vmatprep.subr.mxu0 %v1462_v25 }
 0x476   : > { %1676 = vmatprep.subr.mxu1 %v7840_v8  ;;  %1762 = vmatpush2.msra.mxu0 %v1465_v24 }
 0x477   : > { %1677 = vmatpush2.msra.mxu1 %v7836_v53  ;;  %1763 = vmatprep.subr.mxu0 %v5401_v31  ;;  %v7845_v31 = vld [vmem:[#allocation16_spill] sm:$0xff] }
 0x478   : > { %1679 = vmatmul.mubr.f32.vlgmr.msra.gmra.mxu1 %v7800_v4  ;;  %1764 = vmatpush2.msra.mxu0 %v7837_v62 }
 0x479   : > { %1765 = vmatprep.subr.mxu0 %v7841_v39  ;;  %1684 = vmatprep.mubr.f32.mxu1 %v7842_v16 }
 0x47a   : > { %1766 = vmatpush2.msra.mxu0 %v7839_v9  ;;  %v7848_v9 = vld [vmem:[#allocation21_spill] sm:$0xff] }
 0x47b   : > { %1768 = vmatmul.mubr.f32.vlgmr.msra.gmra.mxu0 %v7800_v4 }
 0x47c   : > { %1685 = vmatmul.mubr.f32.gmra.mxu1 %v7843_v51  ;;  %1773 = vmatprep.mubr.f32.mxu0 %v7842_v16 }
 0x47d   : > { %1690 = vmatprep.mubr.f32.mxu1 %v7844_v45 }
 0x47f   : > { %1774 = vmatmul.mubr.f32.gmra.mxu0 %v7843_v51 }
 0x480   : > { %1691 = vmatmul.mubr.f32.gmra.mxu1 %v7845_v31  ;;  %1779 = vmatprep.mubr.f32.mxu0 %v7844_v45 }
 0x481   : > { %1696 = vmatprep.mubr.f32.mxu1 %v7846_v5 }
 0x483   : > { %1780 = vmatmul.mubr.f32.gmra.mxu0 %v7845_v31 }
 0x484   : > { %1697 = vmatmul.mubr.f32.gmra.mxu1 %v7847_v10  ;;  %1785 = vmatprep.mubr.f32.mxu0 %v7846_v5 }
 0x485   : > { %2410 = vmatprep.mubr.f32.mxu1 %v7848_v9 }
 0x487   : > { %1786 = vmatmul.mubr.f32.gmra.mxu0 %v7847_v10 }
 0x488   : > { %2523 = vmatprep.mubr.f32.mxu0 %v7849_v54 }
 0x4f7   : > { %v6171_v15 = vpop.f32.mrf.mxu0 }
 0x4f8   : > { %v1792_v49 = vmax.f32 %v6171_v15, 0.0 }
 0x4f9   : > { %v6173_v35 = vpop.f32.mrf.mxu0 }
 0x4fa   : > { %v1793_v48 = vmax.f32 %v6173_v35, 0.0 }
 0x4fc   : > { %1842 = vrot.lane.b32.xlu1 %v1793_v48, %s4302_s28 }
 0x4fd   : > { %v6179_v59 = vpop.f32.mrf.mxu0 }
 0x4fe   : > { %v1798_v30 = vmax.f32 %v6179_v59, 0.0 }
 0x4ff   : > { %v6181_v63 = vpop.f32.mrf.mxu0 }
 0x500   : > { %v1799_v20 = vmax.f32 %v6181_v63, 0.0 }
 0x503   : > { %v6183_v14 = vpop.f32.mrf.mxu0 }
 0x504   : > { %v1804_v52 = vmax.f32 %v6183_v14, 0.0 }
 0x505   : > { %v6185_v26 = vpop.f32.mrf.mxu0 }
 0x506   : > { %v1805_v33 = vmax.f32 %v6185_v26, 0.0 }
 0x508   : > { %v6187_v57 = vpop.f32.mrf.mxu0 }
 0x509   : > { %v1810_v60 = vmax.f32 %v6187_v57, 0.0 }
 0x50a   : > { %v6189_v36 = vpop.f32.mrf.mxu0 }
 0x50b   : > { %v1811_v7 = vmax.f32 %v6189_v36, 0.0 }
 0x538   : > { %v6191_v56 = vpop.f32.mrf.mxu1 }
 0x539   : > { %v1794_v21 = vmax.f32 %v6191_v56, 0.0 }
 0x53a   : > { %v6194_v34 = vpop.f32.mrf.mxu1 }
 0x53b   : > { %1844 = vrot.lane.b32.xlu0 %v1794_v21, %s4302_s28  ;;  %v6200_v47 = vpop.f32.mrf.mxu0  ;;  %v1795_v42 = vmax.f32 %v6194_v34, 0.0 }
 0x53c   : > { %v6202_v23 = vpop.f32.mrf.mxu1  ;;  %v1796_v28 = vmax.f32 %v6200_v47, 0.0 }
 0x53d   : > { %v1800_v13 = vmax.f32 %v6202_v23, 0.0  ;;  %v6205_v43 = vpop.f32.mrf.mxu0 }
 0x53e   : > { %v6207_v50 = vpop.f32.mrf.mxu1  ;;  %v1797_v19 = vmax.f32 %v6205_v43, 0.0 }
 0x53f   : > { %1852 = vrot.lane.b32.xlu0 %v1798_v30, %s4302_s28  ;;  %1856 = vrot.lane.b32.xlu1 %v1800_v13, %s4302_s28  ;;  %v6218_v27 = vpop.f32.mrf.mxu0  ;;  %v1801_v55 = vmax.f32 %v6207_v50, 0.0 }
 0x540   : > { %v6216_v18 = vpop.f32.mrf.mxu1  ;;  %v1802_v46 = vmax.f32 %v6218_v27, 0.0 }
 0x541   : > { %v6228_v11 = vpop.f32.mrf.mxu0  ;;  %v1806_v53 = vmax.f32 %v6216_v18, 0.0 }
 0x542   : > { %v6226_v44 = vpop.f32.mrf.mxu1  ;;  %v1803_v41 = vmax.f32 %v6228_v11, 0.0 }
 0x543   : > { %1854 = vrot.lane.b32.xlu0 %v1799_v20, %s4302_s28  ;;  %1864 = vrot.lane.b32.xlu1 %v1804_v52, %s4302_s28  ;;  %v1807_v12 = vmax.f32 %v6226_v44, 0.0  ;;  %v6241_v0 = vpop.f32.mrf.mxu0 }
 0x544   : > { %v6239_v62 = vpop.f32.mrf.mxu1  ;;  %v1808_v17 = vmax.f32 %v6241_v0, 0.0 }
 0x545   : > { %v1812_v8 = vmax.f32 %v6239_v62, 0.0  ;;  %v6250_v38 = vpop.f32.mrf.mxu0 }
 0x546   : > { %v6263_v2 = vpop.f32.mrf.mxu1  ;;  %v1809_v40 = vmax.f32 %v6250_v38, 0.0 }
 0x547   : > { %1866 = vrot.lane.b32.xlu1 %v1805_v33, %s4302_s28  ;;  %1858 = vrot.lane.b32.xlu0 %v1801_v55, %s4302_s28  ;;  %v6260_v29 = vpop.f32.mrf.mxu0  ;;  %v1813_v6 = vmax.f32 %v6263_v2, 0.0 }
 0x548   : > { %v1814_v32 = vmax.f32 %v6260_v29, 0.0 }
 0x549   : > { %v6287_v61 = vpop.f32.mrf.mxu0 }
 0x54a   : > { %v1815_v58 = vmax.f32 %v6287_v61, 0.0 }
 0x54b   : > { %1868 = vrot.lane.b32.xlu0 %v1806_v53, %s4302_s28  ;;  %1870 = vrot.lane.b32.xlu1 %v1807_v12, %s4302_s28 }
 0x54f   : > { %1876 = vrot.lane.b32.xlu0 %v1810_v60, %s4302_s28  ;;  %1880 = vrot.lane.b32.xlu1 %v1812_v8, %s4302_s28 }
 0x553   : > { %1878 = vrot.lane.b32.xlu0 %v1811_v7, %s4302_s28  ;;  %1860 = vrot.lane.b32.xlu1 %v1802_v46, %s4302_s28 }
 0x557   : > { %1882 = vrot.lane.b32.xlu0 %v1813_v6, %s4302_s28  ;;  %1884 = vrot.lane.b32.xlu1 %v1814_v32, %s4302_s28 }
 0x55b   : > { %1872 = vrot.lane.b32.xlu0 %v1808_v17, %s4302_s28  ;;  %1846 = vrot.lane.b32.xlu1 %v1795_v42, %s4302_s28 }
 0x55f   : > { %1848 = vrot.lane.b32.xlu0 %v1796_v28, %s4302_s28  ;;  %1840 = vrot.lane.b32.xlu1 %v1792_v49, %s4302_s28 }
 0x563   : > { %1874 = vrot.lane.b32.xlu1 %v1809_v40, %s4302_s28  ;;  %1886 = vrot.lane.b32.xlu0 %v1815_v58, %s4302_s28 }
 0x567   : > { %1850 = vrot.lane.b32.xlu1 %v1797_v19, %s4302_s28  ;;  %1862 = vrot.lane.b32.xlu0 %v1803_v41, %s4302_s28 }
 0x56e   : > { %v1843_v22 = vpop.permute.xlu1 %1842 }
 0x5ad   : > { %v1845_v1 = vpop.permute.xlu0 %1844 }
 0x5ae   : > { %v1889_v44 = vsel %vm263_vm8, %v1843_v22, %v1845_v1 }
 0x5af   : > { %v6412_v2 = vmax.f32 %v1793_v48, %v1889_v44 }
 0x5b1   : > { %v1857_v37 = vpop.permute.xlu1 %1856  ;;  %v1853_v25 = vpop.permute.xlu0 %1852 }
 0x5b5   : > { %v1865_v3 = vpop.permute.xlu1 %1864  ;;  %v1855_v24 = vpop.permute.xlu0 %1854 }
 0x5b6   : > { %v1893_v39 = vsel %vm263_vm8, %v1853_v25, %v1855_v24  ;;  %v1894_v16 = vsel %vm263_vm8, %v1855_v24, %v1857_v37 }
 0x5b7   : > { %v6315_v51 = vmax.f32 %v1798_v30, %v1893_v39  ;;  %v6317_v45 = vmax.f32 %v1799_v20, %v1894_v16 }
 0x5b9   : > { %v1867_v31 = vpop.permute.xlu1 %1866  ;;  %1994 = vrot.lane.b32.xlu0 %v6317_v45, %s4299_s25  ;;  %1992 = vrot.lane.b32.xlu1 %v6315_v51, %s4299_s25  ;;  %v1859_v63 = vpop.permute.xlu0 %1858 }
 0x5ba   : > { %v1895_v36 = vsel %vm263_vm8, %v1857_v37, %v1859_v63  ;;  %v1898_v59 = vsel %vm263_vm8, %v1865_v3, %v1867_v31 }
 0x5bb   : > { %v6326_v25 = vmax.f32 %v1800_v13, %v1895_v36  ;;  %v6334_v39 = vmax.f32 %v1804_v52, %v1898_v59 }
 0x5bd   : > { %v1871_v30 = vpop.permute.xlu1 %1870  ;;  %1996 = vrot.lane.b32.xlu1 %v6326_v25, %s4299_s25  ;;  %v1869_v20 = vpop.permute.xlu0 %1868 }
 0x5be   : > { %v1899_v24 = vsel %vm263_vm8, %v1867_v31, %v1869_v20  ;;  %v1900_v23 = vsel %vm263_vm8, %v1869_v20, %v1871_v30 }
 0x5bf   : > { %v6338_v37 = vmax.f32 %v1805_v33, %v1899_v24  ;;  %v6347_v16 = vmax.f32 %v1806_v53, %v1900_v23 }
 0x5c1   : > { %v1881_v13 = vpop.permute.xlu1 %1880  ;;  %2004 = vrot.lane.b32.xlu1 %v6334_v39, %s4299_s25  ;;  %2006 = vrot.lane.b32.xlu0 %v6338_v37, %s4299_s25  ;;  %v1877_v3 = vpop.permute.xlu0 %1876 }
 0x5c5   : > { %v1861_v14 = vpop.permute.xlu1 %1860  ;;  %2008 = vrot.lane.b32.xlu1 %v6347_v16, %s4299_s25  ;;  %v1879_v26 = vpop.permute.xlu0 %1878 }
 0x5c6   : > { %v1903_v52 = vsel %vm263_vm8, %v1877_v3, %v1879_v26  ;;  %v1904_v33 = vsel %vm263_vm8, %v1879_v26, %v1881_v13  ;;  %v1896_v59 = vsel %vm263_vm8, %v1859_v63, %v1861_v14 }
 0x5c7   : > { %v6355_v31 = vmax.f32 %v1810_v60, %v1903_v52  ;;  %v6357_v36 = vmax.f32 %v1811_v7, %v1904_v33  ;;  %v6367_v24 = vmax.f32 %v1801_v55, %v1896_v59 }
 0x5c9   : > { %v1885_v18 = vpop.permute.xlu1 %1884  ;;  %2018 = vrot.lane.b32.xlu0 %v6357_v36, %s4299_s25  ;;  %2016 = vrot.lane.b32.xlu1 %v6355_v31, %s4299_s25  ;;  %v1883_v53 = vpop.permute.xlu0 %1882 }
 0x5ca   : > { %v1905_v20 = vsel %vm263_vm8, %v1881_v13, %v1883_v53  ;;  %v1906_v62 = vsel %vm263_vm8, %v1883_v53, %v1885_v18 }
 0x5cb   : > { %v6371_v57 = vmax.f32 %v1812_v8, %v1905_v20  ;;  %v6395_v56 = vmax.f32 %v1813_v6, %v1906_v62 }
 0x5cd   : > { %v1847_v60 = vpop.permute.xlu1 %1846  ;;  %1998 = vrot.lane.b32.xlu0 %v6367_v24, %s4299_s25  ;;  %2020 = vrot.lane.b32.xlu1 %v6371_v57, %s4299_s25  ;;  %v1873_v7 = vpop.permute.xlu0 %1872 }
 0x5ce   : > { %v1890_v63 = vsel %vm263_vm8, %v1845_v1, %v1847_v60  ;;  %v1901_v23 = vsel %vm263_vm8, %v1871_v30, %v1873_v7 }
 0x5cf   : > { %v6381_v50 = vmax.f32 %v1794_v21, %v1890_v63  ;;  %v6385_v55 = vmax.f32 %v1807_v12, %v1901_v23 }
 0x5d1   : > { %v1841_v8 = vpop.permute.xlu1 %1840  ;;  %1984 = vrot.lane.b32.xlu1 %v6381_v50, %s4299_s25  ;;  %2010 = vrot.lane.b32.xlu0 %v6385_v55, %s4299_s25  ;;  %v1849_v13 = vpop.permute.xlu0 %1848 }
 0x5d2   : > { %v1888_v30 = vsel %vm263_vm8, %v1841_v8, %v1843_v22  ;;  %v1891_v15 = vsel %vm263_vm8, %v1847_v60, %v1849_v13 }
 0x5d3   : > { %v6399_v21 = vmax.f32 %v1792_v49, %v1888_v30  ;;  %v6425_v38 = vmax.f32 %v1795_v42, %v1891_v15 }
 0x5d5   : > { %v1875_v12 = vpop.permute.xlu1 %1874  ;;  %1980 = vrot.lane.b32.xlu1 %v6399_v21, %s4299_s25  ;;  %2022 = vrot.lane.b32.xlu0 %v6395_v56, %s4299_s25  ;;  %v1887_v3 = vpop.permute.xlu0 %1886 }
 0x5d6   : > { %v6408_v26 = vmax.f32 %v1809_v40, %v1875_v12  ;;  %v1902_v35 = vsel %vm263_vm8, %v1873_v7, %v1875_v12  ;;  %v6438_v11 = vmax.f32 %v1815_v58, %v1887_v3 }
 0x5d7   : > { %v6434_v48 = vmax.f32 %v1808_v17, %v1902_v35  ;;  %v1907_v17 = vsel %vm263_vm8, %v1885_v18, %v1887_v3 }
 0x5d8   : > { %v6460_v61 = vmax.f32 %v1814_v32, %v1907_v17 }
 0x5d9   : > { %2014 = vrot.lane.b32.xlu1 %v6408_v26, %s4299_s25  ;;  %1982 = vrot.lane.b32.xlu0 %v6412_v2, %s4299_s25  ;;  %v1863_v6 = vpop.permute.xlu0 %1862  ;;  %v1851_v40 = vpop.permute.xlu1 %1850 }
 0x5da   : > { %v6421_v49 = vmax.f32 %v1803_v41, %v1863_v6  ;;  %v1897_v34 = vsel %vm263_vm8, %v1861_v14, %v1863_v6  ;;  %v6447_v42 = vmax.f32 %v1797_v19, %v1851_v40  ;;  %v1892_v43 = vsel %vm263_vm8, %v1849_v13, %v1851_v40 }
 0x5db   : > { %v6451_v0 = vmax.f32 %v1802_v46, %v1897_v34  ;;  %v6467_v27 = vmax.f32 %v1796_v28, %v1892_v43 }
 0x5dd   : > { %1986 = vrot.lane.b32.xlu0 %v6425_v38, %s4299_s25  ;;  %2002 = vrot.lane.b32.xlu1 %v6421_v49, %s4299_s25 }
 0x5e1   : > { %2012 = vrot.lane.b32.xlu0 %v6434_v48, %s4299_s25  ;;  %2026 = vrot.lane.b32.xlu1 %v6438_v11, %s4299_s25 }
 0x5e5   : > { %1990 = vrot.lane.b32.xlu1 %v6447_v42, %s4299_s25  ;;  %2000 = vrot.lane.b32.xlu0 %v6451_v0, %s4299_s25 }
 0x5e9   : > { %2024 = vrot.lane.b32.xlu0 %v6460_v61, %s4299_s25 }
 0x5ed   : > { %1988 = vrot.lane.b32.xlu0 %v6467_v27, %s4299_s25 }
 0x62b   : > { %v1993_v46 = vpop.permute.xlu1 %1992  ;;  %v1995_v58 = vpop.permute.xlu0 %1994 }
 0x62c   : > { %v2033_v19 = vsel %vm419_vm2, %v1993_v46, %v1995_v58 }
 0x62d   : > { %v6473_v29 = vmax.f32 %v6315_v51, %v2033_v19 }
 0x62f   : > { %v1997_v32 = vpop.permute.xlu1 %1996  ;;  %2180 = vrot.lane.b32.xlu0 %v6473_v29, %s4312_s2 }
 0x630   : > { %v2034_v41 = vsel %vm419_vm2, %v1995_v58, %v1997_v32 }
 0x631   : > { %v6479_v47 = vmax.f32 %v6317_v45, %v2034_v41 }
 0x633   : > { %v2005_v28 = vpop.permute.xlu1 %2004  ;;  %2182 = vrot.lane.b32.xlu0 %v6479_v47, %s4312_s2  ;;  %v2007_v22 = vpop.permute.xlu0 %2006 }
 0x634   : > { %v2038_v6 = vsel %vm419_vm2, %v2005_v28, %v2007_v22 }
 0x635   : > { %v6544_v35 = vmax.f32 %v6334_v39, %v2038_v6 }
 0x637   : > { %v2009_v1 = vpop.permute.xlu1 %2008  ;;  %2122 = vrot.lane.b32.xlu0 %v6479_v47, %s4311_s12 }
 0x638   : > { %v2039_v23 = vsel %vm419_vm2, %v2007_v22, %v2009_v1 }
 0x639   : > { %v6513_v44 = vmax.f32 %v6338_v37, %v2039_v23 }
 0x63b   : > { %v2017_v51 = vpop.permute.xlu1 %2016  ;;  %v2019_v14 = vpop.permute.xlu0 %2018 }
 0x63c   : > { %v2043_v52 = vsel %vm419_vm2, %v2017_v51, %v2019_v14 }
 0x63d   : > { %v6487_v33 = vmax.f32 %v6355_v31, %v2043_v52 }
 0x63f   : > { %v2021_v59 = vpop.permute.xlu1 %2020  ;;  %2196 = vrot.lane.b32.xlu0 %v6487_v33, %s4312_s2  ;;  %v1999_v45 = vpop.permute.xlu0 %1998 }
 0x640   : > { %v2044_v18 = vsel %vm419_vm2, %v2019_v14, %v2021_v59  ;;  %v2035_v8 = vsel %vm419_vm2, %v1997_v32, %v1999_v45 }
 0x641   : > { %v6495_v20 = vmax.f32 %v6357_v36, %v2044_v18 }
 0x643   : > { %2136 = vrot.lane.b32.xlu0 %v6487_v33, %s4311_s12  ;;  %v2011_v53 = vpop.permute.xlu0 %2010  ;;  %v1985_v60 = vpop.permute.xlu1 %1984 }
 0x644   : > { %v2040_v7 = vsel %vm419_vm2, %v2009_v1, %v2011_v53 }
 0x645   : > { %v6507_v13 = vmax.f32 %v6347_v16, %v2040_v7 }
 0x647   : > { %2198 = vrot.lane.b32.xlu0 %v6495_v20, %s4312_s2  ;;  %v2023_v31 = vpop.permute.xlu0 %2022  ;;  %v1981_v36 = vpop.permute.xlu1 %1980 }
 0x648   : > { %v2045_v63 = vsel %vm419_vm2, %v2021_v59, %v2023_v31 }
 0x649   : > { %v6503_v62 = vmax.f32 %v6371_v57, %v2045_v63  ;;  %v6518_v57 = vmax.f32 %v6326_v25, %v2035_v8 }
 0x64b   : > { %2138 = vrot.lane.b32.xlu0 %v6495_v20, %s4311_s12  ;;  %2346 = vmatprep.subr.mxu1 %v6503_v62  ;;  %v1983_v30 = vpop.permute.xlu0 %1982 }
 0x64c   : > { %v2028_v12 = vsel %vm419_vm2, %v1981_v36, %v1983_v30  ;;  %2347 = vmatpush1.msra.mxu1 %v6495_v20  ;;  %v2029_v3 = vsel %vm419_vm2, %v1983_v30, %v1985_v60 }
 0x64d   : > { %v6521_v16 = vmax.f32 %v6399_v21, %v2028_v12  ;;  %2348 = vmatprep.subr.mxu1 %v6507_v13  ;;  %v6532_v25 = vmax.f32 %v6412_v2, %v2029_v3 }
 0x64e   : > { %2349 = vmatpush1.msra.mxu1 %v6513_v44 }
 0x64f   : > { %2350 = vmatprep.subr.mxu1 %v6518_v57  ;;  %2172 = vrot.lane.b32.xlu1 %v6521_v16, %s4312_s2  ;;  %v1987_v37 = vpop.permute.xlu0 %1986 }
 0x650   : > { %v2030_v15 = vsel %vm419_vm2, %v1985_v60, %v1987_v37  ;;  %2351 = vmatpush1.msra.mxu1 %v6479_v47 }
 0x651   : > { %v6535_v21 = vmax.f32 %v6381_v50, %v2030_v15 }
 0x653   : > { %2174 = vrot.lane.b32.xlu1 %v6532_v25, %s4312_s2  ;;  %2176 = vrot.lane.b32.xlu0 %v6535_v21, %s4312_s2  ;;  %v2013_v2 = vpop.permute.xlu0 %2012 }
 0x654   : > { %2352 = vmatprep.subr.mxu1 %v6535_v21  ;;  %v2041_v39 = vsel %vm419_vm2, %v2011_v53, %v2013_v2 }
 0x655   : > { %2353 = vmatpush1.msra.mxu1 %v6532_v25  ;;  %v6565_v34 = vmax.f32 %v6385_v55, %v2041_v39  ;;  %v2015_v55 = vpop.permute.xlu1 %2014 }
 0x656   : > { %v2042_v28 = vsel %vm419_vm2, %v2013_v2, %v2015_v55 }
 0x657   : > { %2188 = vrot.lane.b32.xlu1 %v6544_v35, %s4312_s2  ;;  %2192 = vrot.lane.b32.xlu0 %v6507_v13, %s4312_s2  ;;  %v2001_v50 = vpop.permute.xlu0 %2000 }
 0x658   : > { %v2036_v46 = vsel %vm419_vm2, %v1999_v45, %v2001_v50 }
 0x659   : > { %v6581_v19 = vmax.f32 %v6367_v24, %v2036_v46  ;;  %v2003_v41 = vpop.permute.xlu1 %2002 }
 0x65a   : > { %v2037_v51 = vsel %vm419_vm2, %v2001_v50, %v2003_v41 }
 0x65b   : > { %2128 = vrot.lane.b32.xlu1 %v6544_v35, %s4311_s12  ;;  %2132 = vrot.lane.b32.xlu0 %v6507_v13, %s4311_s12  ;;  %v2025_v40 = vpop.permute.xlu0 %2024  ;;  %v6617_v14 = vmax.f32 %v6451_v0, %v2037_v51  ;;  %v6632_v0 = vmax.f32 %v6421_v49, %v2003_v41  ;;  %v6654_v49 = vmax.f32 %v6408_v26, %v2015_v55 }
 0x65c   : > { %v2046_v17 = vsel %vm419_vm2, %v2023_v31, %v2025_v40 }
 0x65d   : > { %v6573_v43 = vmax.f32 %v6395_v56, %v2046_v17  ;;  %v2027_v24 = vpop.permute.xlu1 %2026 }
 0x65e   : > { %v2047_v22 = vsel %vm419_vm2, %v2025_v40, %v2027_v24 }
 0x65f   : > { %2190 = vrot.lane.b32.xlu1 %v6513_v44, %s4312_s2  ;;  %2120 = vrot.lane.b32.xlu0 %v6473_v29, %s4311_s12  ;;  %v1989_v58 = vpop.permute.xlu0 %1988  ;;  %v6609_v1 = vmax.f32 %v6460_v61, %v2047_v22 }
 0x660   : > { %v2031_v32 = vsel %vm419_vm2, %v1987_v37, %v1989_v58 }
 0x661   : > { %v6589_v56 = vmax.f32 %v6425_v38, %v2031_v32  ;;  %v6606_v38 = vmax.f32 %v6434_v48, %v2042_v28  ;;  %v6624_v48 = vmax.f32 %v6438_v11, %v2027_v24  ;;  %v1991_v61 = vpop.permute.xlu1 %1990 }
 0x662   : > { %v2032_v52 = vsel %vm419_vm2, %v1989_v58, %v1991_v61  ;;  %v6659_v11 = vmax.f32 %v6447_v42, %v1991_v61 }
 0x663   : > { %2130 = vrot.lane.b32.xlu1 %v6513_v44, %s4311_s12  ;;  %2116 = vrot.lane.b32.xlu0 %v6535_v21, %s4311_s12  ;;  %v6635_v59 = vmax.f32 %v6467_v27, %v2032_v52 }
 0x667   : > { %2184 = vrot.lane.b32.xlu1 %v6518_v57, %s4312_s2  ;;  %2134 = vrot.lane.b32.xlu0 %v6565_v34, %s4311_s12 }
 0x66b   : > { %2200 = vrot.lane.b32.xlu1 %v6503_v62, %s4312_s2  ;;  %2142 = vrot.lane.b32.xlu0 %v6573_v43, %s4311_s12 }
 0x66f   : > { %2124 = vrot.lane.b32.xlu1 %v6518_v57, %s4311_s12  ;;  %2126 = vrot.lane.b32.xlu0 %v6581_v19, %s4311_s12 }
 0x673   : > { %2140 = vrot.lane.b32.xlu1 %v6503_v62, %s4311_s12  ;;  %2118 = vrot.lane.b32.xlu0 %v6589_v56, %s4311_s12 }
 0x677   : > { %2114 = vrot.lane.b32.xlu1 %v6532_v25, %s4311_s12  ;;  %2202 = vrot.lane.b32.xlu0 %v6573_v43, %s4312_s2 }
 0x67b   : > { %2112 = vrot.lane.b32.xlu1 %v6521_v16, %s4311_s12  ;;  %2186 = vrot.lane.b32.xlu0 %v6581_v19, %s4312_s2 }
 0x67f   : > { %2241 = vrot.lane.b32.xlu1 %v6606_v38, %s4311_s12  ;;  %2263 = vrot.lane.b32.xlu0 %v6609_v1, %s4312_s2 }
 0x683   : > { %2243 = vrot.lane.b32.xlu1 %v6609_v1, %s4311_s12  ;;  %2259 = vrot.lane.b32.xlu0 %v6617_v14, %s4312_s2 }
 0x687   : > { %2239 = vrot.lane.b32.xlu1 %v6617_v14, %s4311_s12  ;;  %2287 = vrot.lane.b32.xlu0 %v6624_v48, %s4311_s12 }
 0x68b   : > { %2237 = vrot.lane.b32.xlu1 %v6635_v59, %s4311_s12  ;;  %2283 = vrot.lane.b32.xlu0 %v6632_v0, %s4311_s12 }
 0x68f   : > { %2194 = vrot.lane.b32.xlu1 %v6565_v34, %s4312_s2  ;;  %2307 = vrot.lane.b32.xlu0 %v6624_v48, %s4312_s2 }
 0x693   : > { %2178 = vrot.lane.b32.xlu1 %v6589_v56, %s4312_s2  ;;  %2303 = vrot.lane.b32.xlu0 %v6632_v0, %s4312_s2 }
 0x697   : > { %2261 = vrot.lane.b32.xlu1 %v6606_v38, %s4312_s2 }
 0x69b   : > { %2257 = vrot.lane.b32.xlu1 %v6635_v59, %s4312_s2 }
 0x69f   : > { %2285 = vrot.lane.b32.xlu1 %v6654_v49, %s4311_s12 }
 0x6a1   : > { %v2181_v27 = vpop.permute.xlu0 %2180 }
 0x6a3   : > { %2281 = vrot.lane.b32.xlu1 %v6659_v11, %s4311_s12 }
 0x6a5   : > { %v2183_v45 = vpop.permute.xlu0 %2182 }
 0x6a6   : > { %v2208_v24 = vsel %vm2204_vm0, %v2181_v27, %v2183_v45 }
 0x6a7   : > { %2305 = vrot.lane.b32.xlu1 %v6654_v49, %s4312_s2 }
 0x6a9   : > { %v2123_v18 = vpop.permute.xlu0 %2122 }
 0x6ab   : > { %2301 = vrot.lane.b32.xlu1 %v6659_v11, %s4312_s2 }
 0x6b1   : > { %v2197_v26 = vpop.permute.xlu0 %2196 }
 0x6b5   : > { %v2137_v53 = vpop.permute.xlu0 %2136 }
 0x6b9   : > { %v2199_v60 = vpop.permute.xlu0 %2198 }
 0x6ba   : > { %v2214_v17 = vsel %vm2204_vm0, %v2197_v26, %v2199_v60 }
 0x6bd   : > { %v2139_v31 = vpop.permute.xlu0 %2138 }
 0x6be   : > { %v2153_v27 = vsel %vm1179_vm5, %v2137_v53, %v2139_v31 }
 0x6c1   : > { %v2173_v7 = vpop.permute.xlu1 %2172 }
 0x6c5   : > { %v2175_v63 = vpop.permute.xlu1 %2174  ;;  %v6667_v42 = vpop.permute.xlu0 %2176 }
 0x6c6   : > { %v6702_v28 = vsel %vm2204_vm0, %v2175_v63, %v6667_v42  ;;  %v2205_v61 = vsel %vm2204_vm0, %v2173_v7, %v2175_v63 }
 0x6c9   : > { %v2189_v23 = vpop.permute.xlu1 %2188  ;;  %v6669_v8 = vpop.permute.xlu0 %2192 }
 0x6cd   : > { %v2129_v36 = vpop.permute.xlu1 %2128  ;;  %v6671_v30 = vpop.permute.xlu0 %2132 }
 0x6d1   : > { %v2191_v12 = vpop.permute.xlu1 %2190  ;;  %v2121_v3 = vpop.permute.xlu0 %2120 }
 0x6d2   : > { %v6688_v46 = vsel %vm2204_vm0, %v2191_v12, %v6669_v8  ;;  %v2211_v32 = vsel %vm2204_vm0, %v2189_v23, %v2191_v12  ;;  %v2147_v23 = vsel %vm1179_vm5, %v2121_v3, %v2123_v18 }
 0x6d5   : > { %v2131_v37 = vpop.permute.xlu1 %2130  ;;  %v6673_v15 = vpop.permute.xlu0 %2116 }
 0x6d6   : > { %v2150_v7 = vsel %vm1179_vm5, %v2129_v36, %v2131_v37 }
 0x6d9   : > { %v6675_v6 = vpop.permute.xlu1 %2184  ;;  %v6677_v2 = vpop.permute.xlu0 %2134 }
 0x6da   : > { %v6696_v41 = vsel %vm2204_vm0, %v2183_v45, %v6675_v6  ;;  %v6715_v45 = vsel %vm1179_vm5, %v2131_v37, %v6671_v30 }
 0x6dd   : > { %v2201_v50 = vpop.permute.xlu1 %2200  ;;  %v6679_v39 = vpop.permute.xlu0 %2142 }
 0x6de   : > { %v6682_v40 = vsel %vm2204_vm0, %v2199_v60, %v2201_v50 }
 0x6df   : > { %2354 = vmatprep.subr.mxu1 %v6682_v40 }
 0x6e0   : > { %2355 = vmatpush1.msra.mxu1 %v2214_v17 }
 0x6e1   : > { %v2125_v58 = vpop.permute.xlu1 %2124  ;;  %2356 = vmatprep.subr.mxu1 %v6688_v46  ;;  %v6691_v55 = vpop.permute.xlu0 %2126 }
 0x6e2   : > { %2357 = vmatpush1.msra.mxu1 %v2211_v32  ;;  %v6722_v63 = vsel %vm1179_vm5, %v2123_v18, %v2125_v58 }
 0x6e3   : > { %2358 = vmatprep.subr.mxu1 %v6696_v41 }
 0x6e4   : > { %2359 = vmatpush1.msra.mxu1 %v2208_v24 }
 0x6e5   : > { %v2141_v22 = vpop.permute.xlu1 %2140  ;;  %2360 = vmatprep.subr.mxu1 %v6702_v28  ;;  %v6705_v51 = vpop.permute.xlu0 %2118 }
 0x6e6   : > { %2361 = vmatpush1.msra.mxu1 %v2205_v61  ;;  %v6709_v52 = vsel %vm1179_vm5, %v2139_v31, %v2141_v22  ;;  %v6808_v24 = vsel %vm1179_vm5, %v6673_v15, %v6705_v51 }
 0x6e7   : > { %2362 = vmatprep.subr.mxu1 %v6709_v52 }
 0x6e8   : > { %2363 = vmatpush1.msra.mxu1 %v2153_v27 }
 0x6e9   : > { %v2115_v26 = vpop.permute.xlu1 %2114  ;;  %2364 = vmatprep.subr.mxu1 %v6715_v45  ;;  %v6718_v60 = vpop.permute.xlu0 %2202 }
 0x6ea   : > { %2365 = vmatpush1.msra.mxu1 %v2150_v7  ;;  %v6728_v53 = vsel %vm1179_vm5, %v2115_v26, %v6673_v15 }
 0x6eb   : > { %2366 = vmatprep.subr.mxu1 %v6722_v63 }
 0x6ec   : > { %2367 = vmatpush1.msra.mxu1 %v2147_v23 }
 0x6ed   : > { %v2113_v31 = vpop.permute.xlu1 %2112  ;;  %2368 = vmatprep.subr.mxu1 %v6728_v53  ;;  %v6731_v12 = vpop.permute.xlu0 %2186 }
 0x6ee   : > { %v2144_v36 = vsel %vm1179_vm5, %v2113_v31, %v2115_v26 }
 0x6ef   : > { %2369 = vmatpush1.msra.mxu1 %v2144_v36 }
 0x6f0   : > { %2370 = vmatprep.subr.mxu1 %v6495_v20  ;;  %v6750_v20 = vsel %vm2204_vm0, %v2201_v50, %v6718_v60  ;;  %v6792_v50 = vsel %vm1179_vm5, %v2125_v58, %v6691_v55 }
 0x6f1   : > { %v6735_v37 = vpop.permute.xlu1 %2241  ;;  %2371 = vmatpush1.msra.mxu1 %v6487_v33  ;;  %v6738_v18 = vpop.permute.xlu0 %2263 }
 0x6f2   : > { %2372 = vmatprep.subr.mxu1 %v6513_v44  ;;  %v6744_v3 = vsel %vm2204_vm0, %v6718_v60, %v6738_v18 }
 0x6f3   : > { %2373 = vmatpush1.msra.mxu1 %v6544_v35  ;;  %2483 = vmatprep.subr.mxu0 %v6744_v3 }
 0x6f4   : > { %2374 = vmatprep.subr.mxu1 %v6479_v47  ;;  %2484 = vmatpush1.msra.mxu0 %v6750_v20  ;;  %v6767_v47 = vsel %vm1179_vm5, %v2141_v22, %v6679_v39 }
 0x6f5   : > { %v6754_v33 = vpop.permute.xlu1 %2243  ;;  %2375 = vmatpush1.msra.mxu1 %v6473_v29  ;;  %v6775_v29 = vsel %vm1179_vm5, %v6677_v2, %v6735_v37  ;;  %v6794_v17 = vpop.permute.xlu0 %2259 }
 0x6f6   : > { %2376 = vmatprep.subr.mxu1 %v6532_v25  ;;  %v6761_v44 = vsel %vm1179_vm5, %v6679_v39, %v6754_v33 }
 0x6f7   : > { %2377 = vmatpush1.msra.mxu1 %v6521_v16  ;;  %v6781_v16 = vsel %vm1179_vm5, %v6671_v30, %v6677_v2 }
 0x6f8   : > { %2378 = vmatprep.subr.mxu1 %v6761_v44 }
 0x6f9   : > { %v6769_v35 = vpop.permute.xlu1 %2239  ;;  %2379 = vmatpush2.msra.mxu1 %v6767_v47  ;;  %v6815_v22 = vpop.permute.xlu0 %2287 }
 0x6fa   : > { %2380 = vmatprep.subr.mxu1 %v6775_v29  ;;  %v6786_v25 = vsel %vm1179_vm5, %v6691_v55, %v6769_v35 }
 0x6fb   : > { %2381 = vmatpush2.msra.mxu1 %v6781_v16 }
 0x6fc   : > { %2382 = vmatprep.subr.mxu1 %v6786_v25 }
 0x6fd   : > { %v6796_v32 = vpop.permute.xlu1 %2237  ;;  %2383 = vmatpush2.msra.mxu1 %v6792_v50  ;;  %v6825_v15 = vpop.permute.xlu0 %2283 }
 0x6fe   : > { %v6802_v30 = vsel %vm1179_vm5, %v6705_v51, %v6796_v32 }
 0x6ff   : > { %2384 = vmatprep.subr.mxu1 %v6802_v30 }
 0x700   : > { %2385 = vmatpush2.msra.mxu1 %v6808_v24 }
 0x701   : > { %v6811_v58 = vpop.permute.xlu1 %2194  ;;  %2386 = vmatprep.subr.mxu1 %v6573_v43  ;;  %v2308_v31 = vpop.permute.xlu0 %2307 }
 0x702   : > { %2387 = vmatpush2.msra.mxu1 %v6503_v62  ;;  %v6834_v26 = vsel %vm2204_vm0, %v6669_v8, %v6811_v58  ;;  %v6853_v8 = vsel %vm2204_vm0, %v6731_v12, %v6794_v17  ;;  %v2312_v4 = vsel %vm2204_vm0, %v6738_v18, %v2308_v31 }
 0x703   : > { %2388 = vmatprep.subr.mxu1 %v6565_v34 }
 0x704   : > { %2389 = vmatpush2.msra.mxu1 %v6507_v13 }
 0x705   : > { %v6819_v61 = vpop.permute.xlu1 %2178  ;;  %2390 = vmatprep.subr.mxu1 %v6581_v19 }
 0x706   : > { %2391 = vmatpush2.msra.mxu1 %v6518_v57 }
 0x707   : > { %2392 = vmatprep.subr.mxu1 %v6589_v56 }
 0x708   : > { %2393 = vmatpush2.msra.mxu1 %v6535_v21 }
 0x709   : > { %v6827_v27 = vpop.permute.xlu1 %2261  ;;  %2394 = vmatprep.subr.mxu1 %v6750_v20 }
 0x70a   : > { %2395 = vmatpush2.msra.mxu1 %v6682_v40  ;;  %v6839_v7 = vsel %vm2204_vm0, %v6811_v58, %v6827_v27  ;;  %v6848_v40 = vsel %vm2204_vm0, %v6675_v6, %v6731_v12  ;;  %v2207_v6 = vsel %vm2204_vm0, %v6667_v42, %v6819_v61  ;;  %v7850_v42 = vld [vmem:[#allocation22_spill] sm:$0xff] }
 0x70b   : > { %2396 = vmatprep.subr.mxu1 %v6834_v26  ;;  %2485 = vmatprep.subr.mxu0 %v6839_v7  ;;  %v7851_v36 = vmov %v7850_v42 }
 0x70c   : > { %2397 = vmatpush2.msra.mxu1 %v6688_v46  ;;  %2486 = vmatpush1.msra.mxu0 %v6834_v26 }
 0x70d   : > { %v6855_v23 = vpop.permute.xlu1 %2257  ;;  %2398 = vmatprep.subr.mxu1 %v6848_v40  ;;  %2487 = vmatprep.subr.mxu0 %v6853_v8 }
 0x70e   : > { %2399 = vmatpush2.msra.mxu1 %v6696_v41  ;;  %2488 = vmatpush1.msra.mxu0 %v6848_v40  ;;  %v6867_v46 = vsel %vm2204_vm0, %v6819_v61, %v6855_v23 }
 0x70f   : > { %2400 = vmatprep.subr.mxu1 %v2207_v6  ;;  %2489 = vmatprep.subr.mxu0 %v6867_v46 }
 0x710   : > { %2401 = vmatpush2.msra.mxu1 %v6702_v28  ;;  %2490 = vmatpush1.msra.mxu0 %v2207_v6 }
 0x711   : > { %v6871_v41 = vpop.permute.xlu1 %2285  ;;  %2402 = vmatprep.subr.mxu1 %v6767_v47  ;;  %2709 = vmatprep.subr.mxu0 %v2308_v31 }
 0x712   : > { %2403 = vmatpush2.msra.mxu1 %v6709_v52  ;;  %3778 = vmatmul.mubr.msk.f32.vlgmr.msra.gmra.mxu0 %vm2321_vm6, %v7850_v42  ;;  %v7852_v52 = vld [vmem:[#allocation25_spill] sm:$0xff] }
 0x713   : > { %2710 = vmatpush1.msra.mxu0 %v2312_v4  ;;  %2404 = vmatprep.subr.mxu1 %v6781_v16  ;;  %v2304_v4 = vpop.permute.xlu0 %2303 }
 0x714   : > { %2405 = vmatpush2.msra.mxu1 %v6715_v45  ;;  %2529 = vmatprep.mubr.f32.mxu0 %v7849_v54  ;;  %v7853_v45 = vld [vmem:[#allocation20_spill] sm:$0xff] }
 0x715   : > { %v6882_v28 = vpop.permute.xlu1 %2281  ;;  %2406 = vmatprep.subr.mxu1 %v6792_v50 }
 0x716   : > { %2407 = vmatpush2.msra.mxu1 %v6722_v63  ;;  %3779 = vmatmul.mubr.msk.f32.gmra.mxu0 %vm2321_vm6, %v7852_v52 }
 0x717   : > { %2408 = vmatprep.subr.mxu1 %v6808_v24  ;;  %2535 = vmatprep.mubr.f32.mxu0 %v7849_v54 }
 0x718   : > { %2409 = vmatpush2.msra.mxu1 %v6728_v53  ;;  %v2310_v53 = vsel %vm2204_vm0, %v6794_v17, %v2304_v4 }
 0x719   : > { %v2306_v31 = vpop.permute.xlu1 %2305  ;;  %2411 = vmatmul.mubr.f32.vlgmr.msra.gmra.mxu1 %v7853_v45  ;;  %2572 = vmatprep.subr.mxu1 %v6609_v1 }
 0x71a   : > { %2573 = vmatpush1.msra.mxu1 %v6573_v43  ;;  %2711 = vmatprep.subr.mxu0 %v2306_v31  ;;  %v2311_v63 = vsel %vm2204_vm0, %v6827_v27, %v2306_v31  ;;  %v7854_v31 = vld [vmem:[#allocation24_spill] sm:$0xff] }
 0x71b   : > { %2574 = vmatprep.subr.mxu1 %v6606_v38  ;;  %2712 = vmatpush1.msra.mxu0 %v2311_v63  ;;  %v7856_v63 = vld [vmem:[#allocation27_spill] sm:$0xff] }
 0x71c   : > { %2575 = vmatpush1.msra.mxu1 %v6565_v34  ;;  %2713 = vmatprep.subr.mxu0 %v2304_v4  ;;  %v7855_v4 = vld [vmem:[#allocation23_spill] sm:$0xff] }
 0x71d   : > { %v2302_v42 = vpop.permute.xlu1 %2301  ;;  %2576 = vmatprep.subr.mxu1 %v6617_v14  ;;  %2714 = vmatpush1.msra.mxu0 %v2310_v53  ;;  %v7857_v53 = vld [vmem:[#allocation28_spill] sm:$0xff] }
 0x71e   : > { %2577 = vmatpush1.msra.mxu1 %v6581_v19  ;;  %2715 = vmatprep.subr.mxu0 %v2302_v42  ;;  %v2309_v5 = vsel %vm2204_vm0, %v6855_v23, %v2302_v42 }
 0x71f   : > { %2578 = vmatprep.subr.mxu1 %v6635_v59  ;;  %2716 = vmatpush1.msra.mxu0 %v2309_v5  ;;  %v7858_v5 = vld [vmem:[#allocation26_spill] sm:$0xff] }
 0x720   : > { %2579 = vmatpush1.msra.mxu1 %v6589_v56  ;;  %2416 = vmatprep.mubr.f32.mxu1 %v7854_v31 }
 0x721   : > { %2580 = vmatprep.subr.mxu1 %v6718_v60  ;;  %2417 = vmatmul.mubr.f32.gmra.mxu1 %v7855_v4  ;;  %v7859_v60 = vld [vmem:[#allocation30_spill] sm:$0xff] }
 0x722   : > { %2581 = vmatpush1.msra.mxu1 %v6750_v20  ;;  %2422 = vmatprep.mubr.f32.mxu1 %v7856_v63  ;;  %v7860_v20 = vld [vmem:[#allocation31_spill] sm:$0xff] }
 0x723   : > { %2582 = vmatprep.subr.mxu1 %v6811_v58  ;;  %3780 = vmatmul.mubr.msk.f32.gmra.mxu0 %vm2321_vm6, %v7857_v53  ;;  %v7861_v58 = vld [vmem:[#allocation29_spill] sm:$0xff] }
 0x724   : > { %2583 = vmatpush1.msra.mxu1 %v6834_v26  ;;  %2541 = vmatprep.mubr.f32.mxu0 %v7849_v54  ;;  %v7863_v26 = vld [vmem:[#allocation34_spill] sm:$0xff] }
 0x725   : > { %2584 = vmatprep.subr.mxu1 %v6731_v12  ;;  %2423 = vmatmul.mubr.f32.gmra.mxu1 %v7858_v5  ;;  %v7862_v12 = vld [vmem:[#allocation33_spill] sm:$0xff] }
 0x726   : > { %2585 = vmatpush1.msra.mxu1 %v6848_v40  ;;  %2428 = vmatprep.mubr.f32.mxu1 %v7859_v60 }
 0x727   : > { %2586 = vmatprep.subr.mxu1 %v6819_v61  ;;  %3781 = vmatmul.mubr.msk.f32.gmra.mxu0 %vm2321_vm6, %v7860_v20  ;;  %v7864_v61 = vld [vmem:[#allocation32_spill] sm:$0xff] }
 0x728   : > { %2587 = vmatpush1.msra.mxu1 %v2207_v6  ;;  %2547 = vmatprep.mubr.f32.mxu0 %v7849_v54 }
 0x729   : > { %2588 = vmatprep.subr.mxu1 %v6679_v39  ;;  %2429 = vmatmul.mubr.f32.gmra.mxu1 %v7861_v58  ;;  %v7865_v39 = vld [vmem:[#allocation36_spill] sm:$0xff] }
 0x72a   : > { %2589 = vmatpush1.msra.mxu1 %v6767_v47  ;;  %2434 = vmatprep.mubr.f32.mxu1 %v7862_v12  ;;  %v7866_v47 = vld [vmem:[#allocation37_spill] sm:$0xff] }
 0x72b   : > { %2590 = vmatprep.subr.mxu1 %v6677_v2  ;;  %3782 = vmatmul.mubr.msk.f32.gmra.mxu0 %vm2321_vm6, %v7863_v26  ;;  %v7867_v2 = vld [vmem:[#allocation35_spill] sm:$0xff] }
 0x72c   : > { %2591 = vmatpush1.msra.mxu1 %v6781_v16  ;;  %2553 = vmatprep.mubr.f32.mxu0 %v7849_v54  ;;  %v7869_v16 = vld [vmem:[#allocation40_spill] sm:$0xff] }
 0x72d   : > { %2592 = vmatprep.subr.mxu1 %v6691_v55  ;;  %2435 = vmatmul.mubr.f32.gmra.mxu1 %v7864_v61  ;;  %v7868_v55 = vld [vmem:[#allocation39_spill] sm:$0xff] }
 0x72e   : > { %2593 = vmatpush1.msra.mxu1 %v6792_v50  ;;  %2440 = vmatprep.mubr.f32.mxu1 %v7865_v39 }
 0x72f   : > { %2594 = vmatprep.subr.mxu1 %v6705_v51  ;;  %3783 = vmatmul.mubr.msk.f32.gmra.mxu0 %vm2321_vm6, %v7866_v47  ;;  %v7870_v51 = vld [vmem:[#allocation38_spill] sm:$0xff] }
 0x730   : > { %2595 = vmatpush1.msra.mxu1 %v6808_v24  ;;  %2559 = vmatprep.mubr.f32.mxu0 %v7849_v54 }
 0x731   : > { %2596 = vmatprep.subr.mxu1 %v6573_v43  ;;  %2441 = vmatmul.mubr.f32.gmra.mxu1 %v7867_v2  ;;  %v7871_v43 = vld [vmem:[#allocation42_spill] sm:$0xff] }
 0x732   : > { %2597 = vmatpush1.msra.mxu1 %v6503_v62  ;;  %2446 = vmatprep.mubr.f32.mxu1 %v7868_v55  ;;  %v7872_v50 = vmov %v7871_v43  ;;  %v7873_v62 = vld [vmem:[#allocation43_spill] sm:$0xff] }
 0x733   : > { %2598 = vmatprep.subr.mxu1 %v6565_v34  ;;  %3784 = vmatmul.mubr.msk.f32.gmra.mxu0 %vm2321_vm6, %v7869_v16  ;;  %v7874_v34 = vld [vmem:[#allocation41_spill] sm:$0xff] }
 0x734   : > { %2599 = vmatpush1.msra.mxu1 %v6507_v13  ;;  %2565 = vmatprep.mubr.f32.mxu0 %v7849_v54  ;;  %v2292_v13 = vsel %vm1179_vm5, %v6754_v33, %v6815_v22 }
 0x735   : > { %2600 = vmatprep.subr.mxu1 %v6581_v19  ;;  %2447 = vmatmul.mubr.f32.gmra.mxu1 %v7870_v51  ;;  %v2289_v19 = vsel %vm1179_vm5, %v6796_v32, %v6882_v28 }
 0x736   : > { %2601 = vmatpush1.msra.mxu1 %v6518_v57  ;;  %2452 = vmatprep.mubr.f32.mxu1 %v7871_v43  ;;  %v2291_v57 = vsel %vm1179_vm5, %v6735_v37, %v6871_v41 }
 0x737   : > { %2602 = vmatprep.subr.mxu1 %v6589_v56  ;;  %3785 = vmatmul.mubr.msk.f32.gmra.mxu0 %vm2321_vm6, %v7873_v62  ;;  %v7875_v56 = vld [vmem:[#allocation45_spill] sm:$0xff] }
 0x738   : > { %2603 = vmatpush1.msra.mxu1 %v6535_v21  ;;  %2749 = vmatprep.mubr.f32.mxu0 %v7849_v54  ;;  %v2290_v21 = vsel %vm1179_vm5, %v6769_v35, %v6825_v15 }
 0x739   : > { %2604 = vmatprep.subr.mxu1 %v6815_v22  ;;  %2453 = vmatmul.mubr.f32.gmra.mxu1 %v7874_v34 }
 0x73a   : > { %2605 = vmatpush2.msra.mxu1 %v2292_v13  ;;  %2636 = vmatprep.mubr.f32.mxu1 %v7848_v9 }
 0x73b   : > { %2606 = vmatprep.subr.mxu1 %v6871_v41  ;;  %3786 = vmatmul.mubr.msk.f32.vlgmr.msra.gmra.mxu0 %vm2321_vm6, %v7851_v36 }
 0x73c   : > { %2607 = vmatpush2.msra.mxu1 %v2291_v57  ;;  %2755 = vmatprep.mubr.f32.mxu0 %v7849_v54 }
 0x73d   : > { %2608 = vmatprep.subr.mxu1 %v6825_v15 }
 0x73e   : > { %2609 = vmatpush2.msra.mxu1 %v2290_v21 }
 0x73f   : > { %2610 = vmatprep.subr.mxu1 %v6882_v28  ;;  %3787 = vmatmul.mubr.msk.f32.gmra.mxu0 %vm2321_vm6, %v7852_v52 }
 0x740   : > { %2611 = vmatpush2.msra.mxu1 %v2289_v19  ;;  %2761 = vmatprep.mubr.f32.mxu0 %v7849_v54 }
 0x741   : > { %2612 = vmatprep.subr.mxu1 %v6624_v48 }
 0x742   : > { %2613 = vmatpush2.msra.mxu1 %v6609_v1 }
 0x743   : > { %2614 = vmatprep.subr.mxu1 %v6654_v49  ;;  %3788 = vmatmul.mubr.msk.f32.gmra.mxu0 %vm2321_vm6, %v7857_v53 }
 0x744   : > { %2615 = vmatpush2.msra.mxu1 %v6606_v38  ;;  %2767 = vmatprep.mubr.f32.mxu0 %v7849_v54  ;;  %v7876_v38 = vld [vmem:[#allocation47_spill] sm:$0xff] }
 0x745   : > { %2616 = vmatprep.subr.mxu1 %v6632_v0 }
 0x746   : > { %2617 = vmatpush2.msra.mxu1 %v6617_v14 }
 0x747   : > { %2618 = vmatprep.subr.mxu1 %v6659_v11  ;;  %3789 = vmatmul.mubr.msk.f32.gmra.mxu0 %vm2321_vm6, %v7860_v20 }
 0x748   : > { %2619 = vmatpush2.msra.mxu1 %v6635_v59  ;;  %2773 = vmatprep.mubr.f32.mxu0 %v7849_v54 }
 0x749   : > { %2620 = vmatprep.subr.mxu1 %v6738_v18 }
 0x74a   : > { %2621 = vmatpush2.msra.mxu1 %v6744_v3 }
 0x74b   : > { %2622 = vmatprep.subr.mxu1 %v6827_v27  ;;  %3790 = vmatmul.mubr.msk.f32.gmra.mxu0 %vm2321_vm6, %v7863_v26 }
 0x74c   : > { %2623 = vmatpush2.msra.mxu1 %v6839_v7  ;;  %2779 = vmatprep.mubr.f32.mxu0 %v7849_v54 }
 0x74d   : > { %2624 = vmatprep.subr.mxu1 %v6794_v17 }
 0x74e   : > { %2625 = vmatpush2.msra.mxu1 %v6853_v8 }
 0x74f   : > { %2626 = vmatprep.subr.mxu1 %v6855_v23  ;;  %3791 = vmatmul.mubr.msk.f32.gmra.mxu0 %vm2321_vm6, %v7866_v47 }
 0x750   : > { %2627 = vmatpush2.msra.mxu1 %v6867_v46  ;;  %2785 = vmatprep.mubr.f32.mxu0 %v7849_v54 }
 0x751   : > { %2628 = vmatprep.subr.mxu1 %v6754_v33 }
 0x752   : > { %2629 = vmatpush2.msra.mxu1 %v6761_v44 }
 0x753   : > { %2630 = vmatprep.subr.mxu1 %v6735_v37  ;;  %3792 = vmatmul.mubr.msk.f32.gmra.mxu0 %vm2321_vm6, %v7869_v16 }
 0x754   : > { %2631 = vmatpush2.msra.mxu1 %v6775_v29  ;;  %2791 = vmatprep.mubr.f32.mxu0 %v7849_v54 }
 0x755   : > { %2632 = vmatprep.subr.mxu1 %v6769_v35 }
 0x756   : > { %2633 = vmatpush2.msra.mxu1 %v6786_v25 }
 0x757   : > { %2634 = vmatprep.subr.mxu1 %v6796_v32  ;;  %3793 = vmatmul.mubr.msk.f32.gmra.mxu0 %vm2321_vm6, %v7873_v62 }
 0x758   : > { %2635 = vmatpush2.msra.mxu1 %v6802_v30  ;;  %3214 = vmatprep.mubr.f32.mxu0 %v7875_v56 }
 0x759   : > { %2637 = vmatmul.mubr.f32.vlgmr.msra.gmra.mxu1 %v7853_v45 }
 0x75a   : > { %2642 = vmatprep.mubr.f32.mxu1 %v7854_v31 }
 0x75d   : > { %2643 = vmatmul.mubr.f32.gmra.mxu1 %v7855_v4 }
 0x75e   : > { %2648 = vmatprep.mubr.f32.mxu1 %v7856_v63 }
 0x761   : > { %2649 = vmatmul.mubr.f32.gmra.mxu1 %v7858_v5 }
 0x762   : > { %2654 = vmatprep.mubr.f32.mxu1 %v7859_v60 }
 0x765   : > { %2655 = vmatmul.mubr.f32.gmra.mxu1 %v7861_v58 }
 0x766   : > { %2660 = vmatprep.mubr.f32.mxu1 %v7862_v12 }
 0x769   : > { %2661 = vmatmul.mubr.f32.gmra.mxu1 %v7864_v61 }
 0x76a   : > { %2666 = vmatprep.mubr.f32.mxu1 %v7865_v39 }
 0x76d   : > { %2667 = vmatmul.mubr.f32.gmra.mxu1 %v7867_v2 }
 0x76e   : > { %2672 = vmatprep.mubr.f32.mxu1 %v7868_v55 }
 0x771   : > { %2673 = vmatmul.mubr.f32.gmra.mxu1 %v7870_v51 }
 0x772   : > { %2678 = vmatprep.mubr.f32.mxu1 %v7872_v50 }
 0x775   : > { %2679 = vmatmul.mubr.f32.gmra.mxu1 %v7874_v34 }
 0x776   : > { %3319 = vmatprep.mubr.f32.mxu1 %v7876_v38 }
 0x7d2   : > { %v2525_v1 = vpop.f32.mrf.mxu0 }
 0x7d4   : > { %v2527_v0 = vpop.f32.mrf.mxu0 }
 0x7d6   : > { %v2531_v3 = vpop.f32.mrf.mxu0 }
 0x7d8   : > { %v2533_v35 = vpop.f32.mrf.mxu0 }
 0x7d9   : > { %v2412_v14 = vpop.f32.mrf.mxu1 }
 0x7da   : > { %v2526_v48 = vadd.f32 %v2525_v1, %v2412_v14 }
 0x7db   : > { %v2414_v59 = vpop.f32.mrf.mxu1 }
 0x7dc   : > { %v7042_v49 = vmax.f32 %v2526_v48, 0.0  ;;  %v2528_v11 = vadd.f32 %v2527_v0, %v2414_v59 }
 0x7de   : > { %2862 = vrot.lane.b32.xlu1 %v7042_v49, %s4312_s2  ;;  %2886 = vrot.lane.b32.xlu0 %v7042_v49, %s4313_s4  ;;  %v7048_v37 = vmax.f32 %v2528_v11, 0.0 }
 0x7e0   : > { %7877 = vst [vmem:[#allocation122_spill] sm:$0xff] %v7048_v37 }
 0x7e1   : > { %v2418_v18 = vpop.f32.mrf.mxu1 }
 0x7e2   : > { %2966 = vrot.lane.b32.xlu1 %v7048_v37, %s4313_s4  ;;  %2838 = vrot.lane.b32.xlu0 %v7042_v49, %s4311_s12  ;;  %v2532_v33 = vadd.f32 %v2531_v3, %v2418_v18 }
 0x7e3   : > { %v2420_v44 = vpop.f32.mrf.mxu1  ;;  %v2537_v30 = vpop.f32.mrf.mxu0 }
 0x7e4   : > { %v7054_v29 = vmax.f32 %v2532_v33, 0.0  ;;  %v2534_v25 = vadd.f32 %v2533_v35, %v2420_v44 }
 0x7e5   : > { %v2424_v32 = vpop.f32.mrf.mxu1  ;;  %v2539_v15 = vpop.f32.mrf.mxu0 }
 0x7e6   : > { %2942 = vrot.lane.b32.xlu1 %v7048_v37, %s4312_s2  ;;  %2918 = vrot.lane.b32.xlu0 %v7048_v37, %s4311_s12  ;;  %v7064_v17 = vmax.f32 %v2534_v25, 0.0  ;;  %v2538_v24 = vadd.f32 %v2537_v30, %v2424_v32 }
 0x7e7   : > { %v2426_v22 = vpop.f32.mrf.mxu1  ;;  %v2543_v23 = vpop.f32.mrf.mxu0 }
 0x7e8   : > { %v7070_v27 = vmax.f32 %v2538_v24, 0.0  ;;  %v2540_v7 = vadd.f32 %v2539_v15, %v2426_v22 }
 0x7e9   : > { %v2430_v8 = vpop.f32.mrf.mxu1  ;;  %v2545_v41 = vpop.f32.mrf.mxu0 }
 0x7ea   : > { %2864 = vrot.lane.b32.xlu1 %v7054_v29, %s4312_s2  ;;  %2888 = vrot.lane.b32.xlu0 %v7054_v29, %s4313_s4  ;;  %v7080_v40 = vmax.f32 %v2540_v7, 0.0  ;;  %v2544_v6 = vadd.f32 %v2543_v23, %v2430_v8 }
 0x7eb   : > { %v2432_v46 = vpop.f32.mrf.mxu1  ;;  %v2549_v57 = vpop.f32.mrf.mxu0 }
 0x7ec   : > { %v7086_v28 = vmax.f32 %v2544_v6, 0.0  ;;  %v2546_v42 = vadd.f32 %v2545_v41, %v2432_v46 }
 0x7ed   : > { %v2436_v13 = vpop.f32.mrf.mxu1  ;;  %v2551_v56 = vpop.f32.mrf.mxu0 }
 0x7ee   : > { %2968 = vrot.lane.b32.xlu1 %v7064_v17, %s4313_s4  ;;  %2840 = vrot.lane.b32.xlu0 %v7054_v29, %s4311_s12  ;;  %v7096_v43 = vmax.f32 %v2546_v42, 0.0  ;;  %v2550_v21 = vadd.f32 %v2549_v57, %v2436_v13 }
 0x7ef   : > { %v2438_v19 = vpop.f32.mrf.mxu1  ;;  %v2555_v0 = vpop.f32.mrf.mxu0 }
 0x7f0   : > { %v7102_v38 = vmax.f32 %v2550_v21, 0.0  ;;  %v2552_v1 = vadd.f32 %v2551_v56, %v2438_v19 }
 0x7f1   : > { %v2442_v48 = vpop.f32.mrf.mxu1  ;;  %v2557_v18 = vpop.f32.mrf.mxu0 }
 0x7f2   : > { %2920 = vrot.lane.b32.xlu1 %v7064_v17, %s4311_s12  ;;  %2944 = vrot.lane.b32.xlu0 %v7064_v17, %s4312_s2  ;;  %v7112_v14 = vmax.f32 %v2552_v1, 0.0  ;;  %v2556_v59 = vadd.f32 %v2555_v0, %v2442_v48 }
 0x7f3   : > { %v2444_v11 = vpop.f32.mrf.mxu1  ;;  %v2561_v25 = vpop.f32.mrf.mxu0 }
 0x7f4   : > { %v7118_v3 = vmax.f32 %v2556_v59, 0.0  ;;  %v2558_v33 = vadd.f32 %v2557_v18, %v2444_v11 }
 0x7f5   : > { %v2448_v35 = vpop.f32.mrf.mxu1  ;;  %v2563_v24 = vpop.f32.mrf.mxu0 }
 0x7f6   : > { %2866 = vrot.lane.b32.xlu1 %v7070_v27, %s4312_s2  ;;  %2890 = vrot.lane.b32.xlu0 %v7070_v27, %s4313_s4  ;;  %v7128_v44 = vmax.f32 %v2558_v33, 0.0  ;;  %v2562_v32 = vadd.f32 %v2561_v25, %v2448_v35 }
 0x7f7   : > { %v2450_v30 = vpop.f32.mrf.mxu1  ;;  %v2567_v8 = vpop.f32.mrf.mxu0 }
 0x7f8   : > { %v7134_v22 = vmax.f32 %v2562_v32, 0.0  ;;  %v2564_v15 = vadd.f32 %v2563_v24, %v2450_v30 }
 0x7f9   : > { %v2454_v7 = vpop.f32.mrf.mxu1  ;;  %v2569_v46 = vpop.f32.mrf.mxu0 }
 0x7fa   : > { %2970 = vrot.lane.b32.xlu1 %v7080_v40, %s4313_s4  ;;  %2842 = vrot.lane.b32.xlu0 %v7070_v27, %s4311_s12  ;;  %v7144_v23 = vmax.f32 %v2564_v15, 0.0  ;;  %v2568_v41 = vadd.f32 %v2567_v8, %v2454_v7 }
 0x7fb   : > { %v2456_v6 = vpop.f32.mrf.mxu1  ;;  %v2751_v13 = vpop.f32.mrf.mxu0 }
 0x7fc   : > { %v7150_v57 = vmax.f32 %v2568_v41, 0.0  ;;  %v2570_v56 = vadd.f32 %v2569_v46, %v2456_v6 }
 0x7fd   : > { %v2753_v19 = vpop.f32.mrf.mxu0 }
 0x7fe   : > { %2922 = vrot.lane.b32.xlu1 %v7080_v40, %s4311_s12  ;;  %2946 = vrot.lane.b32.xlu0 %v7080_v40, %s4312_s2  ;;  %v7160_v0 = vmax.f32 %v2570_v56, 0.0 }
 0x7ff   : > { %v2757_v48 = vpop.f32.mrf.mxu0 }
 0x801   : > { %v2759_v33 = vpop.f32.mrf.mxu0 }
 0x802   : > { %2868 = vrot.lane.b32.xlu1 %v7086_v28, %s4312_s2  ;;  %2892 = vrot.lane.b32.xlu0 %v7086_v28, %s4313_s4 }
 0x803   : > { %v2763_v24 = vpop.f32.mrf.mxu0 }
 0x805   : > { %v2765_v8 = vpop.f32.mrf.mxu0 }
 0x806   : > { %2972 = vrot.lane.b32.xlu1 %v7096_v43, %s4313_s4  ;;  %2844 = vrot.lane.b32.xlu0 %v7086_v28, %s4311_s12 }
 0x807   : > { %v2769_v41 = vpop.f32.mrf.mxu0 }
 0x80a   : > { %2924 = vrot.lane.b32.xlu1 %v7096_v43, %s4311_s12  ;;  %2948 = vrot.lane.b32.xlu0 %v7096_v43, %s4312_s2 }
 0x80e   : > { %2870 = vrot.lane.b32.xlu1 %v7102_v38, %s4312_s2  ;;  %2894 = vrot.lane.b32.xlu0 %v7102_v38, %s4313_s4 }
 0x812   : > { %2974 = vrot.lane.b32.xlu1 %v7112_v14, %s4313_s4  ;;  %2846 = vrot.lane.b32.xlu0 %v7102_v38, %s4311_s12 }
 0x816   : > { %2926 = vrot.lane.b32.xlu1 %v7112_v14, %s4311_s12  ;;  %2950 = vrot.lane.b32.xlu0 %v7112_v14, %s4312_s2 }
 0x819   : > { %v2638_v42 = vpop.f32.mrf.mxu1 }
 0x81a   : > { %2872 = vrot.lane.b32.xlu1 %v7118_v3, %s4312_s2  ;;  %2896 = vrot.lane.b32.xlu0 %v7118_v3, %s4313_s4  ;;  %v2752_v59 = vadd.f32 %v2751_v13, %v2638_v42 }
 0x81b   : > { %v2640_v21 = vpop.f32.mrf.mxu1 }
 0x81c   : > { %v2754_v11 = vadd.f32 %v2753_v19, %v2640_v21  ;;  %v7166_v35 = vmax.f32 %v2752_v59, 0.0  ;;  %v2771_v19 = vpop.f32.mrf.mxu0 }
 0x81d   : > { %v2644_v1 = vpop.f32.mrf.mxu1 }
 0x81e   : > { %2976 = vrot.lane.b32.xlu1 %v7128_v44, %s4313_s4  ;;  %2848 = vrot.lane.b32.xlu0 %v7118_v3, %s4311_s12  ;;  %7878 = vst [vmem:[#allocation118_spill] sm:$0xff] %v7166_v35  ;;  %v7168_v25 = vmax.f32 %v2754_v11, 0.0  ;;  %v2758_v42 = vadd.f32 %v2757_v48, %v2644_v1  ;;  %v2775_v48 = vpop.f32.mrf.mxu0 }
 0x81f   : > { %v2646_v18 = vpop.f32.mrf.mxu1 }
 0x820   : > { %7879 = vst [vmem:[#allocation124_spill] sm:$0xff] %v7168_v25  ;;  %v2760_v32 = vadd.f32 %v2759_v33, %v2646_v18  ;;  %v7190_v56 = vmax.f32 %v2758_v42, 0.0 }
 0x821   : > { %v2650_v30 = vpop.f32.mrf.mxu1 }
 0x822   : > { %2928 = vrot.lane.b32.xlu1 %v7128_v44, %s4311_s12  ;;  %2952 = vrot.lane.b32.xlu0 %v7128_v44, %s4312_s2  ;;  %v7174_v15 = vmax.f32 %v2760_v32, 0.0  ;;  %7881 = vst [vmem:[#allocation121_spill] sm:$0xff] %v7190_v56  ;;  %v2764_v11 = vadd.f32 %v2763_v24, %v2650_v30  ;;  %v2777_v32 = vpop.f32.mrf.mxu0 }
 0x823   : > { %v2652_v7 = vpop.f32.mrf.mxu1 }
 0x824   : > { %v2766_v6 = vadd.f32 %v2765_v8, %v2652_v7  ;;  %v7202_v7 = vmax.f32 %v2764_v11, 0.0  ;;  %v2781_v42 = vpop.f32.mrf.mxu0 }
 0x825   : > { %v2656_v46 = vpop.f32.mrf.mxu1 }
 0x826   : > { %2874 = vrot.lane.b32.xlu1 %v7134_v22, %s4312_s2  ;;  %2898 = vrot.lane.b32.xlu0 %v7134_v22, %s4313_s4  ;;  %v7184_v13 = vmax.f32 %v2766_v6, 0.0  ;;  %7883 = vst [vmem:[#allocation120_spill] sm:$0xff] %v7202_v7  ;;  %v2783_v4 = vpop.f32.mrf.mxu0 }
 0x827   : > { %v2658_v21 = vpop.f32.mrf.mxu1 }
 0x828   : > { %7880 = vst [vmem:[#allocation123_spill] sm:$0xff] %v7184_v13  ;;  %v2772_v59 = vadd.f32 %v2771_v19, %v2658_v21  ;;  %v2770_v21 = vadd.f32 %v2769_v41, %v2656_v46 }
 0x829   : > { %v2662_v1 = vpop.f32.mrf.mxu1 }
 0x82a   : > { %2978 = vrot.lane.b32.xlu1 %v7144_v23, %s4313_s4  ;;  %2850 = vrot.lane.b32.xlu0 %v7134_v22, %s4311_s12  ;;  %v7196_v18 = vmax.f32 %v2772_v59, 0.0  ;;  %v7222_v5 = vmax.f32 %v2770_v21, 0.0  ;;  %v2776_v9 = vadd.f32 %v2775_v48, %v2662_v1 }
 0x82b   : > { %v2664_v33 = vpop.f32.mrf.mxu1 }
 0x82c   : > { %7882 = vst [vmem:[#allocation119_spill] sm:$0xff] %v7196_v18  ;;  %v2778_v30 = vadd.f32 %v2777_v32, %v2664_v33  ;;  %7885 = vst [vmem:[#allocation126_spill] sm:$0xff] %v7222_v5  ;;  %v7242_v26 = vmax.f32 %v2776_v9, 0.0 }
 0x82d   : > { %v2668_v24 = vpop.f32.mrf.mxu1 }
 0x82e   : > { %2930 = vrot.lane.b32.xlu1 %v7144_v23, %s4311_s12  ;;  %2954 = vrot.lane.b32.xlu0 %v7144_v23, %s4312_s2  ;;  %v7216_v11 = vmax.f32 %v2778_v30, 0.0  ;;  %v2787_v30 = vpop.f32.mrf.mxu0  ;;  %7887 = vst [vmem:[#allocation128_spill] sm:$0xff] %v7242_v26  ;;  %v2782_v48 = vadd.f32 %v2781_v42, %v2668_v24 }
 0x82f   : > { %v2670_v2 = vpop.f32.mrf.mxu1 }
 0x830   : > { %7884 = vst [vmem:[#allocation125_spill] sm:$0xff] %v7216_v11  ;;  %v2784_v46 = vadd.f32 %v2783_v4, %v2670_v2  ;;  %v2789_v20 = vpop.f32.mrf.mxu0  ;;  %v7262_v39 = vmax.f32 %v2782_v48, 0.0 }
 0x831   : > { %v2674_v41 = vpop.f32.mrf.mxu1 }
 0x832   : > { %2852 = vrot.lane.b32.xlu1 %v7150_v57, %s4311_s12  ;;  %2900 = vrot.lane.b32.xlu0 %v7150_v57, %s4313_s4  ;;  %v7236_v21 = vmax.f32 %v2784_v46, 0.0  ;;  %v2793_v36 = vpop.f32.mrf.mxu0  ;;  %7889 = vst [vmem:[#allocation130_spill] sm:$0xff] %v7262_v39  ;;  %v2788_v24 = vadd.f32 %v2787_v30, %v2674_v41 }
 0x833   : > { %v2676_v16 = vpop.f32.mrf.mxu1 }
 0x834   : > { %7886 = vst [vmem:[#allocation127_spill] sm:$0xff] %v7236_v21  ;;  %v2790_v1 = vadd.f32 %v2789_v20, %v2676_v16  ;;  %v2795_v50 = vpop.f32.mrf.mxu0  ;;  %v7282_v51 = vmax.f32 %v2788_v24, 0.0 }
 0x835   : > { %v2680_v9 = vpop.f32.mrf.mxu1 }
 0x836   : > { %2980 = vrot.lane.b32.xlu1 %v7160_v0, %s4313_s4  ;;  %2876 = vrot.lane.b32.xlu0 %v7150_v57, %s4312_s2  ;;  %v7256_v34 = vmax.f32 %v2790_v1, 0.0  ;;  %v2794_v16 = vadd.f32 %v2793_v36, %v2680_v9  ;;  %7891 = vst [vmem:[#allocation132_spill] sm:$0xff] %v7282_v51 }
 0x837   : > { %v2682_v47 = vpop.f32.mrf.mxu1 }
 0x838   : > { %7888 = vst [vmem:[#allocation129_spill] sm:$0xff] %v7256_v34  ;;  %v7276_v48 = vmax.f32 %v2794_v16, 0.0  ;;  %v2796_v52 = vadd.f32 %v2795_v50, %v2682_v47 }
 0x83a   : > { %2932 = vrot.lane.b32.xlu1 %v7160_v0, %s4311_s12  ;;  %2956 = vrot.lane.b32.xlu0 %v7160_v0, %s4312_s2  ;;  %7890 = vst [vmem:[#allocation131_spill] sm:$0xff] %v7276_v48  ;;  %v7292_v41 = vmax.f32 %v2796_v52, 0.0 }
 0x83c   : > { %7892 = vst [vmem:[#allocation133_spill] sm:$0xff] %v7292_v41 }
 0x83e   : > { %3126 = vrot.lane.b32.xlu1 %v7168_v25, %s4313_s4  ;;  %3046 = vrot.lane.b32.xlu0 %v7166_v35, %s4313_s4 }
 0x842   : > { %3128 = vrot.lane.b32.xlu1 %v7174_v15, %s4313_s4  ;;  %2998 = vrot.lane.b32.xlu0 %v7166_v35, %s4311_s12 }
 0x846   : > { %3080 = vrot.lane.b32.xlu1 %v7174_v15, %s4311_s12  ;;  %3078 = vrot.lane.b32.xlu0 %v7168_v25, %s4311_s12 }
 0x84a   : > { %3130 = vrot.lane.b32.xlu1 %v7184_v13, %s4313_s4  ;;  %3048 = vrot.lane.b32.xlu0 %v7190_v56, %s4313_s4 }
 0x84e   : > { %3082 = vrot.lane.b32.xlu1 %v7184_v13, %s4311_s12  ;;  %3000 = vrot.lane.b32.xlu0 %v7190_v56, %s4311_s12 }
 0x850   : > { %v7204_v8 = vpop.permute.xlu1 %2862  ;;  %v7206_v6 = vpop.permute.xlu0 %2886 }
 0x852   : > { %3132 = vrot.lane.b32.xlu1 %v7196_v18, %s4313_s4  ;;  %3050 = vrot.lane.b32.xlu0 %v7202_v7, %s4313_s4 }
 0x854   : > { %v7212_v19 = vpop.permute.xlu1 %2966  ;;  %v7214_v59 = vpop.permute.xlu0 %2838 }
 0x856   : > { %3084 = vrot.lane.b32.xlu1 %v7196_v18, %s4311_s12  ;;  %3002 = vrot.lane.b32.xlu0 %v7202_v7, %s4311_s12 }
 0x858   : > { %v7224_v33 = vpop.permute.xlu1 %2942  ;;  %v7226_v32 = vpop.permute.xlu0 %2918 }
 0x85a   : > { %3134 = vrot.lane.b32.xlu1 %v7216_v11, %s4313_s4  ;;  %3052 = vrot.lane.b32.xlu0 %v7222_v5, %s4313_s4 }
 0x85c   : > { %v7232_v10 = vpop.permute.xlu1 %2864  ;;  %v7234_v12 = vpop.permute.xlu0 %2888 }
 0x85e   : > { %3086 = vrot.lane.b32.xlu1 %v7216_v11, %s4311_s12  ;;  %3004 = vrot.lane.b32.xlu0 %v7222_v5, %s4311_s12 }
 0x860   : > { %v7244_v4 = vpop.permute.xlu1 %2968  ;;  %v7246_v2 = vpop.permute.xlu0 %2840 }
 0x862   : > { %3136 = vrot.lane.b32.xlu1 %v7236_v21, %s4313_s4  ;;  %3054 = vrot.lane.b32.xlu0 %v7242_v26, %s4313_s4 }
 0x864   : > { %v7252_v46 = vpop.permute.xlu1 %2920  ;;  %v7254_v31 = vpop.permute.xlu0 %2944 }
 0x866   : > { %3088 = vrot.lane.b32.xlu1 %v7236_v21, %s4311_s12  ;;  %3006 = vrot.lane.b32.xlu0 %v7242_v26, %s4311_s12 }
 0x868   : > { %v7264_v45 = vpop.permute.xlu1 %2866  ;;  %v7266_v20 = vpop.permute.xlu0 %2890 }
 0x86a   : > { %3138 = vrot.lane.b32.xlu1 %v7256_v34, %s4313_s4  ;;  %3056 = vrot.lane.b32.xlu0 %v7262_v39, %s4313_s4 }
 0x86c   : > { %v7272_v42 = vpop.permute.xlu1 %2970  ;;  %v7274_v1 = vpop.permute.xlu0 %2842 }
 0x86e   : > { %3090 = vrot.lane.b32.xlu1 %v7256_v34, %s4311_s12  ;;  %3008 = vrot.lane.b32.xlu0 %v7262_v39, %s4311_s12 }
 0x870   : > { %v7284_v53 = vpop.permute.xlu1 %2922  ;;  %v7286_v36 = vpop.permute.xlu0 %2946 }
 0x872   : > { %3012 = vrot.lane.b32.xlu1 %v7276_v48, %s4311_s12  ;;  %3058 = vrot.lane.b32.xlu0 %v7282_v51, %s4313_s4 }
 0x874   : > { %v7294_v30 = vpop.permute.xlu1 %2868  ;;  %v2893_v9 = vpop.permute.xlu0 %2892 }
 0x876   : > { %3140 = vrot.lane.b32.xlu1 %v7292_v41, %s4313_s4  ;;  %3010 = vrot.lane.b32.xlu0 %v7282_v51, %s4311_s12 }
 0x878   : > { %v7300_v47 = vpop.permute.xlu1 %2972  ;;  %v2845_v50 = vpop.permute.xlu0 %2844 }
 0x87a   : > { %3092 = vrot.lane.b32.xlu1 %v7292_v41, %s4311_s12  ;;  %3060 = vrot.lane.b32.xlu0 %v7276_v48, %s4313_s4 }
 0x87c   : > { %v7306_v52 = vpop.permute.xlu1 %2924  ;;  %v7308_v16 = vpop.permute.xlu0 %2948 }
 0x87e   : > { %3034 = vrot.lane.b32.xlu1 %v7282_v51, %s4312_s2  ;;  %3036 = vrot.lane.b32.xlu0 %v7276_v48, %s4312_s2 }
 0x880   : > { %v7314_v24 = vpop.permute.xlu1 %2870  ;;  %v2895_v55 = vpop.permute.xlu0 %2894 }
 0x882   : > { %3032 = vrot.lane.b32.xlu1 %v7262_v39, %s4312_s2  ;;  %3114 = vrot.lane.b32.xlu0 %v7256_v34, %s4312_s2 }
 0x884   : > { %v2975_v58 = vpop.permute.xlu1 %2974  ;;  %v2847_v60 = vpop.permute.xlu0 %2846 }
 0x886   : > { %3030 = vrot.lane.b32.xlu1 %v7242_v26, %s4312_s2  ;;  %3112 = vrot.lane.b32.xlu0 %v7236_v21, %s4312_s2 }
 0x888   : > { %v2927_v61 = vpop.permute.xlu1 %2926  ;;  %v7324_v62 = vpop.permute.xlu0 %2950 }
 0x88a   : > { %3028 = vrot.lane.b32.xlu1 %v7222_v5, %s4312_s2  ;;  %3110 = vrot.lane.b32.xlu0 %v7216_v11, %s4312_s2 }
 0x88c   : > { %v7330_v63 = vpop.permute.xlu1 %2872  ;;  %v2897_v54 = vpop.permute.xlu0 %2896 }
 0x88e   : > { %3026 = vrot.lane.b32.xlu1 %v7202_v7, %s4312_s2  ;;  %3116 = vrot.lane.b32.xlu0 %v7292_v41, %s4312_s2 }
 0x890   : > { %v2977_v34 = vpop.permute.xlu1 %2976  ;;  %v2849_v21 = vpop.permute.xlu0 %2848 }
 0x892   : > { %3024 = vrot.lane.b32.xlu1 %v7190_v56, %s4312_s2  ;;  %3108 = vrot.lane.b32.xlu0 %v7196_v18, %s4312_s2 }
 0x894   : > { %v2929_v5 = vpop.permute.xlu1 %2928  ;;  %v7340_v26 = vpop.permute.xlu0 %2952 }
 0x896   : > { %3022 = vrot.lane.b32.xlu1 %v7166_v35, %s4312_s2  ;;  %3106 = vrot.lane.b32.xlu0 %v7184_v13, %s4312_s2 }
 0x898   : > { %v2875_v11 = vpop.permute.xlu1 %2874  ;;  %v2899_v7 = vpop.permute.xlu0 %2898 }
 0x89a   : > { %3102 = vrot.lane.b32.xlu1 %v7168_v25, %s4312_s2  ;;  %3104 = vrot.lane.b32.xlu0 %v7174_v15, %s4312_s2 }
 0x89c   : > { %v2979_v56 = vpop.permute.xlu1 %2978  ;;  %v2851_v41 = vpop.permute.xlu0 %2850 }
 0x8a0   : > { %v2931_v18 = vpop.permute.xlu1 %2930  ;;  %v2955_v39 = vpop.permute.xlu0 %2954 }
 0x8a4   : > { %v2853_v51 = vpop.permute.xlu1 %2852  ;;  %v2901_v48 = vpop.permute.xlu0 %2900 }
 0x8a5   : > { %3798 = vmatprep.subr.mxu0 %v2901_v48  ;;  %v7920_v48 = vld [vmem:[#allocation100_spill] sm:$0xff] }
 0x8a6   : > { %3799 = vmatpush3.msra.mxu0 %v2853_v51 }
 0x8a7   : > { %3800 = vmatprep.subr.mxu0 %v2899_v7 }
 0x8a8   : > { %v2981_v35 = vpop.permute.xlu1 %2980  ;;  %3801 = vmatpush3.msra.mxu0 %v2851_v41  ;;  %v2877_v13 = vpop.permute.xlu0 %2876 }
 0x8a9   : > { %3802 = vmatprep.subr.mxu0 %v2897_v54  ;;  %3854 = vmatprep.subr.mxu1 %v2981_v35  ;;  %v7907_v35 = vld [vmem:[#allocation71_spill] sm:$0xff] }
 0x8aa   : > { %3803 = vmatpush3.msra.mxu0 %v2849_v21  ;;  %v7915_v21 = vld [vmem:[#allocation87_spill] sm:$0xff] }
 0x8ab   : > { %3804 = vmatprep.subr.mxu0 %v2895_v55 }
 0x8ac   : > { %v2933_v25 = vpop.permute.xlu1 %2932  ;;  %3805 = vmatpush3.msra.mxu0 %v2847_v60  ;;  %v2957_v37 = vpop.permute.xlu0 %2956 }
 0x8ad   : > { %3806 = vmatprep.subr.mxu0 %v2893_v9  ;;  %3855 = vmatpush3.msra.mxu1 %v2933_v25  ;;  %v7908_v25 = vld [vmem:[#allocation76_spill] sm:$0xff]  ;;  %v7922_v9 = vld [vmem:[#allocation94_spill] sm:$0xff] }
 0x8ae   : > { %3807 = vmatpush3.msra.mxu0 %v2845_v50  ;;  %3856 = vmatprep.subr.mxu1 %v2979_v56 }
 0x8af   : > { %3808 = vmatprep.subr.mxu0 %v7266_v20  ;;  %3857 = vmatpush3.msra.mxu1 %v2931_v18 }
 0x8b0   : > { %3858 = vmatprep.subr.mxu1 %v2977_v34  ;;  %v7351_v51 = vpop.permute.xlu1 %3126  ;;  %3809 = vmatpush3.msra.mxu0 %v7274_v1  ;;  %v7354_v7 = vpop.permute.xlu0 %3046  ;;  %v7895_v34 = vld [vmem:[#allocation52_spill] sm:$0xff]  ;;  %v7919_v1 = vld [vmem:[#allocation95_spill] sm:$0xff] }
 0x8b1   : > { %3810 = vmatprep.subr.mxu0 %v7234_v12  ;;  %3859 = vmatpush3.msra.mxu1 %v2929_v5 }
 0x8b2   : > { %3811 = vmatpush3.msra.mxu0 %v7246_v2  ;;  %3860 = vmatprep.subr.mxu1 %v2975_v58  ;;  %v7917_v2 = vld [vmem:[#allocation101_spill] sm:$0xff] }
 0x8b3   : > { %3812 = vmatprep.subr.mxu0 %v7206_v6  ;;  %3861 = vmatpush3.msra.mxu1 %v2927_v61  ;;  %v7911_v6 = vld [vmem:[#allocation79_spill] sm:$0xff] }
 0x8b4   : > { %3862 = vmatprep.subr.mxu1 %v7300_v47  ;;  %v7360_v54 = vpop.permute.xlu1 %3128  ;;  %3813 = vmatpush3.msra.mxu0 %v7214_v59  ;;  %v7363_v60 = vpop.permute.xlu0 %2998  ;;  %v7913_v59 = vld [vmem:[#allocation93_spill] sm:$0xff]  ;;  %v7923_v47 = vld [vmem:[#allocation103_spill] sm:$0xff] }
 0x8b5   : > { %3814 = vmatprep.subr.mxu0 %v2877_v13  ;;  %3863 = vmatpush3.msra.mxu1 %v7306_v52  ;;  %v7909_v13 = vld [vmem:[#allocation85_spill] sm:$0xff] }
 0x8b6   : > { %3815 = vmatpush3.msra.mxu0 %v7150_v57  ;;  %3864 = vmatprep.subr.mxu1 %v7272_v42  ;;  %v7918_v42 = vld [vmem:[#allocation86_spill] sm:$0xff] }
 0x8b7   : > { %3816 = vmatprep.subr.mxu0 %v2875_v11  ;;  %3865 = vmatpush3.msra.mxu1 %v7284_v53 }
 0x8b8   : > { %3866 = vmatprep.subr.mxu1 %v7244_v4  ;;  %v7370_v5 = vpop.permute.xlu1 %3080  ;;  %3817 = vmatpush3.msra.mxu0 %v7134_v22  ;;  %v7373_v58 = vpop.permute.xlu0 %3078  ;;  %v7905_v22 = vld [vmem:[#allocation77_spill] sm:$0xff]  ;;  %v7916_v4 = vld [vmem:[#allocation92_spill] sm:$0xff] }
 0x8b9   : > { %3818 = vmatprep.subr.mxu0 %v7330_v63  ;;  %3867 = vmatpush3.msra.mxu1 %v7252_v46 }
 0x8ba   : > { %3819 = vmatpush3.msra.mxu0 %v7118_v3  ;;  %3868 = vmatprep.subr.mxu1 %v7212_v19  ;;  %v7903_v3 = vld [vmem:[#allocation63_spill] sm:$0xff]  ;;  %v7912_v19 = vld [vmem:[#allocation84_spill] sm:$0xff] }
 0x8bb   : > { %3820 = vmatprep.subr.mxu0 %v7314_v24  ;;  %3869 = vmatpush3.msra.mxu1 %v7226_v32  ;;  %v7914_v32 = vld [vmem:[#allocation78_spill] sm:$0xff]  ;;  %v7925_v24 = vld [vmem:[#allocation51_spill] sm:$0xff] }
 0x8bc   : > { %v7381_v53 = vpop.permute.xlu1 %3130  ;;  %3821 = vmatpush3.msra.mxu0 %v7102_v38  ;;  %3870 = vmatprep.subr.mxu1 %v2957_v37  ;;  %v7384_v12 = vpop.permute.xlu0 %3048  ;;  %v7897_v37 = vld [vmem:[#allocation122_spill] sm:$0xff] }
 0x8bd   : > { %3822 = vmatprep.subr.mxu0 %v7294_v30  ;;  %3871 = vmatpush3.msra.mxu1 %v7160_v0  ;;  %v7906_v0 = vld [vmem:[#allocation62_spill] sm:$0xff] }
 0x8be   : > { %3823 = vmatpush3.msra.mxu0 %v7086_v28  ;;  %3872 = vmatprep.subr.mxu1 %v2955_v39  ;;  %v7894_v39 = vld [vmem:[#allocation53_spill] sm:$0xff]  ;;  %v7899_v28 = vld [vmem:[#allocation55_spill] sm:$0xff] }
 0x8bf   : > { %3824 = vmatprep.subr.mxu0 %v7264_v45  ;;  %3873 = vmatpush3.msra.mxu1 %v7144_v23 }
 0x8c0   : > { %v7391_v63 = vpop.permute.xlu1 %3082  ;;  %3825 = vmatpush3.msra.mxu0 %v7070_v27  ;;  %3874 = vmatprep.subr.mxu1 %v7340_v26  ;;  %v7395_v61 = vpop.permute.xlu0 %3000 }
 0x8c1   : > { %3826 = vmatprep.subr.mxu0 %v7232_v10  ;;  %3875 = vmatpush3.msra.mxu1 %v7128_v44  ;;  %v7893_v10 = vld [vmem:[#allocation44_spill] sm:$0xff] }
 0x8c2   : > { %3827 = vmatpush3.msra.mxu0 %v7054_v29  ;;  %3876 = vmatprep.subr.mxu1 %v7324_v62  ;;  %v7904_v44 = vld [vmem:[#allocation68_spill] sm:$0xff] }
 0x8c3   : > { %3828 = vmatprep.subr.mxu0 %v7204_v8  ;;  %3877 = vmatpush3.msra.mxu1 %v7112_v14  ;;  %v7902_v14 = vld [vmem:[#allocation54_spill] sm:$0xff] }
 0x8c4   : > { %v7403_v45 = vpop.permute.xlu1 %3132  ;;  %3829 = vmatpush3.msra.mxu0 %v7042_v49  ;;  %3878 = vmatprep.subr.mxu1 %v7308_v16  ;;  %v7407_v26 = vpop.permute.xlu0 %3050  ;;  %v7896_v49 = vld [vmem:[#allocation61_spill] sm:$0xff]  ;;  %v7910_v8 = vld [vmem:[#allocation70_spill] sm:$0xff] }
 0x8c5   : > { %3879 = vmatpush3.msra.mxu1 %v7096_v43  ;;  %3215 = vmatmul.mubr.f32.vlgmr.msra.gmra.mxu0 %v7893_v10  ;;  %v7901_v43 = vld [vmem:[#allocation69_spill] sm:$0xff]  ;;  %v7924_v16 = vld [vmem:[#allocation102_spill] sm:$0xff] }
 0x8c6   : > { %3880 = vmatprep.subr.mxu1 %v7286_v36  ;;  %3219 = vmatprep.mubr.f32.mxu0 %v7894_v39  ;;  %v7921_v36 = vld [vmem:[#allocation49_spill] sm:$0xff] }
 0x8c7   : > { %3881 = vmatpush3.msra.mxu1 %v7080_v40  ;;  %v7898_v40 = vld [vmem:[#allocation46_spill] sm:$0xff] }
 0x8c8   : > { %v7414_v55 = vpop.permute.xlu1 %3084  ;;  %3882 = vmatprep.subr.mxu1 %v7254_v31  ;;  %v7417_v62 = vpop.permute.xlu0 %3002  ;;  %v7900_v31 = vld [vmem:[#allocation60_spill] sm:$0xff] }
 0x8c9   : > { %3883 = vmatpush3.msra.mxu1 %v7064_v17  ;;  %3220 = vmatmul.mubr.f32.gmra.mxu0 %v7895_v34 }
 0x8ca   : > { %3884 = vmatprep.subr.mxu1 %v7224_v33  ;;  %3224 = vmatprep.mubr.f32.mxu0 %v7896_v49 }
 0x8cb   : > { %3885 = vmatpush3.msra.mxu1 %v7897_v37 }
 0x8cc   : > { %v3135_v29 = vpop.permute.xlu1 %3134  ;;  %v7424_v27 = vpop.permute.xlu0 %3052  ;;  %3320 = vmatmul.mubr.f32.vlgmr.msra.gmra.mxu1 %v7898_v40 }
 0x8cd   : > { %3324 = vmatprep.mubr.f32.mxu1 %v7899_v28  ;;  %3225 = vmatmul.mubr.f32.gmra.mxu0 %v7900_v31  ;;  %v7934_v31 = vld [vmem:[#allocation120_spill] sm:$0xff] }
 0x8ce   : > { %3229 = vmatprep.mubr.f32.mxu0 %v7901_v43  ;;  %v7935_v43 = vld [vmem:[#allocation125_spill] sm:$0xff] }
 0x8d0   : > { %v3087_v17 = vpop.permute.xlu1 %3086  ;;  %v3005_v38 = vpop.permute.xlu0 %3004  ;;  %3325 = vmatmul.mubr.f32.gmra.mxu1 %v7902_v14  ;;  %v7937_v14 = vld [vmem:[#allocation119_spill] sm:$0xff] }
 0x8d1   : > { %3329 = vmatprep.mubr.f32.mxu1 %v7903_v3  ;;  %3230 = vmatmul.mubr.f32.gmra.mxu0 %v7904_v44  ;;  %v7938_v3 = vld [vmem:[#allocation118_spill] sm:$0xff]  ;;  %v7939_v44 = vld [vmem:[#allocation123_spill] sm:$0xff] }
 0x8d2   : > { %3234 = vmatprep.mubr.f32.mxu0 %v7905_v22 }
 0x8d4   : > { %v3137_v23 = vpop.permute.xlu1 %3136  ;;  %v3055_v57 = vpop.permute.xlu0 %3054  ;;  %3330 = vmatmul.mubr.f32.gmra.mxu1 %v7906_v0  ;;  %v7941_v0 = vld [vmem:[#allocation57_spill] sm:$0xff] }
 0x8d5   : > { %3334 = vmatprep.mubr.f32.mxu1 %v7907_v35  ;;  %3235 = vmatmul.mubr.f32.gmra.mxu0 %v7908_v25  ;;  %v7942_v35 = vld [vmem:[#allocation124_spill] sm:$0xff] }
 0x8d6   : > { %3239 = vmatprep.mubr.f32.mxu0 %v7909_v13  ;;  %v7943_v25 = vld [vmem:[#allocation56_spill] sm:$0xff]  ;;  %v7944_v13 = vld [vmem:[#allocation50_spill] sm:$0xff] }
 0x8d8   : > { %v3089_v56 = vpop.permute.xlu1 %3088  ;;  %v3007_v18 = vpop.permute.xlu0 %3006  ;;  %3335 = vmatmul.mubr.f32.gmra.mxu1 %v7910_v8  ;;  %v7947_v8 = vld [vmem:[#allocation64_spill] sm:$0xff] }
 0x8d9   : > { %3339 = vmatprep.mubr.f32.mxu1 %v7911_v6  ;;  %3240 = vmatmul.mubr.f32.gmra.mxu0 %v7912_v19  ;;  %v7948_v6 = vld [vmem:[#allocation58_spill] sm:$0xff]  ;;  %v7949_v19 = vld [vmem:[#allocation73_spill] sm:$0xff] }
 0x8da   : > { %3244 = vmatprep.mubr.f32.mxu0 %v7913_v59  ;;  %v7951_v59 = vld [vmem:[#allocation72_spill] sm:$0xff] }
 0x8dc   : > { %v3139_v11 = vpop.permute.xlu1 %3138  ;;  %v3057_v33 = vpop.permute.xlu0 %3056  ;;  %3340 = vmatmul.mubr.f32.gmra.mxu1 %v7914_v32  ;;  %v7954_v32 = vld [vmem:[#allocation75_spill] sm:$0xff] }
 0x8dd   : > { %3344 = vmatprep.mubr.f32.mxu1 %v7915_v21  ;;  %3245 = vmatmul.mubr.f32.gmra.mxu0 %v7916_v4  ;;  %v7955_v21 = vld [vmem:[#allocation80_spill] sm:$0xff]  ;;  %v7956_v4 = vld [vmem:[#allocation74_spill] sm:$0xff] }
 0x8de   : > { %3249 = vmatprep.mubr.f32.mxu0 %v7917_v2  ;;  %v7957_v2 = vld [vmem:[#allocation89_spill] sm:$0xff] }
 0x8e0   : > { %v3091_v46 = vpop.permute.xlu1 %3090  ;;  %v3009_v20 = vpop.permute.xlu0 %3008  ;;  %3345 = vmatmul.mubr.f32.gmra.mxu1 %v7918_v42  ;;  %v7960_v42 = vld [vmem:[#allocation82_spill] sm:$0xff] }
 0x8e1   : > { %3349 = vmatprep.mubr.f32.mxu1 %v7919_v1  ;;  %3250 = vmatmul.mubr.f32.gmra.mxu0 %v7920_v48  ;;  %v7961_v1 = vld [vmem:[#allocation97_spill] sm:$0xff]  ;;  %v7962_v48 = vld [vmem:[#allocation91_spill] sm:$0xff] }
 0x8e2   : > { %3424 = vmatprep.mubr.f32.mxu0 %v7921_v36  ;;  %v7963_v36 = vld [vmem:[#allocation96_spill] sm:$0xff] }
 0x8e4   : > { %v3013_v41 = vpop.permute.xlu1 %3012  ;;  %v3059_v30 = vpop.permute.xlu0 %3058  ;;  %3350 = vmatmul.mubr.f32.gmra.mxu1 %v7922_v9  ;;  %v7966_v9 = vld [vmem:[#allocation99_spill] sm:$0xff] }
 0x8e5   : > { %3354 = vmatprep.mubr.f32.mxu1 %v7923_v47  ;;  %v7967_v47 = vld [vmem:[#allocation104_spill] sm:$0xff] }
 0x8e8   : > { %v3141_v50 = vpop.permute.xlu1 %3140  ;;  %v3011_v52 = vpop.permute.xlu0 %3010  ;;  %3355 = vmatmul.mubr.f32.gmra.mxu1 %v7924_v16  ;;  %v7970_v16 = vld [vmem:[#allocation106_spill] sm:$0xff] }
 0x8e9   : > { %3966 = vmatprep.subr.mxu1 %v3141_v50  ;;  %3529 = vmatprep.mubr.f32.mxu1 %v7925_v24  ;;  %v7968_v50 = vld [vmem:[#allocation98_spill] sm:$0xff]  ;;  %v4314_v24 = vmov 0  }
 0x8ea   : > { %4146 = vset.pattern.permute.xlu0 %v4314_v24  ;;  %4147 = vset.pattern.permute.xlu1 %v4314_v24 }
 0x8ec   : > { %v3093_v10 = vpop.permute.xlu1 %3092  ;;  %v3061_v39 = vpop.permute.xlu0 %3060 }
 0x8ed   : > { %3910 = vmatprep.subr.mxu0 %v3061_v39  ;;  %3967 = vmatpush3.msra.mxu1 %v3093_v10 }
 0x8ee   : > { %3911 = vmatpush3.msra.mxu0 %v3013_v41  ;;  %3968 = vmatprep.subr.mxu1 %v3139_v11  ;;  %v7952_v11 = vld [vmem:[#allocation66_spill] sm:$0xff] }
 0x8ef   : > { %3912 = vmatprep.subr.mxu0 %v3059_v30  ;;  %3969 = vmatpush3.msra.mxu1 %v3091_v46  ;;  %v7958_v46 = vld [vmem:[#allocation83_spill] sm:$0xff]  ;;  %v7964_v41 = vld [vmem:[#allocation90_spill] sm:$0xff]  ;;  %v7965_v30 = vld [vmem:[#allocation105_spill] sm:$0xff] }
 0x8f0   : > { %v3035_v34 = vpop.permute.xlu1 %3034  ;;  %3913 = vmatpush3.msra.mxu0 %v3011_v52  ;;  %3970 = vmatprep.subr.mxu1 %v3137_v23  ;;  %v3037_v49 = vpop.permute.xlu0 %3036  ;;  %v7940_v23 = vld [vmem:[#allocation48_spill] sm:$0xff]  ;;  %v7969_v52 = vld [vmem:[#allocation107_spill] sm:$0xff] }
 0x8f1   : > { %3914 = vmatprep.subr.mxu0 %v3057_v33  ;;  %3971 = vmatpush3.msra.mxu1 %v3089_v56  ;;  %v7945_v56 = vld [vmem:[#allocation65_spill] sm:$0xff] }
 0x8f2   : > { %3915 = vmatpush3.msra.mxu0 %v3009_v20  ;;  %3972 = vmatprep.subr.mxu1 %v3135_v29  ;;  %v7953_v33 = vld [vmem:[#allocation81_spill] sm:$0xff]  ;;  %v7959_v20 = vld [vmem:[#allocation88_spill] sm:$0xff] }
 0x8f3   : > { %3916 = vmatprep.subr.mxu0 %v3055_v57  ;;  %3973 = vmatpush3.msra.mxu1 %v3087_v17 }
 0x8f4   : > { %v3033_v37 = vpop.permute.xlu1 %3032  ;;  %3917 = vmatpush3.msra.mxu0 %v3007_v18  ;;  %3974 = vmatprep.subr.mxu1 %v7403_v45  ;;  %v3115_v40 = vpop.permute.xlu0 %3114  ;;  %v7926_v45 = vld [vmem:[#allocation131_spill] sm:$0xff] }
 0x8f5   : > { %3918 = vmatprep.subr.mxu0 %v7424_v27  ;;  %3975 = vmatpush3.msra.mxu1 %v7414_v55  ;;  %v7932_v55 = vld [vmem:[#allocation126_spill] sm:$0xff]  ;;  %v7946_v18 = vld [vmem:[#allocation59_spill] sm:$0xff] }
 0x8f6   : > { %3919 = vmatpush3.msra.mxu0 %v3005_v38  ;;  %3976 = vmatprep.subr.mxu1 %v7381_v53  ;;  %v7936_v38 = vld [vmem:[#allocation121_spill] sm:$0xff] }
 0x8f7   : > { %3920 = vmatprep.subr.mxu0 %v7407_v26  ;;  %3977 = vmatpush3.msra.mxu1 %v7391_v63 }
 0x8f8   : > { %v3031_v28 = vpop.permute.xlu1 %3030  ;;  %3921 = vmatpush3.msra.mxu0 %v7417_v62  ;;  %3978 = vmatprep.subr.mxu1 %v7360_v54  ;;  %v3113_v29 = vpop.permute.xlu0 %3112  ;;  %v7933_v62 = vld [vmem:[#allocation127_spill] sm:$0xff] }
 0x8f9   : > { %3922 = vmatprep.subr.mxu0 %v7384_v12  ;;  %3979 = vmatpush3.msra.mxu1 %v7370_v5  ;;  %v7927_v12 = vld [vmem:[#allocation132_spill] sm:$0xff] }
 0x8fa   : > { %3923 = vmatpush3.msra.mxu0 %v7395_v61  ;;  %3980 = vmatprep.subr.mxu1 %v7351_v51  ;;  %v7928_v61 = vld [vmem:[#allocation130_spill] sm:$0xff]  ;;  %v7929_v51 = vld [vmem:[#allocation133_spill] sm:$0xff] }
 0x8fb   : > { %3924 = vmatprep.subr.mxu0 %v7354_v7  ;;  %3981 = vmatpush3.msra.mxu1 %v7373_v58  ;;  %v7930_v58 = vld [vmem:[#allocation128_spill] sm:$0xff] }
 0x8fc   : > { %v3029_v53 = vpop.permute.xlu1 %3028  ;;  %3925 = vmatpush3.msra.mxu0 %v7363_v60  ;;  %v3111_v63 = vpop.permute.xlu0 %3110  ;;  %v7931_v60 = vld [vmem:[#allocation129_spill] sm:$0xff] }
 0x8fd   : > { %3926 = vmatprep.subr.mxu0 %v3037_v49 }
 0x8fe   : > { %3927 = vmatpush3.msra.mxu0 %v7926_v45 }
 0x8ff   : > { %3928 = vmatprep.subr.mxu0 %v3035_v34 }
 0x900   : > { %v3027_v54 = vpop.permute.xlu1 %3026  ;;  %3929 = vmatpush3.msra.mxu0 %v7927_v12  ;;  %v3117_v5 = vpop.permute.xlu0 %3116 }
 0x901   : > { %3930 = vmatprep.subr.mxu0 %v3033_v37  ;;  %3982 = vmatprep.subr.mxu1 %v3117_v5 }
 0x902   : > { %3931 = vmatpush3.msra.mxu0 %v7928_v61  ;;  %3983 = vmatpush3.msra.mxu1 %v7929_v51 }
 0x903   : > { %3932 = vmatprep.subr.mxu0 %v3031_v28  ;;  %3984 = vmatprep.subr.mxu1 %v3115_v40 }
 0x904   : > { %v3025_v7 = vpop.permute.xlu1 %3024  ;;  %3933 = vmatpush3.msra.mxu0 %v7930_v58  ;;  %3985 = vmatpush3.msra.mxu1 %v7931_v60  ;;  %v3109_v26 = vpop.permute.xlu0 %3108 }
 0x905   : > { %3934 = vmatprep.subr.mxu0 %v3029_v53  ;;  %3986 = vmatprep.subr.mxu1 %v3113_v29 }
 0x906   : > { %3935 = vmatpush3.msra.mxu0 %v7932_v55  ;;  %3987 = vmatpush3.msra.mxu1 %v7933_v62 }
 0x907   : > { %3936 = vmatprep.subr.mxu0 %v3027_v54  ;;  %3988 = vmatprep.subr.mxu1 %v3111_v63 }
 0x908   : > { %v3023_v27 = vpop.permute.xlu1 %3022  ;;  %3937 = vmatpush3.msra.mxu0 %v7934_v31  ;;  %3989 = vmatpush3.msra.mxu1 %v7935_v43  ;;  %v3107_v17 = vpop.permute.xlu0 %3106 }
 0x909   : > { %3938 = vmatprep.subr.mxu0 %v3025_v7  ;;  %3990 = vmatprep.subr.mxu1 %v3109_v26 }
 0x90a   : > { %3939 = vmatpush3.msra.mxu0 %v7936_v38  ;;  %3991 = vmatpush3.msra.mxu1 %v7937_v14 }
 0x90b   : > { %3940 = vmatprep.subr.mxu0 %v3023_v27  ;;  %3992 = vmatprep.subr.mxu1 %v3107_v17 }
 0x90c   : > { %3941 = vmatpush3.msra.mxu0 %v7938_v3  ;;  %3993 = vmatpush3.msra.mxu1 %v7939_v44  ;;  %v3105_v22 = vpop.permute.xlu0 %3104  ;;  %v3103_v57 = vpop.permute.xlu1 %3102 }
 0x90d   : > { %3425 = vmatmul.mubr.f32.vlgmr.msra.gmra.mxu0 %v7940_v23  ;;  %3994 = vmatprep.subr.mxu1 %v3105_v22 }
 0x90e   : > { %3995 = vmatpush3.msra.mxu1 %v7174_v15  ;;  %3429 = vmatprep.mubr.f32.mxu0 %v7941_v0  ;;  %v7950_v15 = vld [vmem:[#allocation67_spill] sm:$0xff] }
 0x90f   : > { %3996 = vmatprep.subr.mxu1 %v3103_v57 }
 0x910   : > { %3997 = vmatpush3.msra.mxu1 %v7942_v35 }
 0x911   : > { %3430 = vmatmul.mubr.f32.gmra.mxu0 %v7943_v25  ;;  %3530 = vmatmul.mubr.f32.vlgmr.msra.gmra.mxu1 %v7944_v13 }
 0x912   : > { %3434 = vmatprep.mubr.f32.mxu0 %v7945_v56  ;;  %3534 = vmatprep.mubr.f32.mxu1 %v7946_v18 }
 0x915   : > { %3435 = vmatmul.mubr.f32.gmra.mxu0 %v7947_v8  ;;  %3535 = vmatmul.mubr.f32.gmra.mxu1 %v7948_v6 }
 0x916   : > { %3439 = vmatprep.mubr.f32.mxu0 %v7949_v19  ;;  %3539 = vmatprep.mubr.f32.mxu1 %v7950_v15 }
 0x919   : > { %3440 = vmatmul.mubr.f32.gmra.mxu0 %v7951_v59  ;;  %3540 = vmatmul.mubr.f32.gmra.mxu1 %v7952_v11 }
 0x91a   : > { %3444 = vmatprep.mubr.f32.mxu0 %v7953_v33  ;;  %3544 = vmatprep.mubr.f32.mxu1 %v7954_v32 }
 0x91d   : > { %3445 = vmatmul.mubr.f32.gmra.mxu0 %v7955_v21  ;;  %3545 = vmatmul.mubr.f32.gmra.mxu1 %v7956_v4 }
 0x91e   : > { %3449 = vmatprep.mubr.f32.mxu0 %v7957_v2  ;;  %3549 = vmatprep.mubr.f32.mxu1 %v7958_v46 }
 0x921   : > { %3450 = vmatmul.mubr.f32.gmra.mxu0 %v7959_v20  ;;  %3550 = vmatmul.mubr.f32.gmra.mxu1 %v7960_v42 }
 0x922   : > { %3454 = vmatprep.mubr.f32.mxu0 %v7961_v1  ;;  %3554 = vmatprep.mubr.f32.mxu1 %v7962_v48 }
 0x925   : > { %3455 = vmatmul.mubr.f32.gmra.mxu0 %v7963_v36  ;;  %3555 = vmatmul.mubr.f32.gmra.mxu1 %v7964_v41 }
 0x926   : > { %3459 = vmatprep.mubr.f32.mxu0 %v7965_v30  ;;  %3559 = vmatprep.mubr.f32.mxu1 %v7966_v9 }
 0x929   : > { %3460 = vmatmul.mubr.f32.gmra.mxu0 %v7967_v47  ;;  %3560 = vmatmul.mubr.f32.gmra.mxu1 %v7968_v50 }
 0x92a   : > { %3564 = vmatprep.mubr.f32.mxu1 %v7969_v52 }
 0x92d   : > { %3565 = vmatmul.mubr.f32.gmra.mxu1 %v7970_v16 }
 0x985   : > { %v3830_v10 = vpop.f32.mrf.mxu0 }
 0x987   : > { %v3831_v39 = vpop.f32.mrf.mxu0 }
 0x988   : > { %v3832_v57 = vadd.f32 %v3831_v39, %v3830_v10 }
 0x989   : > { %v3833_v49 = vpop.f32.mrf.mxu0 }
 0x98b   : > { %v3834_v40 = vpop.f32.mrf.mxu0 }
 0x98c   : > { %v3886_v34 = vpop.f32.mrf.mxu1  ;;  %v3835_v6 = vadd.f32 %v3834_v40, %v3833_v49 }
 0x98d   : > { %v3836_v29 = vpop.f32.mrf.mxu0 }
 0x98e   : > { %v3887_v37 = vpop.f32.mrf.mxu1 }
 0x98f   : > { %v3837_v63 = vpop.f32.mrf.mxu0  ;;  %v3888_v0 = vadd.f32 %v3887_v37, %v3886_v34 }
 0x990   : > { %v3889_v28 = vpop.f32.mrf.mxu1  ;;  %v3838_v46 = vadd.f32 %v3837_v63, %v3836_v29 }
 0x991   : > { %v3839_v54 = vpop.f32.mrf.mxu0  ;;  %v3322_v8 = vadd.f32 %v3888_v0, %v3832_v57 }
 0x992   : > { %v3890_v53 = vpop.f32.mrf.mxu1 }
 0x993   : > { %v3840_v5 = vpop.f32.mrf.mxu0  ;;  %v3891_v19 = vadd.f32 %v3890_v53, %v3889_v28 }
 0x994   : > { %v3892_v45 = vpop.f32.mrf.mxu1  ;;  %v3841_v16 = vadd.f32 %v3840_v5, %v3839_v54 }
 0x995   : > { %v3842_v51 = vpop.f32.mrf.mxu0  ;;  %v3327_v2 = vadd.f32 %v3891_v19, %v3835_v6 }
 0x996   : > { %v3893_v12 = vpop.f32.mrf.mxu1 }
 0x997   : > { %v3843_v58 = vpop.f32.mrf.mxu0  ;;  %v3894_v20 = vadd.f32 %v3893_v12, %v3892_v45 }
 0x998   : > { %v3895_v61 = vpop.f32.mrf.mxu1  ;;  %v3844_v45 = vadd.f32 %v3843_v58, %v3842_v51 }
 0x999   : > { %v7515_v26 = vpop.f32.mrf.mxu0  ;;  %v3332_v52 = vadd.f32 %v3894_v20, %v3838_v46 }
 0x99a   : > { %v3896_v7 = vpop.f32.mrf.mxu1 }
 0x99b   : > { %v7517_v62 = vpop.f32.mrf.mxu0  ;;  %v3897_v24 = vadd.f32 %v3896_v7, %v3895_v61 }
 0x99c   : > { %v3898_v60 = vpop.f32.mrf.mxu1 }
 0x99d   : > { %v7521_v31 = vpop.f32.mrf.mxu0  ;;  %v3337_v63 = vadd.f32 %v3897_v24, %v3841_v16 }
 0x99e   : > { %v3899_v55 = vpop.f32.mrf.mxu1 }
 0x99f   : > { %v7525_v17 = vpop.f32.mrf.mxu0  ;;  %v3900_v12 = vadd.f32 %v3899_v55, %v3898_v60 }
 0x9a0   : > { %v7519_v27 = vpop.f32.mrf.mxu1 }
 0x9a1   : > { %v7529_v14 = vpop.f32.mrf.mxu0 }
 0x9a2   : > { %v7523_v43 = vpop.f32.mrf.mxu1 }
 0x9a3   : > { %v7533_v44 = vpop.f32.mrf.mxu0 }
 0x9a4   : > { %v7527_v38 = vpop.f32.mrf.mxu1 }
 0x9a6   : > { %v7531_v3 = vpop.f32.mrf.mxu1 }
 0x9a8   : > { %v7535_v22 = vpop.f32.mrf.mxu1 }
 0x9aa   : > { %v7537_v35 = vpop.f32.mrf.mxu1 }
 0x9cd   : > { %v3942_v23 = vpop.f32.mrf.mxu0 }
 0x9cf   : > { %v3943_v25 = vpop.f32.mrf.mxu0 }
 0x9d0   : > { %v3944_v13 = vadd.f32 %v3943_v25, %v3942_v23 }
 0x9d1   : > { %v3945_v56 = vpop.f32.mrf.mxu0  ;;  %v3998_v18 = vpop.f32.mrf.mxu1 }
 0x9d2   : > { %v3427_v11 = vadd.f32 %v3944_v13, %v3322_v8  ;;  %v3903_v8 = vadd.f32 %v7523_v43, %v7519_v27 }
 0x9d3   : > { %v3946_v15 = vpop.f32.mrf.mxu0  ;;  %v3999_v59 = vpop.f32.mrf.mxu1 }
 0x9d4   : > { %v3947_v33 = vadd.f32 %v3946_v15, %v3945_v56  ;;  %v4000_v32 = vadd.f32 %v3999_v59, %v3998_v18  ;;  %v3342_v56 = vadd.f32 %v3900_v12, %v3844_v45  ;;  %v3847_v18 = vadd.f32 %v7517_v62, %v7515_v26  ;;  %v7974_v45 = vld [vmem:[#allocation116_spill] sm:$0xff] }
 0x9d5   : > { %v3948_v21 = vpop.f32.mrf.mxu0  ;;  %v4001_v4 = vpop.f32.mrf.mxu1  ;;  %v3906_v26 = vadd.f32 %v7531_v3, %v7527_v38 }
 0x9d6   : > { %v3532_v42 = vadd.f32 %v4000_v32, %v3427_v11  ;;  %v3432_v36 = vadd.f32 %v3947_v33, %v3327_v2  ;;  %v3347_v33 = vadd.f32 %v3903_v8, %v3847_v18  ;;  %v3850_v32 = vadd.f32 %v7525_v17, %v7521_v31  ;;  %v7977_v18 = vld [vmem:[#allocation113_spill] sm:$0xff] }
 0x9d7   : > { %v3949_v1 = vpop.f32.mrf.mxu0  ;;  %v4002_v48 = vpop.f32.mrf.mxu1  ;;  %v3909_v31 = vadd.f32 %v7537_v35, %v7535_v22  ;;  %v3578_v35 = vstv %s4290_s3  ;;  %s171_s3 = sadd.s32 1, %s4290_s3  }
 0x9d8   : > { %v3570_v41 = vmax.f32 %v3532_v42, 0.0  ;;  %v3950_v30 = vadd.f32 %v3949_v1, %v3948_v21  ;;  %v4003_v9 = vadd.f32 %v4002_v48, %v4001_v4  ;;  %v3352_v1 = vadd.f32 %v3906_v26, %v3850_v32  ;;  %v7980_v32 = vld [vmem:[#allocation110_spill] sm:$0xff]  ;;  %p168_p1 = scmp.ge.s32.totalorder %s171_s3, 2  }
 0x9d9   : > { %v3951_v47 = vpop.f32.mrf.mxu0  ;;  %v4004_v50 = vpop.f32.mrf.mxu1  ;;  %v3853_v48 = vadd.f32 %v7533_v44, %v7529_v14  ;;  %vm3720_vm8 = vcmask (%p168_p1), 15360  }
 0x9da   : > { %v3537_v10 = vadd.f32 %v4003_v9, %v3432_v36  ;;  %3584 = vperm.xlu0 %4146, %v3570_v41   ;;  %v3437_v49 = vadd.f32 %v3950_v30, %v3332_v52 }
 0x9db   : > { %v3952_v39 = vpop.f32.mrf.mxu0  ;;  %v4005_v34 = vpop.f32.mrf.mxu1 }
 0x9dc   : > { %v3571_v37 = vmax.f32 %v3537_v10, 0.0  ;;  %v3953_v40 = vadd.f32 %v3952_v39, %v3951_v47  ;;  %v4006_v28 = vadd.f32 %v4005_v34, %v4004_v50  ;;  %v3357_v50 = vadd.f32 %v3909_v31, %v3853_v48  ;;  %v7971_v39 = vld [vmem:[#allocation9_spill] sm:$0xff] }
 0x9dd   : > { %v3954_v29 = vpop.f32.mrf.mxu0  ;;  %v4007_v53 = vpop.f32.mrf.mxu1  ;;  %vm3579_vm7 = vcmp.eq.s32.totalorder %v7971_v39, %v3578_v35  ;;  %v7972_v34 = vmov 0.0  }
 0x9de   : > { %v3542_v23 = vadd.f32 %v4006_v28, %v3437_v49  ;;  %3589 = vperm.xlu1 %4147, %v3571_v37   ;;  %v3442_v25 = vadd.f32 %v3953_v40, %v3337_v63  ;;  %v3794_v49 = vsel %vm3579_vm7, 1.0, %v7972_v34  ;;  %v7973_v28 = vld [vmem:[#allocation117_spill] sm:$0xff] }
 0x9df   : > { %v3955_v57 = vpop.f32.mrf.mxu0  ;;  %v4008_v0 = vpop.f32.mrf.mxu1 }
 0x9e0   : > { %v3572_v54 = vmax.f32 %v3542_v23, 0.0  ;;  %v3956_v5 = vadd.f32 %v3955_v57, %v3954_v29  ;;  %v4009_v61 = vadd.f32 %v4008_v0, %v4007_v53  ;;  %v7975_v0 = vld [vmem:[#allocation115_spill] sm:$0xff] }
 0x9e1   : > { %v3957_v7 = vpop.f32.mrf.mxu0  ;;  %v4010_v13 = vpop.f32.mrf.mxu1 }
 0x9e2   : > { %v3547_v6 = vadd.f32 %v4009_v61, %v3442_v25  ;;  %3594 = vperm.xlu1 %4147, %v3572_v54   ;;  %v3447_v60 = vadd.f32 %v3956_v5, %v3342_v56  ;;  %v7976_v61 = vld [vmem:[#allocation114_spill] sm:$0xff] }
 0x9e3   : > { %v3958_v51 = vpop.f32.mrf.mxu0  ;;  %v4011_v58 = vpop.f32.mrf.mxu1 }
 0x9e4   : > { %v3573_v55 = vmax.f32 %v3547_v6, 0.0  ;;  %v3959_v19 = vadd.f32 %v3958_v51, %v3957_v7  ;;  %v4012_v15 = vadd.f32 %v4011_v58, %v4010_v13  ;;  %v7978_v58 = vld [vmem:[#allocation112_spill] sm:$0xff] }
 0x9e5   : > { %v3960_v59 = vpop.f32.mrf.mxu0  ;;  %v4013_v11 = vpop.f32.mrf.mxu1 }
 0x9e6   : > { %v3552_v62 = vadd.f32 %v4012_v15, %v3447_v60  ;;  %3599 = vperm.xlu0 %4146, %v3573_v55   ;;  %v3452_v21 = vadd.f32 %v3959_v19, %v3347_v33  ;;  %v7979_v15 = vld [vmem:[#allocation111_spill] sm:$0xff] }
 0x9e7   : > { %v3961_v27 = vpop.f32.mrf.mxu0  ;;  %v4014_v43 = vpop.f32.mrf.mxu1 }
 0x9e8   : > { %v3574_v4 = vmax.f32 %v3552_v62, 0.0  ;;  %v3962_v2 = vadd.f32 %v3961_v27, %v3960_v59  ;;  %v4015_v46 = vadd.f32 %v4014_v43, %v4013_v11  ;;  %v7989_v62 = vld [vmem:[#allocation108_spill] sm:$0xff] (%p168_p1)  ;;  %v7990_v27 = vld [vmem:[#allocation109_spill] sm:$0xff] (%p168_p1) }
 0x9e9   : > { %v3963_v20 = vpop.f32.mrf.mxu0  ;;  %v4016_v42 = vpop.f32.mrf.mxu1  ;;  %4048 = vmatprep.mubr.msk.f32.mxu0 (%p168_p1), %vm419_vm2, %v7989_v62 }
 0x9ea   : > { %v3557_v17 = vadd.f32 %v4015_v46, %v3452_v21  ;;  %3604 = vperm.xlu1 %4147, %v3574_v4   ;;  %v3457_v36 = vadd.f32 %v3962_v2, %v3352_v1 }
 0x9eb   : > { %v3964_v38 = vpop.f32.mrf.mxu0  ;;  %v4017_v3 = vpop.f32.mrf.mxu1 }
 0x9ec   : > { %v3575_v41 = vmax.f32 %v3557_v17, 0.0  ;;  %v3965_v30 = vadd.f32 %v3964_v38, %v3963_v20  ;;  %v4018_v9 = vadd.f32 %v4017_v3, %v4016_v42 }
 0x9ed   : > { %v4019_v47 = vpop.f32.mrf.mxu1 }
 0x9ee   : > { %v3562_v52 = vadd.f32 %v4018_v9, %v3457_v36  ;;  %3609 = vperm.xlu0 %4146, %v3575_v41   ;;  %v3462_v24 = vadd.f32 %v3965_v30, %v3357_v50 }
 0x9ef   : > { %v4020_v16 = vpop.f32.mrf.mxu1 }
 0x9f0   : > { %v3576_v10 = vmax.f32 %v3562_v52, 0.0  ;;  %v4021_v14 = vadd.f32 %v4020_v16, %v4019_v47 }
 0x9f2   : > { %v3567_v44 = vadd.f32 %v4021_v14, %v3462_v24  ;;  %3614 = vperm.xlu1 %4147, %v3576_v10  }
 0x9f4   : > { %v3577_v22 = vmax.f32 %v3567_v44, 0.0 }
 0x9f6   : > { %3619 = vperm.xlu0 %4146, %v3577_v22  }
 0xa55   : > { %v3585_v37 = vpop.permute.xlu0 %3584 }
 0xa56   : > { %v3622_v40 = vmul.f32 %v3794_v49, %v3585_v37 }
 0xa58   : > { %v3630_v29 = vadd.f32 %v7973_v28, %v3622_v40  }
 0xa59   : > { %v3590_v53 = vpop.permute.xlu1 %3589 }
 0xa5a   : > { %v3623_v63 = vmul.f32 %v3794_v49, %v3590_v53  ;;  %v7988_v1 = vmov %v3630_v29 }
 0xa5c   : > { %v3631_v12 = vadd.f32 %v7974_v45, %v3623_v63  }
 0xa5d   : > { %v3595_v23 = vpop.permute.xlu1 %3594 }
 0xa5e   : > { %v3624_v57 = vmul.f32 %v3794_v49, %v3595_v23 }
 0xa60   : > { %v3632_v25 = vadd.f32 %v7975_v0, %v3624_v57   ;;  %v7987_v0 = vmov %v3631_v12 }
 0xa61   : > { %v3600_v54 = vpop.permute.xlu0 %3599 }
 0xa62   : > { %v3625_v5 = vmul.f32 %v3794_v49, %v3600_v54 }
 0xa64   : > { %v3633_v7 = vadd.f32 %v7976_v61, %v3625_v5  }
 0xa65   : > { %v3605_v13 = vpop.permute.xlu1 %3604 }
 0xa66   : > { %v3626_v56 = vmul.f32 %v3794_v49, %v3605_v13  ;;  %v7985_v48 = vmov %v3633_v7 }
 0xa68   : > { %v3634_v8 = vadd.f32 %v7977_v18, %v3626_v56  }
 0xa69   : > { %v3610_v6 = vpop.permute.xlu0 %3609 }
 0xa6a   : > { %v3627_v51 = vmul.f32 %v3794_v49, %v3610_v6  ;;  %v7984_v42 = vmov %v3634_v8 }
 0xa6c   : > { %v3635_v60 = vadd.f32 %v7978_v58, %v3627_v51  }
 0xa6d   : > { %v3615_v55 = vpop.permute.xlu1 %3614 }
 0xa6e   : > { %v3628_v19 = vmul.f32 %v3794_v49, %v3615_v55 }
 0xa70   : > { %v3636_v11 = vadd.f32 %v7979_v15, %v3628_v19  }
 0xa71   : > { %v3620_v59 = vpop.permute.xlu0 %3619 }
 0xa72   : > { %v3629_v33 = vmul.f32 %v3794_v49, %v3620_v59  ;;  %v7982_v41 = vmov %v3636_v11  ;;  %v7983_v59 = vmov %v3635_v60  ;;  %v7986_v49 = vmov %v3632_v25  ;;  %170 = sbr.rel (!%p168_p1) target bundleno = 91 (0x5b), region = 64 }
 0xa74   : > { %v3637_v26 = vadd.f32 %v7980_v32, %v3629_v33  }
 0xa76   : > { %v7981_v43 = vmov %v3637_v26  ;;  %4032 = vmatprep.subr.mxu0 (%p168_p1), %v3637_v26 }
 0xa77   :  { %4033 = vmatpush3.msra.mxu0 %v3637_v26 }
 0xa78   :  { %4034 = vmatprep.subr.mxu0 %v3636_v11 }
 0xa79   :  { %4035 = vmatpush3.msra.mxu0 %v3636_v11 }
 0xa7a   :  { %4036 = vmatprep.subr.mxu0 %v3635_v60 }
 0xa7b   :  { %4037 = vmatpush3.msra.mxu0 %v3635_v60 }
 0xa7c   :  { %4038 = vmatprep.subr.mxu0 %v3634_v8 }
 0xa7d   :  { %4039 = vmatpush3.msra.mxu0 %v3634_v8 }
 0xa7e   :  { %4040 = vmatprep.subr.mxu0 %v3633_v7 }
 0xa7f   :  { %4041 = vmatpush3.msra.mxu0 %v3633_v7 }
 0xa80   :  { %4042 = vmatprep.subr.mxu0 %v3632_v25 }
 0xa81   :  { %4043 = vmatpush3.msra.mxu0 %v3632_v25 }
 0xa82   :  { %4044 = vmatprep.subr.mxu0 %v3631_v12 }
 0xa83   :  { %4045 = vmatpush3.msra.mxu0 %v3631_v12 }
 0xa84   :  { %4046 = vmatprep.subr.mxu0 %v3630_v29 }
 0xa85   :  { %4047 = vmatpush3.msra.mxu0 %v3630_v29 }
 0xa86   :  { %4049 = vmatmul.mubr.msk.f32.vlgmr.msra.gmra.mxu0 %vm419_vm2, %v7990_v27 }
 0xb46   :  { %v4050_v43 = vpop.f32.mrf.mxu0 }
 0xb47   :  { %3722 = vst.msk [vmem:[%s7597_s6 + $0x8] sm:$0xff] %vm3720_vm8, %v4050_v43 }
 0xb48   :  { %v3711_v21 = vpop.f32.mrf.mxu0 }
 0xb49   :  { %3721 = vst.msk [vmem:[%s7597_s6] sm:$0xff] %vm3720_vm8, %v3711_v21 }
 0xb4a   :  { %3727 = vsyncpa [#allocation3], 1 }
 0xb4b   :  { %3728 = vsyncpa [#allocation5], 1 }

</bundles_post_ra>
